<compile_context>
chip_gen: v6e
topology: v6e:2x2x1
jax: 0.10.0
libtpu: 0.0.40
codegen_flags: <defaults>
</compile_context>

<pallas_src>
import functools

import jax
import jax.numpy as jnp
from jax import lax
from jax.experimental import pallas as pl
from jax.experimental.pallas import tpu as pltpu


def _vmem_limit_bytes():
    try:
        cap = int(pltpu.get_tpu_info().vmem_capacity_bytes)
    except Exception:
        cap = 128 * 1024 * 1024
    return max(32 * 1024 * 1024, (cap * 3) // 4)


_VMEM_LIMIT = _vmem_limit_bytes()


def _cparams():
    return pltpu.CompilerParams(dimension_semantics=("parallel",),
                                vmem_limit_bytes=_VMEM_LIMIT)


def _pspec(shape):
    n = len(shape)
    return pl.BlockSpec(shape, lambda b, _n=n: (0,) * _n)


# -----------------------------------------------------------------------------
# Kernel 1: phase-decomposed ConvTranspose2d(3, pad=1, stride=2) + BN + ReLU
# -----------------------------------------------------------------------------
def _up_kernel(x1_ref, w_ref, s_ref, b_ref, o_ref, *, H1, W1, C):
    """x1_ref: (H1, W1, C) bf16; w_ref: (9, C, C) bf16 flipped taps (kh*3+kw);
    s_ref/b_ref: (1, C) f32 folded BN.
    o_ref: (2*H1, W1, 2*C) bf16 where o_ref[2i+s, j, t*C+c] = out[2i+s, 2j+t, c]
    (so a pure row-major reshape outside yields the interleaved image)."""
    x2d = x1_ref[...].reshape(H1 * W1, C)
    scale = s_ref[...]
    bias = b_ref[...]

    def tap(t):
        return jnp.dot(x2d, w_ref[t],
                       preferred_element_type=jnp.float32).reshape(H1, W1, C)

    def act(v):  # folded BN + ReLU, f32 epilogue
        return jnp.maximum(v * scale + bias, 0.0)

    ee = act(tap(4))                                              # (H1,   W1,   C)
    eo = act(tap(3)[:, :W1 - 1] + tap(5)[:, 1:])                  # (H1,   W1-1, C)
    oe = act(tap(1)[:H1 - 1] + tap(7)[1:])                        # (H1-1, W1,   C)
    oo = act(tap(0)[:H1 - 1, :W1 - 1] + tap(2)[:H1 - 1, 1:]
             + tap(6)[1:, :W1 - 1] + tap(8)[1:, 1:])              # (H1-1, W1-1, C)

    # Zero columns/rows are exactly the F.pad(0, diffX, 0, diffY) region.
    eo_p = jnp.concatenate([eo, jnp.zeros((H1, 1, C), jnp.float32)], axis=1)
    oo_p = jnp.concatenate([oo, jnp.zeros((H1 - 1, 1, C), jnp.float32)], axis=1)
    even = jnp.concatenate([ee, eo_p], axis=-1)                   # (H1,   W1, 2C)
    odd = jnp.concatenate(
        [jnp.concatenate([oe, oo_p], axis=-1),
         jnp.zeros((1, W1, 2 * C), jnp.float32)], axis=0)         # (H1,   W1, 2C)

    inter = jnp.concatenate([even[:, None], odd[:, None]],
                            axis=1).reshape(2 * H1, W1, 2 * C)    # row-parity interleave
    o_ref[...] = inter.astype(o_ref.dtype)


def up_block(x1, w, scale, bias, H2, W2):
    """x1: (B, H1, W1, C) -> F.pad-ed upsample output (B, H2, W2, C) bf16."""
    B, H1, W1, C = x1.shape
    kernel = functools.partial(_up_kernel, H1=H1, W1=W1, C=C)
    phases = pl.pallas_call(
        kernel,
        grid=(B,),
        in_specs=[
            pl.BlockSpec((None, H1, W1, C), lambda b: (b, 0, 0, 0)),
            _pspec((9, C, C)),
            _pspec((1, C)),
            _pspec((1, C)),
        ],
        out_specs=pl.BlockSpec((None, 2 * H1, W1, 2 * C),
                               lambda b: (b, 0, 0, 0)),
        out_shape=jax.ShapeDtypeStruct((B, 2 * H1, W1, 2 * C), jnp.bfloat16),
        compiler_params=_cparams(),
    )(x1.astype(jnp.bfloat16), w.astype(jnp.bfloat16), scale, bias)

    # Pure row-major reshape (free, no transpose / extra HBM pass).
    y = phases.reshape(B, 2 * H1, 2 * W1, C)
    y = y[:, :min(H2, 2 * H1), :min(W2, 2 * W1), :]
    ph, pw = H2 - y.shape[1], W2 - y.shape[2]
    if ph or pw:
        y = jnp.pad(y, ((0, 0), (0, ph), (0, pw), (0, 0)))
    return y


# -----------------------------------------------------------------------------
# Kernel 2: SCSE + conv1(3x3)+downsample(1x1) + IBN + ReLU + conv2(3x3) + BN
#           + residual + ReLU, all fused.
# -----------------------------------------------------------------------------
def _fused_kernel(x2_ref, up_ref,
                  w1_ref, b1_ref, w2_ref, b2_ref, ws2_ref, ws1_ref, bs_ref,
                  c1w_ref, ing_ref, inb_ref, bns_ref, bnb_ref,
                  dss_ref, dsb_ref,
                  c2w_ref, c2s_ref, c2b_ref,
                  o_ref,
                  *, H, W, C2, C1, Co, half, eps=1e-5):
    HW = H * W
    C = C2 + C1
    x2 = x2_ref[...]                                  # (H, W, C2) bf16
    up = up_ref[...]                                  # (H, W, C1) bf16
    x2_2d = x2.reshape(HW, C2)
    up_2d = up.reshape(HW, C1)

    # ---------------- SCSE gates (computed on pre-gate activations) ----------
    gap2 = jnp.mean(x2_2d.astype(jnp.float32), axis=0, keepdims=True)   # (1, C2)
    gap1 = jnp.mean(up_2d.astype(jnp.float32), axis=0, keepdims=True)   # (1, C1)
    gap = jnp.concatenate([gap2, gap1], axis=-1)                        # (1, C)
    h1 = jnp.maximum(
        jnp.dot(gap.astype(jnp.bfloat16), w1_ref[...],
                preferred_element_type=jnp.float32) + b1_ref[...], 0.0)
    g = jax.nn.sigmoid(
        jnp.dot(h1.astype(jnp.bfloat16), w2_ref[...],
                preferred_element_type=jnp.float32) + b2_ref[...])      # (1, C)
    g2 = g[:, :C2]
    g1 = g[:, C2:]
    s = jax.nn.sigmoid(
        jnp.dot(x2_2d, ws2_ref[...], preferred_element_type=jnp.float32)
        + jnp.dot(up_2d, ws1_ref[...], preferred_element_type=jnp.float32)
        + bs_ref[...])                                                  # (HW, 1)

    # gated halves -> bf16 (no full-C f32 image, no explicit concat)
    x2g = (x2_2d.astype(jnp.float32) * (g2 + s)).astype(jnp.bfloat16)
    upg = (up_2d.astype(jnp.float32) * (g1 + s)).astype(jnp.bfloat16)
    x2g = x2g.reshape(H, W, C2)
    upg = upg.reshape(H, W, C1)

    # ---------------- lane-wise W-im2col: (H, W, 3C) = [w-1 | w | w+1] -------
    zc2 = jnp.zeros((H, 1, C2), jnp.bfloat16)
    zc1 = jnp.zeros((H, 1, C1), jnp.bfloat16)
    xcol = jnp.concatenate(
        [jnp.concatenate([zc2, x2g[:, :W - 1, :]], axis=1),
         jnp.concatenate([zc1, upg[:, :W - 1, :]], axis=1),
         x2g, upg,
         jnp.concatenate([x2g[:, 1:, :], zc2], axis=1),
         jnp.concatenate([upg[:, 1:, :], zc1], axis=1)], axis=-1)       # (H, W, 3C)
    zrow = jnp.zeros((1, W, 3 * C), jnp.bfloat16)
    xcol_p = jnp.concatenate([zrow, xcol, zrow],
                             axis=0).reshape((H + 2) * W, 3 * C)

    # ---------------- conv1 3x3 + fused 1x1 downsample (N = 2*Co) ------------
    # kh shifts are tile-aligned sublane-offset slices of the padded buffer.
    acc = jnp.dot(xcol_p[0:HW], c1w_ref[0],
                  preferred_element_type=jnp.float32)
    acc = acc + jnp.dot(xcol_p[W:W + HW], c1w_ref[1],
                        preferred_element_type=jnp.float32)
    acc = acc + jnp.dot(xcol_p[2 * W:2 * W + HW], c1w_ref[2],
                        preferred_element_type=jnp.float32)             # (HW, 2Co)

    # ---------------- IBN (static channel split) + ReLU ----------------------
    y_in = acc[:, :half]
    m = jnp.mean(y_in, axis=0, keepdims=True)
    d = y_in - m
    v = jnp.mean(d * d, axis=0, keepdims=True)
    y_in = d * lax.rsqrt(v + eps) * ing_ref[...] + inb_ref[...]
    y_bn = acc[:, half:Co] * bns_ref[...] + bnb_ref[...]
    a1 = jnp.maximum(jnp.concatenate([y_in, y_bn], axis=-1), 0.0)       # (HW, Co)
    a1b = a1.astype(jnp.bfloat16).reshape(H, W, Co)

    # downsample shortcut (folded BN), straight from the packed columns
    dn = acc[:, Co:] * dss_ref[...] + dsb_ref[...]                      # (HW, Co)

    # ---------------- conv2 3x3 via the same W-im2col (K = 3*Co) -------------
    zco = jnp.zeros((H, 1, Co), jnp.bfloat16)
    acol = jnp.concatenate(
        [jnp.concatenate([zco, a1b[:, :W - 1, :]], axis=1),
         a1b,
         jnp.concatenate([a1b[:, 1:, :], zco], axis=1)], axis=-1)       # (H, W, 3Co)
    zrow2 = jnp.zeros((1, W, 3 * Co), jnp.bfloat16)
    acol_p = jnp.concatenate([zrow2, acol, zrow2],
                             axis=0).reshape((H + 2) * W, 3 * Co)

    acc2 = jnp.dot(acol_p[0:HW], c2w_ref[0],
                   preferred_element_type=jnp.float32)
    acc2 = acc2 + jnp.dot(acol_p[W:W + HW], c2w_ref[1],
                          preferred_element_type=jnp.float32)
    acc2 = acc2 + jnp.dot(acol_p[2 * W:2 * W + HW], c2w_ref[2],
                          preferred_element_type=jnp.float32)           # (HW, Co)

    out = acc2 * c2s_ref[...] + c2b_ref[...] + dn
    o_ref[...] = jnp.maximum(out, 0.0).reshape(H, W, Co).astype(o_ref.dtype)


def fused_block(x2, up, p):
    B, H, W, C2 = x2.shape
    C1 = up.shape[-1]
    C = C2 + C1
    Co = p["c2_w"].shape[-1]
    half = p["ibn_half"]
    mid = p["se_w1"].shape[-1]

    # weight packing (tiny, XLA-side): conv1 taps -> (3, 3C, Co), downsample
    # 1x1 appended on the N axis at the (kh=1, kw=1) rows -> (3, 3C, 2Co).
    c1 = p["c1_w"].reshape(3, 3, C, Co)
    dsz = jnp.zeros((3, 3, C, Co), p["c1_w"].dtype).at[1, 1].set(p["ds_w"])
    c1w = jnp.concatenate([c1.reshape(3, 3 * C, Co),
                           dsz.reshape(3, 3 * C, Co)], axis=-1)
    c2w = p["c2_w"].reshape(3, 3, Co, Co).reshape(3, 3 * Co, Co)
    ws2 = p["se_ws"][:C2]
    ws1 = p["se_ws"][C2:]

    kernel = functools.partial(_fused_kernel, H=H, W=W, C2=C2, C1=C1,
                               Co=Co, half=half)
    return pl.pallas_call(
        kernel,
        grid=(B,),
        in_specs=[
            pl.BlockSpec((None, H, W, C2), lambda b: (b, 0, 0, 0)),
            pl.BlockSpec((None, H, W, C1), lambda b: (b, 0, 0, 0)),
            _pspec((C, mid)), _pspec((1, mid)),
            _pspec((mid, C)), _pspec((1, C)),
            _pspec((C2, 1)), _pspec((C1, 1)), _pspec((1, 1)),
            _pspec((3, 3 * C, 2 * Co)),
            _pspec((1, half)), _pspec((1, half)),
            _pspec((1, Co - half)), _pspec((1, Co - half)),
            _pspec((1, Co)), _pspec((1, Co)),
            _pspec((3, 3 * Co, Co)), _pspec((1, Co)), _pspec((1, Co)),
        ],
        out_specs=pl.BlockSpec((None, H, W, Co), lambda b: (b, 0, 0, 0)),
        out_shape=jax.ShapeDtypeStruct((B, H, W, Co), jnp.float32),
        compiler_params=_cparams(),
    )(x2.astype(jnp.bfloat16), up.astype(jnp.bfloat16),
      p["se_w1"].astype(jnp.bfloat16), p["se_b1"],
      p["se_w2"].astype(jnp.bfloat16), p["se_b2"],
      ws2.astype(jnp.bfloat16), ws1.astype(jnp.bfloat16), p["se_bs"],
      c1w.astype(jnp.bfloat16),
      p["ibn_in_gamma"], p["ibn_in_beta"],
      p["ibn_bn_scale"], p["ibn_bn_bias"],
      p["ds_scale"], p["ds_bias"],
      c2w.astype(jnp.bfloat16), p["c2_scale"], p["c2_bias"])


# -----------------------------------------------------------------------------
# Glue: parameter transforms & forward pass
# -----------------------------------------------------------------------------
def bn_fold(gamma, beta, rmean, rvar, conv_bias=None, eps=1e-5):
    scale = gamma / jnp.sqrt(rvar + eps)
    bias = beta - rmean * scale
    if conv_bias is not None:
        bias = bias + conv_bias * scale
    return (scale.reshape(1, -1).astype(jnp.float32),
            bias.reshape(1, -1).astype(jnp.float32))


def torch_conv_w(w):
    """torch Conv2d weight (Co, Ci, K, K) -> tap-major (K*K, Ci, Co)."""
    Co, Ci, K, _ = w.shape
    return jnp.transpose(w, (2, 3, 1, 0)).reshape(K * K, Ci, Co)


def torch_convT_w(w):
    """torch ConvTranspose2d weight (Ci, Co, K, K) -> equivalent regular-conv
    (spatially flipped) taps in layout (K*K, Ci, Co)."""
    Ci, Co, K, _ = w.shape
    w_f = w[:, :, ::-1, ::-1]
    return jnp.transpose(w_f, (2, 3, 0, 1)).reshape(K * K, Ci, Co)


def unet_upsample_v2(x1, x2, p):
    """x1, x2: NHWC. Returns NHWC output (B, H2, W2, channels//4)."""
    B, H2, W2, _ = x2.shape
    up = up_block(x1, p["up_w"], p["up_scale"], p["up_bias"], H2, W2)
    return fused_block(x2, up, p)


# -----------------------------------------------------------------------------
# Deterministic parameter construction
# -----------------------------------------------------------------------------
def make_params(key, inchannels, channels):
    C_cat = channels + inchannels
    C_out = channels // 4
    mid = max(C_cat // 16, 1)
    half = C_out // 2

    ks = jax.random.split(key, 32)
    it = iter(range(32))

    def nrm(shape, s=0.1):
        return s * jax.random.normal(ks[next(it)], shape, jnp.float32)

    def pos(shape):
        return 0.5 + jax.random.uniform(ks[next(it)], shape, jnp.float32)

    p = {}

    # up: ConvTranspose2d(Cin, Cin, 3, pad=1, stride=2) + BN(Cin)
    up_wT = nrm((inchannels, inchannels, 3, 3))
    up_cb = nrm((inchannels,))
    g, b, rm, rv = (1.0 + nrm((inchannels,)), nrm((inchannels,)),
                    nrm((inchannels,)), pos((inchannels,)))
    p["up_w"] = torch_convT_w(up_wT)
    p["up_scale"], p["up_bias"] = bn_fold(g, b, rm, rv, conv_bias=up_cb)

    # SCSE(C_cat), reduction=16
    p["se_w1"] = nrm((C_cat, mid))
    p["se_b1"] = nrm((1, mid))
    p["se_w2"] = nrm((mid, C_cat))
    p["se_b2"] = nrm((1, C_cat))
    p["se_ws"] = nrm((C_cat, 1))
    p["se_bs"] = nrm((1, 1))

    # BasicResConvBlock(C_cat, C_out, ibn=True): conv1 (no bias) + IBN
    p["c1_w"] = torch_conv_w(nrm((C_out, C_cat, 3, 3)))
    p["ibn_half"] = half
    p["ibn_in_gamma"] = (1.0 + nrm((half,))).reshape(1, -1)
    p["ibn_in_beta"] = nrm((half,)).reshape(1, -1)
    g, b, rm, rv = (1.0 + nrm((C_out - half,)), nrm((C_out - half,)),
                    nrm((C_out - half,)), pos((C_out - half,)))
    p["ibn_bn_scale"], p["ibn_bn_bias"] = bn_fold(g, b, rm, rv)

    # conv2 (no bias) + BN(C_out)
    p["c2_w"] = torch_conv_w(nrm((C_out, C_out, 3, 3)))
    g, b, rm, rv = (1.0 + nrm((C_out,)), nrm((C_out,)),
                    nrm((C_out,)), pos((C_out,)))
    p["c2_scale"], p["c2_bias"] = bn_fold(g, b, rm, rv)

    # downsample: 1x1 conv (no bias) + BN(C_out)
    p["ds_w"] = torch_conv_w(nrm((C_out, C_cat, 1, 1))).reshape(C_cat, C_out)
    g, b, rm, rv = (1.0 + nrm((C_out,)), nrm((C_out,)),
                    nrm((C_out,)), pos((C_out,)))
    p["ds_scale"], p["ds_bias"] = bn_fold(g, b, rm, rv)

    return p


# -----------------------------------------------------------------------------
if __name__ == "__main__":
    B = 2
    inchannels = 16
    channels = 16
    H1 = W1 = 8      # x1 spatial (pre-upsample)
    H2 = W2 = 16     # x2 spatial

    root = jax.random.PRNGKey(0)
    k_x1, k_x2, k_p = jax.random.split(root, 3)

    # PyTorch-convention NCHW inputs
    x1_nchw = jax.random.normal(k_x1, (B, inchannels, H1, W1), jnp.float32)
    x2_nchw = jax.random.normal(k_x2, (B, channels, H2, W2), jnp.float32)

    params = make_params(k_p, inchannels, channels)

    # NCHW -> NHWC for the kernels
    x1 = jnp.transpose(x1_nchw, (0, 2, 3, 1))
    x2 = jnp.transpose(x2_nchw, (0, 2, 3, 1))

    fwd = jax.jit(lambda a, b: unet_upsample_v2(a, b, params))
    out_nhwc = fwd(x1, x2)
    out_nchw = jnp.transpose(out_nhwc, (0, 3, 1, 2))     # (B, channels//4, H2, W2)
    out_nchw = jax.block_until_ready(out_nchw)

    assert out_nchw.shape == (B, channels // 4, H2, W2)
    assert bool(jnp.all(jnp.isfinite(out_nchw)))
    print("KERNEL_OK")
</pallas_src>

<mosaic_0001>
module attributes {stable_mosaic.version = 11 : i64} {
  func.func @_up_kernel(%arg0: i32, %arg1: memref<1x8x8x16xbf16, #tpu.memory_space<vmem>>, %arg2: memref<9x16x16xbf16, #tpu.memory_space<vmem>>, %arg3: memref<1x16xf32, #tpu.memory_space<vmem>>, %arg4: memref<1x16xf32, #tpu.memory_space<vmem>>, %arg5: memref<1x16x8x32xbf16, #tpu.memory_space<vmem>>) attributes {dimension_semantics = [#tpu.dimension_semantics<parallel>], iteration_bounds = array<i64: 2>, scalar_prefetch = 0 : i64, scratch_operands = 0 : i64, tpu.core_type = #tpu.core_type<tc>, window_params = [{transform_indices = @transform_0, window_bounds = array<i64: 1, 8, 8, 16>}, {pipeline_mode = #tpu.pipeline_mode<synchronous>, transform_indices = @transform_1, window_bounds = array<i64: 9, 16, 16>}, {pipeline_mode = #tpu.pipeline_mode<synchronous>, transform_indices = @transform_2, window_bounds = array<i64: 1, 16>}, {pipeline_mode = #tpu.pipeline_mode<synchronous>, transform_indices = @transform_3, window_bounds = array<i64: 1, 16>}, {transform_indices = @transform_4, window_bounds = array<i64: 1, 16, 8, 32>}]} {
    %c0 = arith.constant 0 : index
    %c0_0 = arith.constant 0 : index
    %c0_1 = arith.constant 0 : index
    %c0_2 = arith.constant 0 : index
    %0 = vector.load %arg1[%c0, %c0_0, %c0_1, %c0_2] : memref<1x8x8x16xbf16, #tpu.memory_space<vmem>>, vector<1x8x8x16xbf16>
    %1 = vector.shape_cast %0 : vector<1x8x8x16xbf16> to vector<8x8x16xbf16>
    %2 = vector.shape_cast %1 : vector<8x8x16xbf16> to vector<64x16xbf16>
    %c0_3 = arith.constant 0 : index
    %c0_4 = arith.constant 0 : index
    %3 = vector.load %arg3[%c0_3, %c0_4] : memref<1x16xf32, #tpu.memory_space<vmem>>, vector<1x16xf32>
    %c0_5 = arith.constant 0 : index
    %c0_6 = arith.constant 0 : index
    %4 = vector.load %arg4[%c0_5, %c0_6] : memref<1x16xf32, #tpu.memory_space<vmem>>, vector<1x16xf32>
    %c4 = arith.constant 4 : index
    %c0_7 = arith.constant 0 : index
    %c0_8 = arith.constant 0 : index
    %5 = vector.load %arg2[%c4, %c0_7, %c0_8] : memref<9x16x16xbf16, #tpu.memory_space<vmem>>, vector<1x16x16xbf16>
    %6 = vector.shape_cast %5 : vector<1x16x16xbf16> to vector<16x16xbf16>
    %cst = arith.constant dense<0.000000e+00> : vector<64x16xf32>
    %7 = tpu.matmul %2, %6, %cst {dimension_numbers = #tpu.dot_dimension_numbers<[1], [0], [0], [1], [0, 0, 1, 1], [], []>} : vector<64x16xbf16>, vector<16x16xbf16>, vector<64x16xf32> -> vector<64x16xf32>
    %8 = vector.shape_cast %7 : vector<64x16xf32> to vector<8x8x16xf32>
    %9 = vector.shape_cast %3 : vector<1x16xf32> to vector<1x1x16xf32>
    %10 = vector.broadcast %9 : vector<1x1x16xf32> to vector<8x8x16xf32>
    %11 = arith.mulf %8, %10 : vector<8x8x16xf32>
    %12 = vector.shape_cast %4 : vector<1x16xf32> to vector<1x1x16xf32>
    %13 = vector.broadcast %12 : vector<1x1x16xf32> to vector<8x8x16xf32>
    %14 = arith.addf %11, %13 : vector<8x8x16xf32>
    %cst_9 = arith.constant 0.000000e+00 : f32
    %15 = vector.broadcast %cst_9 : f32 to vector<8x8x16xf32>
    %16 = arith.maximumf %14, %15 : vector<8x8x16xf32>
    %c3 = arith.constant 3 : index
    %c0_10 = arith.constant 0 : index
    %c0_11 = arith.constant 0 : index
    %17 = vector.load %arg2[%c3, %c0_10, %c0_11] : memref<9x16x16xbf16, #tpu.memory_space<vmem>>, vector<1x16x16xbf16>
    %18 = vector.shape_cast %17 : vector<1x16x16xbf16> to vector<16x16xbf16>
    %cst_12 = arith.constant dense<0.000000e+00> : vector<64x16xf32>
    %19 = tpu.matmul %2, %18, %cst_12 {dimension_numbers = #tpu.dot_dimension_numbers<[1], [0], [0], [1], [0, 0, 1, 1], [], []>} : vector<64x16xbf16>, vector<16x16xbf16>, vector<64x16xf32> -> vector<64x16xf32>
    %20 = vector.shape_cast %19 : vector<64x16xf32> to vector<8x8x16xf32>
    %21 = vector.extract_strided_slice %20 {offsets = [0, 0, 0], sizes = [8, 7, 16], strides = [1, 1, 1]} : vector<8x8x16xf32> to vector<8x7x16xf32>
    %c5 = arith.constant 5 : index
    %c0_13 = arith.constant 0 : index
    %c0_14 = arith.constant 0 : index
    %22 = vector.load %arg2[%c5, %c0_13, %c0_14] : memref<9x16x16xbf16, #tpu.memory_space<vmem>>, vector<1x16x16xbf16>
    %23 = vector.shape_cast %22 : vector<1x16x16xbf16> to vector<16x16xbf16>
    %cst_15 = arith.constant dense<0.000000e+00> : vector<64x16xf32>
    %24 = tpu.matmul %2, %23, %cst_15 {dimension_numbers = #tpu.dot_dimension_numbers<[1], [0], [0], [1], [0, 0, 1, 1], [], []>} : vector<64x16xbf16>, vector<16x16xbf16>, vector<64x16xf32> -> vector<64x16xf32>
    %25 = vector.shape_cast %24 : vector<64x16xf32> to vector<8x8x16xf32>
    %26 = vector.extract_strided_slice %25 {offsets = [0, 1, 0], sizes = [8, 7, 16], strides = [1, 1, 1]} : vector<8x8x16xf32> to vector<8x7x16xf32>
    %27 = arith.addf %21, %26 : vector<8x7x16xf32>
    %28 = vector.shape_cast %3 : vector<1x16xf32> to vector<1x1x16xf32>
    %29 = vector.broadcast %28 : vector<1x1x16xf32> to vector<8x7x16xf32>
    %30 = arith.mulf %27, %29 : vector<8x7x16xf32>
    %31 = vector.shape_cast %4 : vector<1x16xf32> to vector<1x1x16xf32>
    %32 = vector.broadcast %31 : vector<1x1x16xf32> to vector<8x7x16xf32>
    %33 = arith.addf %30, %32 : vector<8x7x16xf32>
    %cst_16 = arith.constant 0.000000e+00 : f32
    %34 = vector.broadcast %cst_16 : f32 to vector<8x7x16xf32>
    %35 = arith.maximumf %33, %34 : vector<8x7x16xf32>
    %c1 = arith.constant 1 : index
    %c0_17 = arith.constant 0 : index
    %c0_18 = arith.constant 0 : index
    %36 = vector.load %arg2[%c1, %c0_17, %c0_18] : memref<9x16x16xbf16, #tpu.memory_space<vmem>>, vector<1x16x16xbf16>
    %37 = vector.shape_cast %36 : vector<1x16x16xbf16> to vector<16x16xbf16>
    %cst_19 = arith.constant dense<0.000000e+00> : vector<64x16xf32>
    %38 = tpu.matmul %2, %37, %cst_19 {dimension_numbers = #tpu.dot_dimension_numbers<[1], [0], [0], [1], [0, 0, 1, 1], [], []>} : vector<64x16xbf16>, vector<16x16xbf16>, vector<64x16xf32> -> vector<64x16xf32>
    %39 = vector.shape_cast %38 : vector<64x16xf32> to vector<8x8x16xf32>
    %40 = vector.extract_strided_slice %39 {offsets = [0, 0, 0], sizes = [7, 8, 16], strides = [1, 1, 1]} : vector<8x8x16xf32> to vector<7x8x16xf32>
    %c7 = arith.constant 7 : index
    %c0_20 = arith.constant 0 : index
    %c0_21 = arith.constant 0 : index
    %41 = vector.load %arg2[%c7, %c0_20, %c0_21] : memref<9x16x16xbf16, #tpu.memory_space<vmem>>, vector<1x16x16xbf16>
    %42 = vector.shape_cast %41 : vector<1x16x16xbf16> to vector<16x16xbf16>
    %cst_22 = arith.constant dense<0.000000e+00> : vector<64x16xf32>
    %43 = tpu.matmul %2, %42, %cst_22 {dimension_numbers = #tpu.dot_dimension_numbers<[1], [0], [0], [1], [0, 0, 1, 1], [], []>} : vector<64x16xbf16>, vector<16x16xbf16>, vector<64x16xf32> -> vector<64x16xf32>
    %44 = vector.shape_cast %43 : vector<64x16xf32> to vector<8x8x16xf32>
    %45 = vector.extract_strided_slice %44 {offsets = [1, 0, 0], sizes = [7, 8, 16], strides = [1, 1, 1]} : vector<8x8x16xf32> to vector<7x8x16xf32>
    %46 = arith.addf %40, %45 : vector<7x8x16xf32>
    %47 = vector.shape_cast %3 : vector<1x16xf32> to vector<1x1x16xf32>
    %48 = vector.broadcast %47 : vector<1x1x16xf32> to vector<7x8x16xf32>
    %49 = arith.mulf %46, %48 : vector<7x8x16xf32>
    %50 = vector.shape_cast %4 : vector<1x16xf32> to vector<1x1x16xf32>
    %51 = vector.broadcast %50 : vector<1x1x16xf32> to vector<7x8x16xf32>
    %52 = arith.addf %49, %51 : vector<7x8x16xf32>
    %cst_23 = arith.constant 0.000000e+00 : f32
    %53 = vector.broadcast %cst_23 : f32 to vector<7x8x16xf32>
    %54 = arith.maximumf %52, %53 : vector<7x8x16xf32>
    %c0_24 = arith.constant 0 : index
    %c0_25 = arith.constant 0 : index
    %c0_26 = arith.constant 0 : index
    %55 = vector.load %arg2[%c0_24, %c0_25, %c0_26] : memref<9x16x16xbf16, #tpu.memory_space<vmem>>, vector<1x16x16xbf16>
    %56 = vector.shape_cast %55 : vector<1x16x16xbf16> to vector<16x16xbf16>
    %cst_27 = arith.constant dense<0.000000e+00> : vector<64x16xf32>
    %57 = tpu.matmul %2, %56, %cst_27 {dimension_numbers = #tpu.dot_dimension_numbers<[1], [0], [0], [1], [0, 0, 1, 1], [], []>} : vector<64x16xbf16>, vector<16x16xbf16>, vector<64x16xf32> -> vector<64x16xf32>
    %58 = vector.shape_cast %57 : vector<64x16xf32> to vector<8x8x16xf32>
    %59 = vector.extract_strided_slice %58 {offsets = [0, 0, 0], sizes = [7, 7, 16], strides = [1, 1, 1]} : vector<8x8x16xf32> to vector<7x7x16xf32>
    %c2 = arith.constant 2 : index
    %c0_28 = arith.constant 0 : index
    %c0_29 = arith.constant 0 : index
    %60 = vector.load %arg2[%c2, %c0_28, %c0_29] : memref<9x16x16xbf16, #tpu.memory_space<vmem>>, vector<1x16x16xbf16>
    %61 = vector.shape_cast %60 : vector<1x16x16xbf16> to vector<16x16xbf16>
    %cst_30 = arith.constant dense<0.000000e+00> : vector<64x16xf32>
    %62 = tpu.matmul %2, %61, %cst_30 {dimension_numbers = #tpu.dot_dimension_numbers<[1], [0], [0], [1], [0, 0, 1, 1], [], []>} : vector<64x16xbf16>, vector<16x16xbf16>, vector<64x16xf32> -> vector<64x16xf32>
    %63 = vector.shape_cast %62 : vector<64x16xf32> to vector<8x8x16xf32>
    %64 = vector.extract_strided_slice %63 {offsets = [0, 1, 0], sizes = [7, 7, 16], strides = [1, 1, 1]} : vector<8x8x16xf32> to vector<7x7x16xf32>
    %65 = arith.addf %59, %64 : vector<7x7x16xf32>
    %c6 = arith.constant 6 : index
    %c0_31 = arith.constant 0 : index
    %c0_32 = arith.constant 0 : index
    %66 = vector.load %arg2[%c6, %c0_31, %c0_32] : memref<9x16x16xbf16, #tpu.memory_space<vmem>>, vector<1x16x16xbf16>
    %67 = vector.shape_cast %66 : vector<1x16x16xbf16> to vector<16x16xbf16>
    %cst_33 = arith.constant dense<0.000000e+00> : vector<64x16xf32>
    %68 = tpu.matmul %2, %67, %cst_33 {dimension_numbers = #tpu.dot_dimension_numbers<[1], [0], [0], [1], [0, 0, 1, 1], [], []>} : vector<64x16xbf16>, vector<16x16xbf16>, vector<64x16xf32> -> vector<64x16xf32>
    %69 = vector.shape_cast %68 : vector<64x16xf32> to vector<8x8x16xf32>
    %70 = vector.extract_strided_slice %69 {offsets = [1, 0, 0], sizes = [7, 7, 16], strides = [1, 1, 1]} : vector<8x8x16xf32> to vector<7x7x16xf32>
    %71 = arith.addf %65, %70 : vector<7x7x16xf32>
    %c8 = arith.constant 8 : index
    %c0_34 = arith.constant 0 : index
    %c0_35 = arith.constant 0 : index
    %72 = vector.load %arg2[%c8, %c0_34, %c0_35] : memref<9x16x16xbf16, #tpu.memory_space<vmem>>, vector<1x16x16xbf16>
    %73 = vector.shape_cast %72 : vector<1x16x16xbf16> to vector<16x16xbf16>
    %cst_36 = arith.constant dense<0.000000e+00> : vector<64x16xf32>
    %74 = tpu.matmul %2, %73, %cst_36 {dimension_numbers = #tpu.dot_dimension_numbers<[1], [0], [0], [1], [0, 0, 1, 1], [], []>} : vector<64x16xbf16>, vector<16x16xbf16>, vector<64x16xf32> -> vector<64x16xf32>
    %75 = vector.shape_cast %74 : vector<64x16xf32> to vector<8x8x16xf32>
    %76 = vector.extract_strided_slice %75 {offsets = [1, 1, 0], sizes = [7, 7, 16], strides = [1, 1, 1]} : vector<8x8x16xf32> to vector<7x7x16xf32>
    %77 = arith.addf %71, %76 : vector<7x7x16xf32>
    %78 = vector.shape_cast %3 : vector<1x16xf32> to vector<1x1x16xf32>
    %79 = vector.broadcast %78 : vector<1x1x16xf32> to vector<7x7x16xf32>
    %80 = arith.mulf %77, %79 : vector<7x7x16xf32>
    %81 = vector.shape_cast %4 : vector<1x16xf32> to vector<1x1x16xf32>
    %82 = vector.broadcast %81 : vector<1x1x16xf32> to vector<7x7x16xf32>
    %83 = arith.addf %80, %82 : vector<7x7x16xf32>
    %cst_37 = arith.constant 0.000000e+00 : f32
    %84 = vector.broadcast %cst_37 : f32 to vector<7x7x16xf32>
    %85 = arith.maximumf %83, %84 : vector<7x7x16xf32>
    %cst_38 = arith.constant 0.000000e+00 : f32
    %86 = vector.broadcast %cst_38 : f32 to vector<8x1x16xf32>
    %87 = tpu.concatenate %35, %86 in 1 : vector<8x7x16xf32>, vector<8x1x16xf32> -> vector<8x8x16xf32>
    %cst_39 = arith.constant 0.000000e+00 : f32
    %88 = vector.broadcast %cst_39 : f32 to vector<7x1x16xf32>
    %89 = tpu.concatenate %85, %88 in 1 : vector<7x7x16xf32>, vector<7x1x16xf32> -> vector<7x8x16xf32>
    %90 = tpu.concatenate %16, %87 in 2 : vector<8x8x16xf32>, vector<8x8x16xf32> -> vector<8x8x32xf32>
    %91 = tpu.concatenate %54, %89 in 2 : vector<7x8x16xf32>, vector<7x8x16xf32> -> vector<7x8x32xf32>
    %cst_40 = arith.constant 0.000000e+00 : f32
    %92 = vector.broadcast %cst_40 : f32 to vector<1x8x32xf32>
    %93 = tpu.concatenate %91, %92 in 0 : vector<7x8x32xf32>, vector<1x8x32xf32> -> vector<8x8x32xf32>
    %94 = vector.shape_cast %90 : vector<8x8x32xf32> to vector<8x1x8x32xf32>
    %95 = vector.shape_cast %93 : vector<8x8x32xf32> to vector<8x1x8x32xf32>
    %96 = tpu.concatenate %94, %95 in 1 : vector<8x1x8x32xf32>, vector<8x1x8x32xf32> -> vector<8x2x8x32xf32>
    %97 = vector.shape_cast %96 : vector<8x2x8x32xf32> to vector<16x8x32xf32>
    %98 = arith.truncf %97 : vector<16x8x32xf32> to vector<16x8x32xbf16>
    %c0_41 = arith.constant 0 : index
    %c0_42 = arith.constant 0 : index
    %c0_43 = arith.constant 0 : index
    %c0_44 = arith.constant 0 : index
    %99 = vector.load %arg5[%c0_41, %c0_42, %c0_43, %c0_44] : memref<1x16x8x32xbf16, #tpu.memory_space<vmem>>, vector<1x16x8x32xbf16>
    %100 = vector.shape_cast %99 : vector<1x16x8x32xbf16> to vector<16x8x32xbf16>
    %101 = vector.shape_cast %98 : vector<16x8x32xbf16> to vector<1x16x8x32xbf16>
    tpu.vector_store %arg5[%c0_41, %c0_42, %c0_43, %c0_44], %101 {strides = array<i32>} : memref<1x16x8x32xbf16, #tpu.memory_space<vmem>>, vector<1x16x8x32xbf16>,
    return
  }
  func.func @transform_0(%arg0: i32) -> (i32, i32, i32, i32) {
    %c0_i32 = arith.constant 0 : i32
    %c0_i32_0 = arith.constant 0 : i32
    %c0_i32_1 = arith.constant 0 : i32
    %c0_i32_2 = arith.constant 0 : i32
    return %arg0, %c0_i32, %c0_i32_0, %c0_i32_1 : i32, i32, i32, i32
  }
  func.func @transform_1(%arg0: i32) -> (i32, i32, i32) {
    %c0_i32 = arith.constant 0 : i32
    %c0_i32_0 = arith.constant 0 : i32
    %c0_i32_1 = arith.constant 0 : i32
    %c0_i32_2 = arith.constant 0 : i32
    return %c0_i32, %c0_i32_0, %c0_i32_1 : i32, i32, i32
  }
  func.func @transform_2(%arg0: i32) -> (i32, i32) {
    %c0_i32 = arith.constant 0 : i32
    %c0_i32_0 = arith.constant 0 : i32
    %c0_i32_1 = arith.constant 0 : i32
    return %c0_i32, %c0_i32_0 : i32, i32
  }
  func.func @transform_3(%arg0: i32) -> (i32, i32) {
    %c0_i32 = arith.constant 0 : i32
    %c0_i32_0 = arith.constant 0 : i32
    %c0_i32_1 = arith.constant 0 : i32
    return %c0_i32, %c0_i32_0 : i32, i32
  }
  func.func @transform_4(%arg0: i32) -> (i32, i32, i32, i32) {
    %c0_i32 = arith.constant 0 : i32
    %c0_i32_0 = arith.constant 0 : i32
    %c0_i32_1 = arith.constant 0 : i32
    %c0_i32_2 = arith.constant 0 : i32
    return %arg0, %c0_i32, %c0_i32_0, %c0_i32_1 : i32, i32, i32, i32
  }
}

module attributes {stable_mosaic.version = 11 : i64} {
  func.func @_fused_kernel(%arg0: i32, %arg1: memref<1x16x16x16xbf16, #tpu.memory_space<vmem>>, %arg2: memref<1x16x16x16xbf16, #tpu.memory_space<vmem>>, %arg3: memref<32x2xbf16, #tpu.memory_space<vmem>>, %arg4: memref<1x2xf32, #tpu.memory_space<vmem>>, %arg5: memref<2x32xbf16, #tpu.memory_space<vmem>>, %arg6: memref<1x32xf32, #tpu.memory_space<vmem>>, %arg7: memref<16x1xbf16, #tpu.memory_space<vmem>>, %arg8: memref<16x1xbf16, #tpu.memory_space<vmem>>, %arg9: memref<1x1xf32, #tpu.memory_space<vmem>>, %arg10: memref<3x96x8xbf16, #tpu.memory_space<vmem>>, %arg11: memref<1x2xf32, #tpu.memory_space<vmem>>, %arg12: memref<1x2xf32, #tpu.memory_space<vmem>>, %arg13: memref<1x2xf32, #tpu.memory_space<vmem>>, %arg14: memref<1x2xf32, #tpu.memory_space<vmem>>, %arg15: memref<1x4xf32, #tpu.memory_space<vmem>>, %arg16: memref<1x4xf32, #tpu.memory_space<vmem>>, %arg17: memref<3x12x4xbf16, #tpu.memory_space<vmem>>, %arg18: memref<1x4xf32, #tpu.memory_space<vmem>>, %arg19: memref<1x4xf32, #tpu.memory_space<vmem>>, %arg20: memref<1x16x16x4xf32, #tpu.memory_space<vmem>>) attributes {dimension_semantics = [#tpu.dimension_semantics<parallel>], iteration_bounds = array<i64: 2>, scalar_prefetch = 0 : i64, scratch_operands = 0 : i64, tpu.core_type = #tpu.core_type<tc>, window_params = [{transform_indices = @transform_0, window_bounds = array<i64: 1, 16, 16, 16>}, {transform_indices = @transform_1, window_bounds = array<i64: 1, 16, 16, 16>}, {pipeline_mode = #tpu.pipeline_mode<synchronous>, transform_indices = @transform_2, window_bounds = array<i64: 32, 2>}, {pipeline_mode = #tpu.pipeline_mode<synchronous>, transform_indices = @transform_3, window_bounds = array<i64: 1, 2>}, {pipeline_mode = #tpu.pipeline_mode<synchronous>, transform_indices = @transform_4, window_bounds = array<i64: 2, 32>}, {pipeline_mode = #tpu.pipeline_mode<synchronous>, transform_indices = @transform_5, window_bounds = array<i64: 1, 32>}, {pipeline_mode = #tpu.pipeline_mode<synchronous>, transform_indices = @transform_6, window_bounds = array<i64: 16, 1>}, {pipeline_mode = #tpu.pipeline_mode<synchronous>, transform_indices = @transform_7, window_bounds = array<i64: 16, 1>}, {pipeline_mode = #tpu.pipeline_mode<synchronous>, transform_indices = @transform_8, window_bounds = array<i64: 1, 1>}, {pipeline_mode = #tpu.pipeline_mode<synchronous>, transform_indices = @transform_9, window_bounds = array<i64: 3, 96, 8>}, {pipeline_mode = #tpu.pipeline_mode<synchronous>, transform_indices = @transform_10, window_bounds = array<i64: 1, 2>}, {pipeline_mode = #tpu.pipeline_mode<synchronous>, transform_indices = @transform_11, window_bounds = array<i64: 1, 2>}, {pipeline_mode = #tpu.pipeline_mode<synchronous>, transform_indices = @transform_12, window_bounds = array<i64: 1, 2>}, {pipeline_mode = #tpu.pipeline_mode<synchronous>, transform_indices = @transform_13, window_bounds = array<i64: 1, 2>}, {pipeline_mode = #tpu.pipeline_mode<synchronous>, transform_indices = @transform_14, window_bounds = array<i64: 1, 4>}, {pipeline_mode = #tpu.pipeline_mode<synchronous>, transform_indices = @transform_15, window_bounds = array<i64: 1, 4>}, {pipeline_mode = #tpu.pipeline_mode<synchronous>, transform_indices = @transform_16, window_bounds = array<i64: 3, 12, 4>}, {pipeline_mode = #tpu.pipeline_mode<synchronous>, transform_indices = @transform_17, window_bounds = array<i64: 1, 4>}, {pipeline_mode = #tpu.pipeline_mode<synchronous>, transform_indices = @transform_18, window_bounds = array<i64: 1, 4>}, {transform_indices = @transform_19, window_bounds = array<i64: 1, 16, 16, 4>}]} {
    %c0 = arith.constant 0 : index
    %c0_0 = arith.constant 0 : index
    %c0_1 = arith.constant 0 : index
    %c0_2 = arith.constant 0 : index
    %0 = vector.load %arg1[%c0, %c0_0, %c0_1, %c0_2] : memref<1x16x16x16xbf16, #tpu.memory_space<vmem>>, vector<1x16x16x16xbf16>
    %1 = vector.shape_cast %0 : vector<1x16x16x16xbf16> to vector<16x16x16xbf16>
    %c0_3 = arith.constant 0 : index
    %c0_4 = arith.constant 0 : index
    %c0_5 = arith.constant 0 : index
    %c0_6 = arith.constant 0 : index
    %2 = vector.load %arg2[%c0_3, %c0_4, %c0_5, %c0_6] : memref<1x16x16x16xbf16, #tpu.memory_space<vmem>>, vector<1x16x16x16xbf16>
    %3 = vector.shape_cast %2 : vector<1x16x16x16xbf16> to vector<16x16x16xbf16>
    %4 = vector.shape_cast %1 : vector<16x16x16xbf16> to vector<256x16xbf16>
    %5 = vector.shape_cast %3 : vector<16x16x16xbf16> to vector<256x16xbf16>
    %6 = arith.extf %4 : vector<256x16xbf16> to vector<256x16xf32>
    %cst = arith.constant dense<0.000000e+00> : vector<16xf32>
    %7 = vector.multi_reduction <add>, %6, %cst [0] : vector<256x16xf32> to vector<16xf32>
    %8 = vector.shape_cast %7 : vector<16xf32> to vector<1x16xf32>
    %cst_7 = arith.constant 2.560000e+02 : f32
    %9 = vector.broadcast %cst_7 : f32 to vector<1x16xf32>
    %10 = arith.divf %8, %9 : vector<1x16xf32>
    %11 = arith.extf %5 : vector<256x16xbf16> to vector<256x16xf32>
    %cst_8 = arith.constant dense<0.000000e+00> : vector<16xf32>
    %12 = vector.multi_reduction <add>, %11, %cst_8 [0] : vector<256x16xf32> to vector<16xf32>
    %13 = vector.shape_cast %12 : vector<16xf32> to vector<1x16xf32>
    %cst_9 = arith.constant 2.560000e+02 : f32
    %14 = vector.broadcast %cst_9 : f32 to vector<1x16xf32>
    %15 = arith.divf %13, %14 : vector<1x16xf32>
    %16 = tpu.concatenate %10, %15 in 1 : vector<1x16xf32>, vector<1x16xf32> -> vector<1x32xf32>
    %17 = arith.truncf %16 : vector<1x32xf32> to vector<1x32xbf16>
    %c0_10 = arith.constant 0 : index
    %c0_11 = arith.constant 0 : index
    %18 = vector.load %arg3[%c0_10, %c0_11] : memref<32x2xbf16, #tpu.memory_space<vmem>>, vector<32x2xbf16>
    %cst_12 = arith.constant dense<0.000000e+00> : vector<1x2xf32>
    %19 = tpu.matmul %17, %18, %cst_12 {dimension_numbers = #tpu.dot_dimension_numbers<[1], [0], [0], [1], [0, 0, 1, 1], [], []>} : vector<1x32xbf16>, vector<32x2xbf16>, vector<1x2xf32> -> vector<1x2xf32>
    %c0_13 = arith.constant 0 : index
    %c0_14 = arith.constant 0 : index
    %20 = vector.load %arg4[%c0_13, %c0_14] : memref<1x2xf32, #tpu.memory_space<vmem>>, vector<1x2xf32>
    %21 = arith.addf %19, %20 : vector<1x2xf32>
    %cst_15 = arith.constant 0.000000e+00 : f32
    %22 = vector.broadcast %cst_15 : f32 to vector<1x2xf32>
    %23 = arith.maximumf %21, %22 : vector<1x2xf32>
    %24 = arith.truncf %23 : vector<1x2xf32> to vector<1x2xbf16>
    %c0_16 = arith.constant 0 : index
    %c0_17 = arith.constant 0 : index
    %25 = vector.load %arg5[%c0_16, %c0_17] : memref<2x32xbf16, #tpu.memory_space<vmem>>, vector<2x32xbf16>
    %cst_18 = arith.constant dense<0.000000e+00> : vector<1x32xf32>
    %26 = tpu.matmul %24, %25, %cst_18 {dimension_numbers = #tpu.dot_dimension_numbers<[1], [0], [0], [1], [0, 0, 1, 1], [], []>} : vector<1x2xbf16>, vector<2x32xbf16>, vector<1x32xf32> -> vector<1x32xf32>
    %c0_19 = arith.constant 0 : index
    %c0_20 = arith.constant 0 : index
    %27 = vector.load %arg6[%c0_19, %c0_20] : memref<1x32xf32, #tpu.memory_space<vmem>>, vector<1x32xf32>
    %28 = arith.addf %26, %27 : vector<1x32xf32>
    %29 = arith.negf %28 : vector<1x32xf32>
    %30 = math.exp %29 : vector<1x32xf32>
    %cst_21 = arith.constant 1.000000e+00 : f32
    %31 = vector.broadcast %cst_21 : f32 to vector<1x32xf32>
    %32 = arith.addf %31, %30 : vector<1x32xf32>
    %33 = arith.divf %31, %32 : vector<1x32xf32>
    %34 = vector.extract_strided_slice %33 {offsets = [0, 0], sizes = [1, 16], strides = [1, 1]} : vector<1x32xf32> to vector<1x16xf32>
    %35 = vector.extract_strided_slice %33 {offsets = [0, 16], sizes = [1, 16], strides = [1, 1]} : vector<1x32xf32> to vector<1x16xf32>
    %c0_22 = arith.constant 0 : index
    %c0_23 = arith.constant 0 : index
    %36 = vector.load %arg7[%c0_22, %c0_23] : memref<16x1xbf16, #tpu.memory_space<vmem>>, vector<16x1xbf16>
    %cst_24 = arith.constant dense<0.000000e+00> : vector<256x1xf32>
    %37 = tpu.matmul %4, %36, %cst_24 {dimension_numbers = #tpu.dot_dimension_numbers<[1], [0], [0], [1], [0, 0, 1, 1], [], []>} : vector<256x16xbf16>, vector<16x1xbf16>, vector<256x1xf32> -> vector<256x1xf32>
    %c0_25 = arith.constant 0 : index
    %c0_26 = arith.constant 0 : index
    %38 = vector.load %arg8[%c0_25, %c0_26] : memref<16x1xbf16, #tpu.memory_space<vmem>>, vector<16x1xbf16>
    %cst_27 = arith.constant dense<0.000000e+00> : vector<256x1xf32>
    %39 = tpu.matmul %5, %38, %cst_27 {dimension_numbers = #tpu.dot_dimension_numbers<[1], [0], [0], [1], [0, 0, 1, 1], [], []>} : vector<256x16xbf16>, vector<16x1xbf16>, vector<256x1xf32> -> vector<256x1xf32>
    %40 = arith.addf %37, %39 : vector<256x1xf32>
    %c0_28 = arith.constant 0 : index
    %c0_29 = arith.constant 0 : index
    %41 = vector.load %arg9[%c0_28, %c0_29] : memref<1x1xf32, #tpu.memory_space<vmem>>, vector<1x1xf32>
    %42 = vector.broadcast %41 : vector<1x1xf32> to vector<256x1xf32>
    %43 = arith.addf %40, %42 : vector<256x1xf32>
    %44 = arith.negf %43 : vector<256x1xf32>
    %45 = math.exp %44 : vector<256x1xf32>
    %cst_30 = arith.constant 1.000000e+00 : f32
    %46 = vector.broadcast %cst_30 : f32 to vector<256x1xf32>
    %47 = arith.addf %46, %45 : vector<256x1xf32>
    %48 = arith.divf %46, %47 : vector<256x1xf32>
    %49 = arith.extf %4 : vector<256x16xbf16> to vector<256x16xf32>
    %50 = vector.broadcast %34 : vector<1x16xf32> to vector<256x16xf32>
    %51 = vector.broadcast %48 : vector<256x1xf32> to vector<256x16xf32>
    %52 = arith.addf %50, %51 : vector<256x16xf32>
    %53 = arith.mulf %49, %52 : vector<256x16xf32>
    %54 = arith.truncf %53 : vector<256x16xf32> to vector<256x16xbf16>
    %55 = arith.extf %5 : vector<256x16xbf16> to vector<256x16xf32>
    %56 = vector.broadcast %35 : vector<1x16xf32> to vector<256x16xf32>
    %57 = vector.broadcast %48 : vector<256x1xf32> to vector<256x16xf32>
    %58 = arith.addf %56, %57 : vector<256x16xf32>
    %59 = arith.mulf %55, %58 : vector<256x16xf32>
    %60 = arith.truncf %59 : vector<256x16xf32> to vector<256x16xbf16>
    %61 = vector.shape_cast %54 : vector<256x16xbf16> to vector<16x16x16xbf16>
    %62 = vector.shape_cast %60 : vector<256x16xbf16> to vector<16x16x16xbf16>
    %cst_31 = arith.constant 0.000000e+00 : bf16
    %63 = vector.broadcast %cst_31 : bf16 to vector<16x1x16xbf16>
    %cst_32 = arith.constant 0.000000e+00 : bf16
    %64 = vector.broadcast %cst_32 : bf16 to vector<16x1x16xbf16>
    %65 = vector.extract_strided_slice %61 {offsets = [0, 0, 0], sizes = [16, 15, 16], strides = [1, 1, 1]} : vector<16x16x16xbf16> to vector<16x15x16xbf16>
    %66 = tpu.concatenate %63, %65 in 1 : vector<16x1x16xbf16>, vector<16x15x16xbf16> -> vector<16x16x16xbf16>
    %67 = vector.extract_strided_slice %62 {offsets = [0, 0, 0], sizes = [16, 15, 16], strides = [1, 1, 1]} : vector<16x16x16xbf16> to vector<16x15x16xbf16>
    %68 = tpu.concatenate %64, %67 in 1 : vector<16x1x16xbf16>, vector<16x15x16xbf16> -> vector<16x16x16xbf16>
    %69 = vector.extract_strided_slice %61 {offsets = [0, 1, 0], sizes = [16, 15, 16], strides = [1, 1, 1]} : vector<16x16x16xbf16> to vector<16x15x16xbf16>
    %70 = tpu.concatenate %69, %63 in 1 : vector<16x15x16xbf16>, vector<16x1x16xbf16> -> vector<16x16x16xbf16>
    %71 = vector.extract_strided_slice %62 {offsets = [0, 1, 0], sizes = [16, 15, 16], strides = [1, 1, 1]} : vector<16x16x16xbf16> to vector<16x15x16xbf16>
    %72 = tpu.concatenate %71, %64 in 1 : vector<16x15x16xbf16>, vector<16x1x16xbf16> -> vector<16x16x16xbf16>
    %73 = tpu.concatenate %66, %68, %61, %62, %70, %72 in 2 : vector<16x16x16xbf16>, vector<16x16x16xbf16>, vector<16x16x16xbf16>, vector<16x16x16xbf16>, vector<16x16x16xbf16>, vector<16x16x16xbf16> -> vector<16x16x96xbf16>
    %cst_33 = arith.constant 0.000000e+00 : bf16
    %74 = vector.broadcast %cst_33 : bf16 to vector<1x16x96xbf16>
    %75 = tpu.concatenate %74, %73, %74 in 0 : vector<1x16x96xbf16>, vector<16x16x96xbf16>, vector<1x16x96xbf16> -> vector<18x16x96xbf16>
    %76 = vector.shape_cast %75 : vector<18x16x96xbf16> to vector<288x96xbf16>
    %77 = vector.extract_strided_slice %76 {offsets = [0, 0], sizes = [256, 96], strides = [1, 1]} : vector<288x96xbf16> to vector<256x96xbf16>
    %c0_34 = arith.constant 0 : index
    %c0_35 = arith.constant 0 : index
    %c0_36 = arith.constant 0 : index
    %78 = vector.load %arg10[%c0_34, %c0_35, %c0_36] : memref<3x96x8xbf16, #tpu.memory_space<vmem>>, vector<1x96x8xbf16>
    %79 = vector.shape_cast %78 : vector<1x96x8xbf16> to vector<96x8xbf16>
    %cst_37 = arith.constant dense<0.000000e+00> : vector<256x8xf32>
    %80 = tpu.matmul %77, %79, %cst_37 {dimension_numbers = #tpu.dot_dimension_numbers<[1], [0], [0], [1], [0, 0, 1, 1], [], []>} : vector<256x96xbf16>, vector<96x8xbf16>, vector<256x8xf32> -> vector<256x8xf32>
    %81 = vector.extract_strided_slice %76 {offsets = [16, 0], sizes = [256, 96], strides = [1, 1]} : vector<288x96xbf16> to vector<256x96xbf16>
    %c1 = arith.constant 1 : index
    %c0_38 = arith.constant 0 : index
    %c0_39 = arith.constant 0 : index
    %82 = vector.load %arg10[%c1, %c0_38, %c0_39] : memref<3x96x8xbf16, #tpu.memory_space<vmem>>, vector<1x96x8xbf16>
    %83 = vector.shape_cast %82 : vector<1x96x8xbf16> to vector<96x8xbf16>
    %cst_40 = arith.constant dense<0.000000e+00> : vector<256x8xf32>
    %84 = tpu.matmul %81, %83, %cst_40 {dimension_numbers = #tpu.dot_dimension_numbers<[1], [0], [0], [1], [0, 0, 1, 1], [], []>} : vector<256x96xbf16>, vector<96x8xbf16>, vector<256x8xf32> -> vector<256x8xf32>
    %85 = arith.addf %80, %84 : vector<256x8xf32>
    %86 = vector.extract_strided_slice %76 {offsets = [32, 0], sizes = [256, 96], strides = [1, 1]} : vector<288x96xbf16> to vector<256x96xbf16>
    %c2 = arith.constant 2 : index
    %c0_41 = arith.constant 0 : index
    %c0_42 = arith.constant 0 : index
    %87 = vector.load %arg10[%c2, %c0_41, %c0_42] : memref<3x96x8xbf16, #tpu.memory_space<vmem>>, vector<1x96x8xbf16>
    %88 = vector.shape_cast %87 : vector<1x96x8xbf16> to vector<96x8xbf16>
    %cst_43 = arith.constant dense<0.000000e+00> : vector<256x8xf32>
    %89 = tpu.matmul %86, %88, %cst_43 {dimension_numbers = #tpu.dot_dimension_numbers<[1], [0], [0], [1], [0, 0, 1, 1], [], []>} : vector<256x96xbf16>, vector<96x8xbf16>, vector<256x8xf32> -> vector<256x8xf32>
    %90 = arith.addf %85, %89 : vector<256x8xf32>
    %91 = vector.extract_strided_slice %90 {offsets = [0, 0], sizes = [256, 2], strides = [1, 1]} : vector<256x8xf32> to vector<256x2xf32>
    %cst_44 = arith.constant dense<0.000000e+00> : vector<2xf32>
    %92 = vector.multi_reduction <add>, %91, %cst_44 [0] : vector<256x2xf32> to vector<2xf32>
    %93 = vector.shape_cast %92 : vector<2xf32> to vector<1x2xf32>
    %cst_45 = arith.constant 2.560000e+02 : f32
    %94 = vector.broadcast %cst_45 : f32 to vector<1x2xf32>
    %95 = arith.divf %93, %94 : vector<1x2xf32>
    %96 = vector.broadcast %95 : vector<1x2xf32> to vector<256x2xf32>
    %97 = arith.subf %91, %96 : vector<256x2xf32>
    %98 = arith.mulf %97, %97 : vector<256x2xf32>
    %cst_46 = arith.constant dense<0.000000e+00> : vector<2xf32>
    %99 = vector.multi_reduction <add>, %98, %cst_46 [0] : vector<256x2xf32> to vector<2xf32>
    %100 = vector.shape_cast %99 : vector<2xf32> to vector<1x2xf32>
    %cst_47 = arith.constant 2.560000e+02 : f32
    %101 = vector.broadcast %cst_47 : f32 to vector<1x2xf32>
    %102 = arith.divf %100, %101 : vector<1x2xf32>
    %cst_48 = arith.constant 9.99999974E-6 : f32
    %103 = vector.broadcast %cst_48 : f32 to vector<1x2xf32>
    %104 = arith.addf %102, %103 : vector<1x2xf32>
    %105 = math.rsqrt %104 : vector<1x2xf32>
    %106 = vector.broadcast %105 : vector<1x2xf32> to vector<256x2xf32>
    %107 = arith.mulf %97, %106 : vector<256x2xf32>
    %c0_49 = arith.constant 0 : index
    %c0_50 = arith.constant 0 : index
    %108 = vector.load %arg11[%c0_49, %c0_50] : memref<1x2xf32, #tpu.memory_space<vmem>>, vector<1x2xf32>
    %109 = vector.broadcast %108 : vector<1x2xf32> to vector<256x2xf32>
    %110 = arith.mulf %107, %109 : vector<256x2xf32>
    %c0_51 = arith.constant 0 : index
    %c0_52 = arith.constant 0 : index
    %111 = vector.load %arg12[%c0_51, %c0_52] : memref<1x2xf32, #tpu.memory_space<vmem>>, vector<1x2xf32>
    %112 = vector.broadcast %111 : vector<1x2xf32> to vector<256x2xf32>
    %113 = arith.addf %110, %112 : vector<256x2xf32>
    %114 = vector.extract_strided_slice %90 {offsets = [0, 2], sizes = [256, 2], strides = [1, 1]} : vector<256x8xf32> to vector<256x2xf32>
    %c0_53 = arith.constant 0 : index
    %c0_54 = arith.constant 0 : index
    %115 = vector.load %arg13[%c0_53, %c0_54] : memref<1x2xf32, #tpu.memory_space<vmem>>, vector<1x2xf32>
    %116 = vector.broadcast %115 : vector<1x2xf32> to vector<256x2xf32>
    %117 = arith.mulf %114, %116 : vector<256x2xf32>
    %c0_55 = arith.constant 0 : index
    %c0_56 = arith.constant 0 : index
    %118 = vector.load %arg14[%c0_55, %c0_56] : memref<1x2xf32, #tpu.memory_space<vmem>>, vector<1x2xf32>
    %119 = vector.broadcast %118 : vector<1x2xf32> to vector<256x2xf32>
    %120 = arith.addf %117, %119 : vector<256x2xf32>
    %121 = tpu.concatenate %113, %120 in 1 : vector<256x2xf32>, vector<256x2xf32> -> vector<256x4xf32>
    %cst_57 = arith.constant 0.000000e+00 : f32
    %122 = vector.broadcast %cst_57 : f32 to vector<256x4xf32>
    %123 = arith.maximumf %121, %122 : vector<256x4xf32>
    %124 = arith.truncf %123 : vector<256x4xf32> to vector<256x4xbf16>
    %125 = vector.shape_cast %124 : vector<256x4xbf16> to vector<16x16x4xbf16>
    %126 = vector.extract_strided_slice %90 {offsets = [0, 4], sizes = [256, 4], strides = [1, 1]} : vector<256x8xf32> to vector<256x4xf32>
    %c0_58 = arith.constant 0 : index
    %c0_59 = arith.constant 0 : index
    %127 = vector.load %arg15[%c0_58, %c0_59] : memref<1x4xf32, #tpu.memory_space<vmem>>, vector<1x4xf32>
    %128 = vector.broadcast %127 : vector<1x4xf32> to vector<256x4xf32>
    %129 = arith.mulf %126, %128 : vector<256x4xf32>
    %c0_60 = arith.constant 0 : index
    %c0_61 = arith.constant 0 : index
    %130 = vector.load %arg16[%c0_60, %c0_61] : memref<1x4xf32, #tpu.memory_space<vmem>>, vector<1x4xf32>
    %131 = vector.broadcast %130 : vector<1x4xf32> to vector<256x4xf32>
    %132 = arith.addf %129, %131 : vector<256x4xf32>
    %cst_62 = arith.constant 0.000000e+00 : bf16
    %133 = vector.broadcast %cst_62 : bf16 to vector<16x1x4xbf16>
    %134 = vector.extract_strided_slice %125 {offsets = [0, 0, 0], sizes = [16, 15, 4], strides = [1, 1, 1]} : vector<16x16x4xbf16> to vector<16x15x4xbf16>
    %135 = tpu.concatenate %133, %134 in 1 : vector<16x1x4xbf16>, vector<16x15x4xbf16> -> vector<16x16x4xbf16>
    %136 = vector.extract_strided_slice %125 {offsets = [0, 1, 0], sizes = [16, 15, 4], strides = [1, 1, 1]} : vector<16x16x4xbf16> to vector<16x15x4xbf16>
    %137 = tpu.concatenate %136, %133 in 1 : vector<16x15x4xbf16>, vector<16x1x4xbf16> -> vector<16x16x4xbf16>
    %138 = tpu.concatenate %135, %125, %137 in 2 : vector<16x16x4xbf16>, vector<16x16x4xbf16>, vector<16x16x4xbf16> -> vector<16x16x12xbf16>
    %cst_63 = arith.constant 0.000000e+00 : bf16
    %139 = vector.broadcast %cst_63 : bf16 to vector<1x16x12xbf16>
    %140 = tpu.concatenate %139, %138, %139 in 0 : vector<1x16x12xbf16>, vector<16x16x12xbf16>, vector<1x16x12xbf16> -> vector<18x16x12xbf16>
    %141 = vector.shape_cast %140 : vector<18x16x12xbf16> to vector<288x12xbf16>
    %142 = vector.extract_strided_slice %141 {offsets = [0, 0], sizes = [256, 12], strides = [1, 1]} : vector<288x12xbf16> to vector<256x12xbf16>
    %c0_64 = arith.constant 0 : index
    %c0_65 = arith.constant 0 : index
    %c0_66 = arith.constant 0 : index
    %143 = vector.load %arg17[%c0_64, %c0_65, %c0_66] : memref<3x12x4xbf16, #tpu.memory_space<vmem>>, vector<1x12x4xbf16>
    %144 = vector.shape_cast %143 : vector<1x12x4xbf16> to vector<12x4xbf16>
    %cst_67 = arith.constant dense<0.000000e+00> : vector<256x4xf32>
    %145 = tpu.matmul %142, %144, %cst_67 {dimension_numbers = #tpu.dot_dimension_numbers<[1], [0], [0], [1], [0, 0, 1, 1], [], []>} : vector<256x12xbf16>, vector<12x4xbf16>, vector<256x4xf32> -> vector<256x4xf32>
    %146 = vector.extract_strided_slice %141 {offsets = [16, 0], sizes = [256, 12], strides = [1, 1]} : vector<288x12xbf16> to vector<256x12xbf16>
    %c1_68 = arith.constant 1 : index
    %c0_69 = arith.constant 0 : index
    %c0_70 = arith.constant 0 : index
    %147 = vector.load %arg17[%c1_68, %c0_69, %c0_70] : memref<3x12x4xbf16, #tpu.memory_space<vmem>>, vector<1x12x4xbf16>
    %148 = vector.shape_cast %147 : vector<1x12x4xbf16> to vector<12x4xbf16>
    %cst_71 = arith.constant dense<0.000000e+00> : vector<256x4xf32>
    %149 = tpu.matmul %146, %148, %cst_71 {dimension_numbers = #tpu.dot_dimension_numbers<[1], [0], [0], [1], [0, 0, 1, 1], [], []>} : vector<256x12xbf16>, vector<12x4xbf16>, vector<256x4xf32> -> vector<256x4xf32>
    %150 = arith.addf %145, %149 : vector<256x4xf32>
    %151 = vector.extract_strided_slice %141 {offsets = [32, 0], sizes = [256, 12], strides = [1, 1]} : vector<288x12xbf16> to vector<256x12xbf16>
    %c2_72 = arith.constant 2 : index
    %c0_73 = arith.constant 0 : index
    %c0_74 = arith.constant 0 : index
    %152 = vector.load %arg17[%c2_72, %c0_73, %c0_74] : memref<3x12x4xbf16, #tpu.memory_space<vmem>>, vector<1x12x4xbf16>
    %153 = vector.shape_cast %152 : vector<1x12x4xbf16> to vector<12x4xbf16>
    %cst_75 = arith.constant dense<0.000000e+00> : vector<256x4xf32>
    %154 = tpu.matmul %151, %153, %cst_75 {dimension_numbers = #tpu.dot_dimension_numbers<[1], [0], [0], [1], [0, 0, 1, 1], [], []>} : vector<256x12xbf16>, vector<12x4xbf16>, vector<256x4xf32> -> vector<256x4xf32>
    %155 = arith.addf %150, %154 : vector<256x4xf32>
    %c0_76 = arith.constant 0 : index
    %c0_77 = arith.constant 0 : index
    %156 = vector.load %arg18[%c0_76, %c0_77] : memref<1x4xf32, #tpu.memory_space<vmem>>, vector<1x4xf32>
    %157 = vector.broadcast %156 : vector<1x4xf32> to vector<256x4xf32>
    %158 = arith.mulf %155, %157 : vector<256x4xf32>
    %c0_78 = arith.constant 0 : index
    %c0_79 = arith.constant 0 : index
    %159 = vector.load %arg19[%c0_78, %c0_79] : memref<1x4xf32, #tpu.memory_space<vmem>>, vector<1x4xf32>
    %160 = vector.broadcast %159 : vector<1x4xf32> to vector<256x4xf32>
    %161 = arith.addf %158, %160 : vector<256x4xf32>
    %162 = arith.addf %161, %132 : vector<256x4xf32>
    %cst_80 = arith.constant 0.000000e+00 : f32
    %163 = vector.broadcast %cst_80 : f32 to vector<256x4xf32>
    %164 = arith.maximumf %162, %163 : vector<256x4xf32>
    %165 = vector.shape_cast %164 : vector<256x4xf32> to vector<16x16x4xf32>
    %c0_81 = arith.constant 0 : index
    %c0_82 = arith.constant 0 : index
    %c0_83 = arith.constant 0 : index
    %c0_84 = arith.constant 0 : index
    %166 = vector.load %arg20[%c0_81, %c0_82, %c0_83, %c0_84] : memref<1x16x16x4xf32, #tpu.memory_space<vmem>>, vector<1x16x16x4xf32>
    %167 = vector.shape_cast %166 : vector<1x16x16x4xf32> to vector<16x16x4xf32>
    %168 = vector.shape_cast %165 : vector<16x16x4xf32> to vector<1x16x16x4xf32>
    tpu.vector_store %arg20[%c0_81, %c0_82, %c0_83, %c0_84], %168 {strides = array<i32>} : memref<1x16x16x4xf32, #tpu.memory_space<vmem>>, vector<1x16x16x4xf32>,
    return
  }
  func.func @transform_0(%arg0: i32) -> (i32, i32, i32, i32) {
    %c0_i32 = arith.constant 0 : i32
    %c0_i32_0 = arith.constant 0 : i32
    %c0_i32_1 = arith.constant 0 : i32
    %c0_i32_2 = arith.constant 0 : i32
    return %arg0, %c0_i32, %c0_i32_0, %c0_i32_1 : i32, i32, i32, i32
  }
  func.func @transform_1(%arg0: i32) -> (i32, i32, i32, i32) {
    %c0_i32 = arith.constant 0 : i32
    %c0_i32_0 = arith.constant 0 : i32
    %c0_i32_1 = arith.constant 0 : i32
    %c0_i32_2 = arith.constant 0 : i32
    return %arg0, %c0_i32, %c0_i32_0, %c0_i32_1 : i32, i32, i32, i32
  }
  func.func @transform_2(%arg0: i32) -> (i32, i32) {
    %c0_i32 = arith.constant 0 : i32
    %c0_i32_0 = arith.constant 0 : i32
    %c0_i32_1 = arith.constant 0 : i32
    return %c0_i32, %c0_i32_0 : i32, i32
  }
  func.func @transform_3(%arg0: i32) -> (i32, i32) {
    %c0_i32 = arith.constant 0 : i32
    %c0_i32_0 = arith.constant 0 : i32
    %c0_i32_1 = arith.constant 0 : i32
    return %c0_i32, %c0_i32_0 : i32, i32
  }
  func.func @transform_4(%arg0: i32) -> (i32, i32) {
    %c0_i32 = arith.constant 0 : i32
    %c0_i32_0 = arith.constant 0 : i32
    %c0_i32_1 = arith.constant 0 : i32
    return %c0_i32, %c0_i32_0 : i32, i32
  }
  func.func @transform_5(%arg0: i32) -> (i32, i32) {
    %c0_i32 = arith.constant 0 : i32
    %c0_i32_0 = arith.constant 0 : i32
    %c0_i32_1 = arith.constant 0 : i32
    return %c0_i32, %c0_i32_0 : i32, i32
  }
  func.func @transform_6(%arg0: i32) -> (i32, i32) {
    %c0_i32 = arith.constant 0 : i32
    %c0_i32_0 = arith.constant 0 : i32
    %c0_i32_1 = arith.constant 0 : i32
    return %c0_i32, %c0_i32_0 : i32, i32
  }
  func.func @transform_7(%arg0: i32) -> (i32, i32) {
    %c0_i32 = arith.constant 0 : i32
    %c0_i32_0 = arith.constant 0 : i32
    %c0_i32_1 = arith.constant 0 : i32
    return %c0_i32, %c0_i32_0 : i32, i32
  }
  func.func @transform_8(%arg0: i32) -> (i32, i32) {
    %c0_i32 = arith.constant 0 : i32
    %c0_i32_0 = arith.constant 0 : i32
    %c0_i32_1 = arith.constant 0 : i32
    return %c0_i32, %c0_i32_0 : i32, i32
  }
  func.func @transform_9(%arg0: i32) -> (i32, i32, i32) {
    %c0_i32 = arith.constant 0 : i32
    %c0_i32_0 = arith.constant 0 : i32
    %c0_i32_1 = arith.constant 0 : i32
    %c0_i32_2 = arith.constant 0 : i32
    return %c0_i32, %c0_i32_0, %c0_i32_1 : i32, i32, i32
  }
  func.func @transform_10(%arg0: i32) -> (i32, i32) {
    %c0_i32 = arith.constant 0 : i32
    %c0_i32_0 = arith.constant 0 : i32
    %c0_i32_1 = arith.constant 0 : i32
    return %c0_i32, %c0_i32_0 : i32, i32
  }
  func.func @transform_11(%arg0: i32) -> (i32, i32) {
    %c0_i32 = arith.constant 0 : i32
    %c0_i32_0 = arith.constant 0 : i32
    %c0_i32_1 = arith.constant 0 : i32
    return %c0_i32, %c0_i32_0 : i32, i32
  }
  func.func @transform_12(%arg0: i32) -> (i32, i32) {
    %c0_i32 = arith.constant 0 : i32
    %c0_i32_0 = arith.constant 0 : i32
    %c0_i32_1 = arith.constant 0 : i32
    return %c0_i32, %c0_i32_0 : i32, i32
  }
  func.func @transform_13(%arg0: i32) -> (i32, i32) {
    %c0_i32 = arith.constant 0 : i32
    %c0_i32_0 = arith.constant 0 : i32
    %c0_i32_1 = arith.constant 0 : i32
    return %c0_i32, %c0_i32_0 : i32, i32
  }
  func.func @transform_14(%arg0: i32) -> (i32, i32) {
    %c0_i32 = arith.constant 0 : i32
    %c0_i32_0 = arith.constant 0 : i32
    %c0_i32_1 = arith.constant 0 : i32
    return %c0_i32, %c0_i32_0 : i32, i32
  }
  func.func @transform_15(%arg0: i32) -> (i32, i32) {
    %c0_i32 = arith.constant 0 : i32
    %c0_i32_0 = arith.constant 0 : i32
    %c0_i32_1 = arith.constant 0 : i32
    return %c0_i32, %c0_i32_0 : i32, i32
  }
  func.func @transform_16(%arg0: i32) -> (i32, i32, i32) {
    %c0_i32 = arith.constant 0 : i32
    %c0_i32_0 = arith.constant 0 : i32
    %c0_i32_1 = arith.constant 0 : i32
    %c0_i32_2 = arith.constant 0 : i32
    return %c0_i32, %c0_i32_0, %c0_i32_1 : i32, i32, i32
  }
  func.func @transform_17(%arg0: i32) -> (i32, i32) {
    %c0_i32 = arith.constant 0 : i32
    %c0_i32_0 = arith.constant 0 : i32
    %c0_i32_1 = arith.constant 0 : i32
    return %c0_i32, %c0_i32_0 : i32, i32
  }
  func.func @transform_18(%arg0: i32) -> (i32, i32) {
    %c0_i32 = arith.constant 0 : i32
    %c0_i32_0 = arith.constant 0 : i32
    %c0_i32_1 = arith.constant 0 : i32
    return %c0_i32, %c0_i32_0 : i32, i32
  }
  func.func @transform_19(%arg0: i32) -> (i32, i32, i32, i32) {
    %c0_i32 = arith.constant 0 : i32
    %c0_i32_0 = arith.constant 0 : i32
    %c0_i32_1 = arith.constant 0 : i32
    %c0_i32_2 = arith.constant 0 : i32
    return %arg0, %c0_i32, %c0_i32_0, %c0_i32_1 : i32, i32, i32, i32
  }
}

</mosaic_0001>

<bundles_post_ra>
// kernel: _lambda_.2
= control target key start
LH: loop header
LB: loop body
LE: loop exit
PB: predicated region body
PF: predicated region fallthrough
CT: control target
= control target key end

     0   :  { %s1594_s15 = smov 0   ;;  %s1865_s0 = inlined_call_operand.vmem [shape: bf16[2,8,8,16], index: 0, kind: input, shape index: {}]   ;;  %s1866_s1 = inlined_call_operand.vmem [shape: bf16[9,16,16], index: 1, kind: input, shape index: {}]   ;;  %s1867_s2 = inlined_call_operand.vmem [shape: f32[1,16], index: 2, kind: input, shape index: {}]   ;;  %s1868_s3 = inlined_call_operand.vmem [shape: f32[1,16], index: 3, kind: input, shape index: {}]   ;;  %s1869_s4 = inlined_call_operand.vmem [shape: bf16[2,16,8,32], index: 4, kind: output, shape index: {}]  }
   0x1 LB: > { %s1284_s16 = sadd.s32 4294967295, %s1565_s15   ;;  %p1288_p0 = scmp.ge.s32.totalorder %s1565_s15, 1  ;;  %s1565_s15 = sphi %s1594_s15, %s14_s15  }
   0x2   : > { %p162_p1 = scmp.lt.s32.totalorder %s1565_s15, 3 }
   0x4   : > { %p163_p2 = pnand %p1288_p0, %p162_p1 }
   0x5   : > { %p188_p3 = scmp.lt.s32.totalorder (!%p163_p2), %s1284_s16, 1  ;;  %s1568_s22 = smov (!%p163_p2), 16  }
   0x6   : > { %166 = sbr.rel (%p163_p2) target bundleno = 413 (0x19d), region = 36 }
   0xb   : > { %v1546_v0 = vld [vmem:[%s1866_s1 + $0x20] sm:$0xff]   ;;  %v1549_v1 = vld [vmem:[%s1866_s1 + $0x18] sm:$0xff]   ;;  %s1871_s16 = smov (!%p188_p3, %s1284_s16), 1  ;;  %v1550_v2 = vld [vmem:[%s1866_s1 + $0x28] sm:$0xff]   ;;  %vm238_vm0 = vcmask 130048   ;;  %vm1212_vm1 = vcmask 257024  }
   0xc   : > { %1409 = vmatprep.subr.bf16.mxu0 %v1546_v0  ;;  %1499 = vmatprep.subr.bf16.mxu1 %v1546_v0  ;;  %s1362_s23 = sshll.u32 %s1871_s16, 5  ;;  %v1553_v5 = vld [vmem:[%s1866_s1 + $0x8] sm:$0xff]   ;;  %v1554_v8 = vld [vmem:[%s1866_s1 + $0x38] sm:$0xff]   ;;  %v1555_v9 = vld [vmem:[%s1866_s1] sm:$0xff]   ;;  %s1363_s13 = sshll.u32 %s1871_s16, 6  ;;  %v1567_v13 = vmov 0.0|0.0  }
   0xd   : > { %1410 = vmatpush3.bf16.msra.mxu0 %v1546_v0  ;;  %1500 = vmatpush3.bf16.msra.mxu1 %v1546_v0  ;;  %s192_s26 = scalar_lea.vmem %s1865_s0, %s1362_s23  ;;  %v1556_v10 = vld [vmem:[%s1866_s1 + $0x10] sm:$0xff]   ;;  %v1558_v12 = vld [vmem:[%s1866_s1 + $0x40] sm:$0xff]   ;;  %s1675_s18 = scalar_lea.vmem %s1869_s4, %s1363_s13  ;;  %vm1105_vm2 = vcmask 1046528  }
   0xe   : > { %1419 = vmatprep.subr.bf16.mxu1 %v1549_v1  ;;  %1429 = vmatprep.subr.bf16.mxu0 %v1550_v2  ;;  %v1547_v3 = vld [vmem:[%s192_s26] sm:$0xff]   ;;  %v1548_v4 = vld [vmem:[%s192_s26 + $0x10] sm:$0xff]   ;;  %v1551_v6 = vld [vmem:[%s192_s26 + $0x8] sm:$0xff]   ;;  %1228 = vst.msk [vmem:[%s1675_s18 + $0x3c] sm:$0xf] %vm1212_vm1, %v1567_v13 }
   0xf   : > { %1411 = vmatprep.mubr.msk.bf16.mxu0 %vm238_vm0, %v1547_v3  ;;  %1415 = vmatprep.mubr.msk.bf16.mxu1 %vm238_vm0, %v1548_v4  ;;  %v1552_v7 = vld [vmem:[%s192_s26 + $0x18] sm:$0xff]   ;;  %v1557_v11 = vld [vmem:[%s1866_s1 + $0x30] sm:$0xff]   ;;  %v1698_v29 = vld [vmem:[%s1867_s2] ss:$0 sm:$0xff] }
  0x10   : > { %1412 = vmatmul.mubr.msk.bf16.vlgmr.msra.gmra.mxu0 %vm238_vm0, %v1551_v6  ;;  %1416 = vmatmul.mubr.msk.bf16.vlgmr.msra.gmra.mxu1 %vm238_vm0, %v1552_v7  ;;  %v1704_v36 = vld [vmem:[%s1868_s3] ss:$0 sm:$0xff] }
  0x11   : > { %1430 = vmatpush3.bf16.msra.mxu0 %v1550_v2  ;;  %1420 = vmatpush3.bf16.msra.mxu1 %v1549_v1 }
  0x12   : > { %1421 = vmatprep.mubr.msk.bf16.mxu1 %vm238_vm0, %v1547_v3  ;;  %1431 = vmatprep.mubr.msk.bf16.mxu0 %vm238_vm0, %v1547_v3 }
  0x13   : > { %1439 = vmatprep.subr.bf16.mxu1 %v1553_v5  ;;  %1449 = vmatprep.subr.bf16.mxu0 %v1554_v8 }
  0x18   : > { %1432 = vmatmul.mubr.msk.bf16.vlgmr.msra.gmra.mxu0 %vm238_vm0, %v1551_v6  ;;  %1422 = vmatmul.mubr.msk.bf16.vlgmr.msra.gmra.mxu1 %vm238_vm0, %v1551_v6 }
  0x19   : > { %1450 = vmatpush3.bf16.msra.mxu0 %v1554_v8  ;;  %1440 = vmatpush3.bf16.msra.mxu1 %v1553_v5 }
  0x1a   : > { %1425 = vmatprep.mubr.msk.bf16.mxu1 %vm238_vm0, %v1548_v4  ;;  %1435 = vmatprep.mubr.msk.bf16.mxu0 %vm238_vm0, %v1548_v4 }
  0x1b   : > { %1459 = vmatprep.subr.bf16.mxu1 %v1555_v9  ;;  %1469 = vmatprep.subr.bf16.mxu0 %v1556_v10 }
  0x20   : > { %1436 = vmatmul.mubr.msk.bf16.gmra.mxu0 %vm238_vm0, %v1552_v7  ;;  %1426 = vmatmul.mubr.msk.bf16.gmra.mxu1 %vm238_vm0, %v1552_v7 }
  0x21   : > { %1451 = vmatprep.mubr.msk.bf16.mxu0 %vm238_vm0, %v1547_v3  ;;  %1441 = vmatprep.mubr.msk.bf16.mxu1 %vm238_vm0, %v1547_v3 }
  0x28   : > { %1452 = vmatmul.mubr.msk.bf16.vlgmr.msra.gmra.mxu0 %vm238_vm0, %v1551_v6  ;;  %1442 = vmatmul.mubr.msk.bf16.vlgmr.msra.gmra.mxu1 %vm238_vm0, %v1551_v6 }
  0x29   : > { %1470 = vmatpush3.bf16.msra.mxu0 %v1556_v10  ;;  %1460 = vmatpush3.bf16.msra.mxu1 %v1555_v9 }
  0x2a   : > { %1445 = vmatprep.mubr.msk.bf16.mxu1 %vm238_vm0, %v1548_v4  ;;  %1455 = vmatprep.mubr.msk.bf16.mxu0 %vm238_vm0, %v1548_v4 }
  0x2b   : > { %1479 = vmatprep.subr.bf16.mxu1 %v1557_v11  ;;  %1489 = vmatprep.subr.bf16.mxu0 %v1558_v12 }
  0x30   : > { %1456 = vmatmul.mubr.msk.bf16.gmra.mxu0 %vm238_vm0, %v1552_v7  ;;  %1446 = vmatmul.mubr.msk.bf16.gmra.mxu1 %vm238_vm0, %v1552_v7 }
  0x31   : > { %1471 = vmatprep.mubr.msk.bf16.mxu0 %vm238_vm0, %v1547_v3  ;;  %1461 = vmatprep.mubr.msk.bf16.mxu1 %vm238_vm0, %v1547_v3 }
  0x38   : > { %1472 = vmatmul.mubr.msk.bf16.vlgmr.msra.gmra.mxu0 %vm238_vm0, %v1551_v6  ;;  %1462 = vmatmul.mubr.msk.bf16.vlgmr.msra.gmra.mxu1 %vm238_vm0, %v1551_v6 }
  0x39   : > { %1490 = vmatpush3.bf16.msra.mxu0 %v1558_v12  ;;  %1480 = vmatpush3.bf16.msra.mxu1 %v1557_v11 }
  0x3a   : > { %1465 = vmatprep.mubr.msk.bf16.mxu1 %vm238_vm0, %v1548_v4  ;;  %1475 = vmatprep.mubr.msk.bf16.mxu0 %vm238_vm0, %v1548_v4 }
  0x40   : > { %1476 = vmatmul.mubr.msk.bf16.gmra.mxu0 %vm238_vm0, %v1552_v7  ;;  %1466 = vmatmul.mubr.msk.bf16.gmra.mxu1 %vm238_vm0, %v1552_v7 }
  0x41   : > { %1491 = vmatprep.mubr.msk.bf16.mxu0 %vm238_vm0, %v1547_v3  ;;  %1481 = vmatprep.mubr.msk.bf16.mxu1 %vm238_vm0, %v1547_v3 }
  0x48   : > { %1492 = vmatmul.mubr.msk.bf16.vlgmr.msra.gmra.mxu0 %vm238_vm0, %v1551_v6  ;;  %1482 = vmatmul.mubr.msk.bf16.vlgmr.msra.gmra.mxu1 %vm238_vm0, %v1551_v6 }
  0x49   : > { %1495 = vmatprep.mubr.msk.bf16.mxu0 %vm238_vm0, %v1548_v4  ;;  %1485 = vmatprep.mubr.msk.bf16.mxu1 %vm238_vm0, %v1548_v4 }
  0x50   : > { %1496 = vmatmul.mubr.msk.bf16.gmra.mxu0 %vm238_vm0, %v1552_v7  ;;  %1486 = vmatmul.mubr.msk.bf16.gmra.mxu1 %vm238_vm0, %v1552_v7 }
  0xd0   : > { %v1679_v14 = vpop.f32.mrf.mxu0  ;;  %v1681_v15 = vpop.f32.mrf.mxu1 }
  0xd2   : > { %v1683_v16 = vpop.f32.mrf.mxu0  ;;  %v1685_v17 = vpop.f32.mrf.mxu1 }
  0xd4   : > { %v1687_v18 = vpop.f32.mrf.mxu0  ;;  %v1689_v19 = vpop.f32.mrf.mxu1 }
  0xd6   : > { %v1691_v20 = vpop.f32.mrf.mxu0  ;;  %v1693_v21 = vpop.f32.mrf.mxu1 }
  0xd8   : > { %v1433_v22 = vpop.f32.mrf.mxu0  ;;  %v1423_v23 = vpop.f32.mrf.mxu1 }
  0xd9   : > { %v510_v24 = vrot.slane %v1433_v22, 1 }
  0xda   : > { %v469_v25 = vpop.f32.mrf.mxu0  ;;  %v395_v27 = vpop.f32.mrf.mxu1 }
  0xdb   : > { %v526_v26 = vadd.f32 %v1423_v23, %v510_v24  ;;  %v508_v28 = vrot.slane %v469_v25, 1 }
  0xdc   : > { %v1434_v30 = vpop.f32.mrf.mxu0  ;;  %v1424_v33 = vpop.f32.mrf.mxu1 }
  0xdd   : > { %v534_v31 = vmul.f32 %v1698_v29, %v526_v26  ;;  %v524_v32 = vadd.f32 %v508_v28, %v395_v27  ;;  %v511_v34 = vrot.slane %v1434_v30, 1 }
  0xde   : > { %v472_v35 = vpop.f32.mrf.mxu0  ;;  %v398_v38 = vpop.f32.mrf.mxu1 }
  0xdf   : > { %v527_v37 = vadd.f32 %v1424_v33, %v511_v34  ;;  %v509_v39 = vrot.slane %v472_v35, 1  ;;  %v532_v40 = vmul.f32 %v1698_v29, %v524_v32  ;;  %v542_v42 = vadd.f32 %v1704_v36, %v534_v31 }
  0xe0   : > { %v1437_v41 = vpop.f32.mrf.mxu0  ;;  %v1427_v45 = vpop.f32.mrf.mxu1 }
  0xe1   : > { %v535_v43 = vmul.f32 %v1698_v29, %v527_v37  ;;  %v525_v44 = vadd.f32 %v509_v39, %v398_v38  ;;  %v514_v46 = vrot.slane %v1437_v41, 1  ;;  %v540_v53 = vadd.f32 %v1704_v36, %v532_v40 }
  0xe2   : > { %v485_v47 = vpop.f32.mrf.mxu0  ;;  %v411_v50 = vpop.f32.mrf.mxu1  ;;  %v550_v55 = vmax.f32 %v542_v42, 0.0 }
  0xe3   : > { %v533_v48 = vmul.f32 %v1698_v29, %v525_v44  ;;  %v530_v49 = vadd.f32 %v1427_v45, %v514_v46  ;;  %v512_v51 = vrot.slane %v485_v47, 1  ;;  %v543_v52 = vadd.f32 %v1704_v36, %v535_v43 }
  0xe4   : > { %v1438_v54 = vpop.f32.mrf.mxu0  ;;  %v1428_v59 = vpop.f32.mrf.mxu1  ;;  %v1108_v5 = vsel %vm1105_vm2, %v550_v55, 0.0  ;;  %v548_v7 = vmax.f32 %v540_v53, 0.0 }
  0xe5   : > { %v541_v56 = vadd.f32 %v1704_v36, %v533_v48  ;;  %v538_v57 = vmul.f32 %v1698_v29, %v530_v49  ;;  %v528_v58 = vadd.f32 %v512_v51, %v411_v50  ;;  %v515_v60 = vrot.slane %v1438_v54, 1 }
  0xe6   : > { %v488_v61 = vpop.f32.mrf.mxu0  ;;  %v551_v62 = vmax.f32 %v543_v52, 0.0  ;;  %v414_v1 = vpop.f32.mrf.mxu1  ;;  %v1106_v30 = vsel %vm1105_vm2, %v548_v7, 0.0 }
  0xe7   : > { %v536_v63 = vmul.f32 %v1698_v29, %v528_v58  ;;  %v531_v0 = vadd.f32 %v1428_v59, %v515_v60  ;;  %v513_v2 = vrot.slane %v488_v61, 1  ;;  %v549_v3 = vmax.f32 %v541_v56, 0.0 }
  0xe8   : > { %v1453_v4 = vpop.f32.mrf.mxu0  ;;  %v1109_v6 = vsel %vm1105_vm2, %v551_v62, 0.0  ;;  %v546_v8 = vadd.f32 %v1704_v36, %v538_v57  ;;  %v1443_v11 = vpop.f32.mrf.mxu1 }
  0xe9   : > { %v539_v9 = vmul.f32 %v1698_v29, %v531_v0  ;;  %v529_v10 = vadd.f32 %v513_v2, %v414_v1  ;;  %v1511_v12 = vpack.i.bf16 %v1109_v6, %v1108_v5  ;;  %v544_v13 = vadd.f32 %v1704_v36, %v536_v63 }
  0xea   : > { %v672_v22 = vpop.f32.mrf.mxu0  ;;  %v1107_v23 = vsel %vm1105_vm2, %v549_v3, 0.0  ;;  %v599_v25 = vpop.f32.mrf.mxu1  ;;  %v554_v27 = vmax.f32 %v546_v8, 0.0 }
  0xeb   : > { %v537_v24 = vmul.f32 %v1698_v29, %v529_v10  ;;  %1512 = vrot.lane.b32.xlu0 %v1511_v12, %s1568_s22  ;;  %v547_v26 = vadd.f32 %v1704_v36, %v539_v9  ;;  %v1516_v34 = vpack.i.bf16 %v1107_v23, %v1106_v30  ;;  %v552_v38 = vmax.f32 %v544_v13, 0.0 }
  0xec   : > { %v1454_v28 = vpop.f32.mrf.mxu0  ;;  %v1444_v32 = vpop.f32.mrf.mxu1  ;;  %v1112_v41 = vsel %vm1105_vm2, %v554_v27, 0.0 }
  0xed   : > { %v545_v31 = vadd.f32 %v1704_v36, %v537_v24  ;;  %v1726_v33 = vadd.f32 %v1454_v28, %v1443_v11  ;;  %v555_v35 = vmax.f32 %v547_v26, 0.0  ;;  %v1110_v52 = vsel %vm1105_vm2, %v552_v38, 0.0 }
  0xee   : > { %v674_v37 = vpop.f32.mrf.mxu0  ;;  %v602_v39 = vpop.f32.mrf.mxu1 }
  0xef   : > { %1517 = vrot.lane.b32.xlu0 %v1516_v34, %s1568_s22  ;;  %v1729_v40 = vadd.f32 %v674_v37, %v599_v25  ;;  %v1113_v42 = vsel %vm1105_vm2, %v555_v35, 0.0  ;;  %v553_v43 = vmax.f32 %v545_v31, 0.0  ;;  %v1733_v44 = vadd.f32 %v1453_v4, %v602_v39 }
  0xf0   : > { %v1457_v45 = vpop.f32.mrf.mxu0  ;;  %v1521_v46 = vpack.i.bf16 %v1113_v42, %v1112_v41  ;;  %v1447_v47 = vpop.f32.mrf.mxu1 }
  0xf1   : > { %v1111_v48 = vsel %vm1105_vm2, %v553_v43, 0.0 }
  0xf2   : > { %1522 = vrot.lane.b32.xlu1 %v1521_v46, %s1568_s22  ;;  %v687_v49 = vpop.f32.mrf.mxu0  ;;  %v615_v50 = vpop.f32.mrf.mxu1  ;;  %v1526_v54 = vpack.i.bf16 %v1111_v48, %v1110_v52 }
  0xf3   : > { %v1737_v51 = vadd.f32 %v1444_v32, %v687_v49 }
  0xf4   : > { %v1458_v53 = vpop.f32.mrf.mxu0  ;;  %v1448_v55 = vpop.f32.mrf.mxu1 }
  0xf5   : > { %v1740_v56 = vadd.f32 %v1458_v53, %v1447_v47 }
  0xf6   : > { %v690_v57 = vpop.f32.mrf.mxu0  ;;  %1527 = vrot.lane.b32.xlu1 %v1526_v54, %s1568_s22  ;;  %v618_v58 = vpop.f32.mrf.mxu1 }
  0xf7   : > { %v1743_v59 = vadd.f32 %v690_v57, %v615_v50  ;;  %v1745_v60 = vadd.f32 %v1457_v45, %v618_v58 }
  0xf8   : > { %v1473_v61 = vpop.f32.mrf.mxu0  ;;  %v1463_v62 = vpop.f32.mrf.mxu1 }
  0xf9   : > { %v884_v22 = vrot.slane %v1473_v61, 1 }
  0xfa   : > { %v845_v63 = vpop.f32.mrf.mxu0  ;;  %v772_v0 = vpop.f32.mrf.mxu1 }
  0xfb   : > { %v882_v27 = vrot.slane %v845_v63, 1  ;;  %v898_v35 = vadd.f32 %v1463_v62, %v884_v22 }
  0xfc   : > { %v1474_v1 = vpop.f32.mrf.mxu0  ;;  %v1464_v2 = vpop.f32.mrf.mxu1 }
  0xfd   : > { %v885_v41 = vrot.slane %v1474_v1, 1  ;;  %v896_v43 = vadd.f32 %v882_v27, %v772_v0 }
  0xfe   : > { %v848_v3 = vpop.f32.mrf.mxu0  ;;  %v775_v4 = vpop.f32.mrf.mxu1 }
  0xff   : > { %v883_v9 = vrot.slane %v848_v3, 1  ;;  %v899_v1 = vadd.f32 %v1464_v2, %v885_v41 }
 0x100   : > { %v1477_v5 = vpop.f32.mrf.mxu0  ;;  %v1467_v6 = vpop.f32.mrf.mxu1 }
 0x101   : > { %v897_v23 = vadd.f32 %v883_v9, %v775_v4  ;;  %v888_v49 = vrot.slane %v1477_v5, 1 }
 0x102   : > { %v861_v7 = vpop.f32.mrf.mxu0  ;;  %v788_v8 = vpop.f32.mrf.mxu1 }
 0x103   : > { %v886_v55 = vrot.slane %v861_v7, 1 }
 0x104   : > { %v1478_v10 = vpop.f32.mrf.mxu0  ;;  %v1468_v11 = vpop.f32.mrf.mxu1 }
 0x106   : > { %v864_v12 = vpop.f32.mrf.mxu0  ;;  %v791_v13 = vpop.f32.mrf.mxu1 }
 0x107   : > { %v887_v32 = vrot.slane %v864_v12, 1  ;;  %v902_v12 = vadd.f32 %v1467_v6, %v888_v49 }
 0x108   : > { %v1493_v24 = vpop.f32.mrf.mxu0  ;;  %v1483_v25 = vpop.f32.mrf.mxu1 }
 0x109   : > { %v1064_v26 = vrot.slane %v1493_v24, 1  ;;  %v977_v28 = vadd.f32 %v1483_v25, %v897_v23  ;;  %v901_v53 = vadd.f32 %v887_v32, %v791_v13  ;;  %v900_v24 = vadd.f32 %v886_v55, %v788_v8 }
 0x10a   : > { %v1026_v30 = vpop.f32.mrf.mxu0  ;;  %v946_v31 = vpop.f32.mrf.mxu1 }
 0x10b   : > { %v1078_v34 = vadd.f32 %v1064_v26, %v977_v28 }
 0x10c   : > { %v1494_v37 = vpop.f32.mrf.mxu0  ;;  %v1484_v38 = vpop.f32.mrf.mxu1 }
 0x10d   : > { %v1065_v39 = vrot.slane %v1494_v37, 1  ;;  %v978_v42 = vadd.f32 %v1484_v38, %v898_v35  ;;  %v1085_v46 = vmul.f32 %v1698_v29, %v1078_v34 }
 0x10e   : > { %v1028_v45 = vpop.f32.mrf.mxu0  ;;  %v948_v47 = vpop.f32.mrf.mxu1 }
 0x10f   : > { %v1063_v48 = vrot.slane %v1028_v45, 1  ;;  %v1079_v50 = vadd.f32 %v1065_v39, %v978_v42  ;;  %v976_v52 = vadd.f32 %v948_v47, %v896_v43  ;;  %v1092_v0 = vadd.f32 %v1704_v36, %v1085_v46 }
 0x110   : > { %v1497_v54 = vpop.f32.mrf.mxu0  ;;  %v1487_v57 = vpop.f32.mrf.mxu1 }
 0x111   : > { %v1068_v58 = vrot.slane %v1497_v54, 1  ;;  %v1086_v61 = vmul.f32 %v1698_v29, %v1079_v50  ;;  %v1077_v62 = vadd.f32 %v1063_v48, %v976_v52  ;;  %v981_v63 = vadd.f32 %v1487_v57, %v901_v53 }
 0x112   : > { %v1041_v3 = vpop.f32.mrf.mxu0  ;;  %v961_v4 = vpop.f32.mrf.mxu1  ;;  %v1099_v32 = vmax.f32 %v1092_v0, 0.0  ;;  %v325_v0 = vmul.f32 %v1687_v18, %v1698_v29 }
 0x113   : > { %v1066_v9 = vrot.slane %v1041_v3, 1  ;;  %v1084_v10 = vmul.f32 %v1698_v29, %v1077_v62  ;;  %v1082_v5 = vadd.f32 %v1068_v58, %v981_v63  ;;  %v979_v11 = vadd.f32 %v961_v4, %v899_v1 }
 0x114   : > { %v1498_v13 = vpop.f32.mrf.mxu0  ;;  %v1093_v7 = vadd.f32 %v1704_v36, %v1086_v61  ;;  %v1488_v22 = vpop.f32.mrf.mxu1  ;;  %v1115_v45 = vsel %vm1105_vm2, %v1099_v32, 0.0  ;;  %v324_v3 = vmul.f32 %v1679_v14, %v1698_v29 }
 0x115   : > { %v1069_v23 = vrot.slane %v1498_v13, 1  ;;  %v1091_v25 = vadd.f32 %v1704_v36, %v1084_v10  ;;  %v1089_v2 = vmul.f32 %v1698_v29, %v1082_v5  ;;  %v1080_v26 = vadd.f32 %v1066_v9, %v979_v11 }
 0x116   : > { %v982_v27 = vadd.f32 %v1488_v22, %v902_v12  ;;  %v1044_v28 = vpop.f32.mrf.mxu0  ;;  %v964_v30 = vpop.f32.mrf.mxu1  ;;  %v1100_v38 = vmax.f32 %v1093_v7, 0.0  ;;  %v338_v4 = vadd.f32 %v1704_v36, %v324_v3  ;;  %v322_v9 = vmul.f32 %v1698_v29, %v1683_v16 }
 0x117   : > { %v1067_v31 = vrot.slane %v1044_v28, 1  ;;  %v1087_v34 = vmul.f32 %v1698_v29, %v1080_v26  ;;  %v980_v6 = vadd.f32 %v964_v30, %v900_v24  ;;  %v1098_v37 = vmax.f32 %v1091_v25, 0.0 }
 0x118   : > { %v1083_v35 = vadd.f32 %v1069_v23, %v982_v27  ;;  %v1096_v39 = vadd.f32 %v1704_v36, %v1089_v2  ;;  %v1116_v52 = vsel %vm1105_vm2, %v1100_v38, 0.0  ;;  %v339_v10 = vadd.f32 %v1704_v36, %v325_v0 }
 0x119   : > { %v1094_v8 = vadd.f32 %v1704_v36, %v1087_v34  ;;  %v1081_v42 = vadd.f32 %v1067_v31, %v980_v6  ;;  %v1114_v43 = vsel %vm1105_vm2, %v1098_v37, 0.0  ;;  %v323_v5 = vmul.f32 %v1698_v29, %v1691_v20 }
 0x11a   : > { %v1090_v41 = vmul.f32 %v1698_v29, %v1083_v35  ;;  %v1531_v47 = vpack.i.bf16 %v1115_v45, %v1114_v43  ;;  %v1103_v54 = vmax.f32 %v1096_v39, 0.0  ;;  %v328_v11 = vmul.f32 %v1681_v15, %v1698_v29 }
 0x11b   : > { %v1088_v46 = vmul.f32 %v1698_v29, %v1081_v42  ;;  %v1101_v48 = vmax.f32 %v1094_v8, 0.0  ;;  %v329_v12 = vmul.f32 %v1689_v19, %v1698_v29  ;;  %v346_v14 = vmax.f32 %v338_v4, 0.0 }
 0x11c   : > { %v1097_v49 = vadd.f32 %v1704_v36, %v1090_v41  ;;  %1532 = vrot.lane.b32.xlu0 %v1531_v47, %s1568_s22  ;;  %v1119_v62 = vsel %vm1105_vm2, %v1103_v54, 0.0  ;;  %v336_v13 = vadd.f32 %v1704_v36, %v322_v9  ;;  %v347_v7 = vmax.f32 %v339_v10, 0.0 }
 0x11d   : > { %v1095_v50 = vadd.f32 %v1704_v36, %v1088_v46  ;;  %v1117_v53 = vsel %vm1105_vm2, %v1101_v48, 0.0  ;;  %v337_v22 = vadd.f32 %v1704_v36, %v323_v5  ;;  %v342_v24 = vadd.f32 %v1704_v36, %v328_v11 }
 0x11e   : > { %v1536_v55 = vpack.i.bf16 %v1117_v53, %v1116_v52  ;;  %v1104_v58 = vmax.f32 %v1097_v49, 0.0  ;;  %v326_v20 = vmul.f32 %v1698_v29, %v1685_v17  ;;  %v343_v15 = vadd.f32 %v1704_v36, %v329_v12 }
 0x11f   : > { %v1102_v57 = vmax.f32 %v1095_v50, 0.0  ;;  %v327_v19 = vmul.f32 %v1698_v29, %v1693_v21  ;;  %v344_v30 = vmax.f32 %v336_v13, 0.0  ;;  %v345_v31 = vmax.f32 %v337_v22, 0.0 }
 0x120   : > { %1537 = vrot.lane.b32.xlu1 %v1536_v55, %s1568_s22  ;;  %v1120_v1 = vsel %vm1105_vm2, %v1104_v58, 0.0  ;;  %v350_v35 = vmax.f32 %v342_v24, 0.0  ;;  %v340_v17 = vadd.f32 %v1704_v36, %v326_v20  ;;  %v351_v21 = vmax.f32 %v343_v15, 0.0 }
 0x121   : > { %v1118_v61 = vsel %vm1105_vm2, %v1102_v57, 0.0  ;;  %v341_v6 = vadd.f32 %v1704_v36, %v327_v19  ;;  %v712_v3 = vmul.f32 %v1698_v29, %v1737_v51 }
 0x122   : > { %v1541_v63 = vpack.i.bf16 %v1119_v62, %v1118_v61  ;;  %v348_v50 = vmax.f32 %v340_v17, 0.0  ;;  %v710_v62 = vmul.f32 %v1698_v29, %v1733_v44  ;;  %v715_v44 = vmul.f32 %v1698_v29, %v1740_v56 }
 0x123   : > { %v349_v52 = vmax.f32 %v341_v6, 0.0  ;;  %v719_v10 = vadd.f32 %v1704_v36, %v712_v3 }
 0x124   : > { %1542 = vrot.lane.b32.xlu0 %v1541_v63, %s1568_s22  ;;  %1180 = vrot.lane.b32.xlu1 %v1120_v1, %s1568_s22  ;;  %v709_v63 = vmul.f32 %v1698_v29, %v1729_v40  ;;  %v711_v1 = vmul.f32 %v1698_v29, %v1726_v33  ;;  %v717_v0 = vadd.f32 %v1704_v36, %v710_v62 }
 0x125   : > { %v714_v40 = vmul.f32 %v1698_v29, %v1745_v60  ;;  %v713_v33 = vmul.f32 %v1698_v29, %v1743_v59 }
 0x126   : > { %v716_v4 = vadd.f32 %v1704_v36, %v709_v63  ;;  %v718_v9 = vadd.f32 %v1704_v36, %v711_v1  ;;  %v724_v11 = vmax.f32 %v717_v0, 0.0 }
 0x127   : > { %v721_v22 = vadd.f32 %v1704_v36, %v714_v40  ;;  %v720_v56 = vadd.f32 %v1704_v36, %v713_v33 }
 0x128   : > { %v723_v51 = vmax.f32 %v716_v4, 0.0  ;;  %v725_v13 = vmax.f32 %v718_v9, 0.0 }
 0x15d   : > { %v1513_v18 = vpop.permute.xlu0 %1512 }
 0x15e   : > { %v1515_v23 = vunpack.i.h.bf16 %v1513_v18  ;;  %v1514_v16 = vunpack.i.l.bf16 %v1513_v18  ;;  %v726_v18 = vmax.f32 %v719_v10, 0.0 }
 0x160   : > { %v1156_v25 = vsel %vm238_vm0, %v347_v7, %v1515_v23  ;;  %v1155_v2 = vsel %vm238_vm0, %v346_v14, %v1514_v16  ;;  %v722_v7 = vadd.f32 %v1704_v36, %v715_v44 }
 0x161   : > { %v1202_v26 = vpack.c.bf16 %v1156_v25, %v1156_v25  ;;  %v1200_v27 = vpack.c.bf16 %v1155_v2, %v1155_v2  ;;  %v1518_v28 = vpop.permute.xlu0 %1517  ;;  %v727_v25 = vmax.f32 %v720_v56, 0.0 }
 0x162   : > { %v1520_v32 = vunpack.i.h.bf16 %v1518_v28  ;;  %v1519_v34 = vunpack.i.l.bf16 %v1518_v28  ;;  %v729_v15 = vmax.f32 %v722_v7, 0.0 }
 0x163   : > { %1219 = vst.msk [vmem:[%s1675_s18 + $0x18] sm:$0xf] %vm1212_vm1, %v1202_v26  ;;  %1217 = vst.msk [vmem:[%s1675_s18 + $0x10] sm:$0xf] %vm1212_vm1, %v1200_v27 }
 0x164   : > { %v1153_v37 = vsel %vm238_vm0, %v344_v30, %v1519_v34  ;;  %v1154_v38 = vsel %vm238_vm0, %v345_v31, %v1520_v32  ;;  %v1523_v39 = vpop.permute.xlu1 %1522  ;;  %v728_v30 = vmax.f32 %v721_v22, 0.0 }
 0x165   : > { %v1196_v8 = vpack.c.bf16 %v1153_v37, %v1153_v37  ;;  %v1198_v41 = vpack.c.bf16 %v1154_v38, %v1154_v38  ;;  %v1525_v42 = vunpack.i.h.bf16 %v1523_v39  ;;  %v1524_v43 = vunpack.i.l.bf16 %v1523_v39 }
 0x167   : > { %1213 = vst.msk [vmem:[%s1675_s18] sm:$0xf] %vm1212_vm1, %v1196_v8  ;;  %1215 = vst.msk [vmem:[%s1675_s18 + $0x8] sm:$0xf] %vm1212_vm1, %v1198_v41  ;;  %v1160_v45 = vsel %vm238_vm0, %v351_v21, %v1525_v42  ;;  %v1159_v46 = vsel %vm238_vm0, %v350_v35, %v1524_v43 }
 0x168   : > { %v1210_v47 = vpack.c.bf16 %v1160_v45, %v1160_v45  ;;  %v1208_v48 = vpack.c.bf16 %v1159_v46, %v1159_v46  ;;  %v1528_v49 = vpop.permute.xlu1 %1527 }
 0x169   : > { %v1530_v53 = vunpack.i.h.bf16 %v1528_v49  ;;  %v1529_v54 = vunpack.i.l.bf16 %v1528_v49 }
 0x16a   : > { %1227 = vst.msk [vmem:[%s1675_s18 + $0x38] sm:$0xf] %vm1212_vm1, %v1210_v47  ;;  %1225 = vst.msk [vmem:[%s1675_s18 + $0x30] sm:$0xf] %vm1212_vm1, %v1208_v48 }
 0x16b   : > { %v1158_v55 = vsel %vm238_vm0, %v349_v52, %v1530_v53  ;;  %v1157_v57 = vsel %vm238_vm0, %v348_v50, %v1529_v54 }
 0x16c   : > { %v1206_v58 = vpack.c.bf16 %v1158_v55, %v1158_v55  ;;  %v1204_v61 = vpack.c.bf16 %v1157_v57, %v1157_v57 }
 0x16e   : > { %1223 = vst.msk [vmem:[%s1675_s18 + $0x28] sm:$0xf] %vm1212_vm1, %v1206_v58  ;;  %1221 = vst.msk [vmem:[%s1675_s18 + $0x20] sm:$0xf] %vm1212_vm1, %v1204_v61 }
 0x18e   : > { %v1533_v5 = vpop.permute.xlu0 %1532 }
 0x18f   : > { %v1535_v12 = vunpack.i.h.bf16 %v1533_v5  ;;  %v1534_v14 = vunpack.i.l.bf16 %v1533_v5 }
 0x191   : > { %v1190_v60 = vsel %vm238_vm0, %v724_v11, %v1535_v12  ;;  %v1189_v23 = vsel %vm238_vm0, %v723_v51, %v1534_v14 }
 0x192   : > { %v1538_v29 = vpop.permute.xlu1 %1537  ;;  %v1199_v59 = vpack.c.bf16 %v1190_v60, %v1190_v60  ;;  %v1197_v16 = vpack.c.bf16 %v1189_v23, %v1189_v23 }
 0x193   : > { %v1540_v24 = vunpack.i.h.bf16 %v1538_v29  ;;  %v1539_v20 = vunpack.i.l.bf16 %v1538_v29 }
 0x194   : > { %1216 = vst.msk [vmem:[%s1675_s18 + $0xc] sm:$0xf] %vm1212_vm1, %v1199_v59  ;;  %1214 = vst.msk [vmem:[%s1675_s18 + $0x4] sm:$0xf] %vm1212_vm1, %v1197_v16 }
 0x195   : > { %v1192_v19 = vsel %vm238_vm0, %v726_v18, %v1540_v24  ;;  %v1191_v36 = vsel %vm238_vm0, %v725_v13, %v1539_v20 }
 0x196   : > { %v1203_v2 = vpack.c.bf16 %v1192_v19, %v1192_v19  ;;  %v1201_v26 = vpack.c.bf16 %v1191_v36, %v1191_v36  ;;  %v1543_v27 = vpop.permute.xlu0 %1542  ;;  %v1181_v28 = vpop.permute.xlu1 %1180 }
 0x197   : > { %v1545_v31 = vunpack.i.h.bf16 %v1543_v27  ;;  %v1544_v32 = vunpack.i.l.bf16 %v1543_v27  ;;  %v1195_v34 = vsel %vm238_vm0, %v729_v15, %v1181_v28 }
 0x198   : > { %1220 = vst.msk [vmem:[%s1675_s18 + $0x1c] sm:$0xf] %vm1212_vm1, %v1203_v2  ;;  %1218 = vst.msk [vmem:[%s1675_s18 + $0x14] sm:$0xf] %vm1212_vm1, %v1201_v26  ;;  %v1209_v35 = vpack.c.bf16 %v1195_v34, %v1195_v34 }
 0x199   : > { %v1194_v17 = vsel %vm238_vm0, %v728_v30, %v1545_v31  ;;  %v1193_v21 = vsel %vm238_vm0, %v727_v25, %v1544_v32 }
 0x19a   : > { %v1207_v6 = vpack.c.bf16 %v1194_v17, %v1194_v17  ;;  %v1205_v37 = vpack.c.bf16 %v1193_v21, %v1193_v21  ;;  %1226 = vst.msk [vmem:[%s1675_s18 + $0x34] sm:$0xf] %vm1212_vm1, %v1209_v35 }
 0x19c   : > { %1224 = vst.msk [vmem:[%s1675_s18 + $0x2c] sm:$0xf] %vm1212_vm1, %v1207_v6  ;;  %1222 = vst.msk [vmem:[%s1675_s18 + $0x24] sm:$0xf] %vm1212_vm1, %v1205_v37 }
 0x19d PF: > { %s14_s15 = sadd.s32 1, %s1565_s15  }
 0x19e   : > { %p11_p4 = scmp.ge.s32.totalorder %s14_s15, 4  }
 0x1a0   :  { %13 = sbr.rel (!%p11_p4) target bundleno = 1 (0x1), region = 74 }

// kernel: _lambda_.3
= control target key start
LH: loop header
LB: loop body
LE: loop exit
PB: predicated region body
PF: predicated region fallthrough
CT: control target
= control target key end

     0   :  { %s6816_s20 = smov 0   ;;  %s10222_s0 = inlined_call_operand.vmem [shape: bf16[2,16,16,16], index: 0, kind: input, shape index: {}]   ;;  %s10223_s1 = inlined_call_operand.vmem [shape: bf16[2,16,16,16], index: 1, kind: input, shape index: {}]   ;;  %s10224_s2 = inlined_call_operand.vmem [shape: bf16[32,2], index: 2, kind: input, shape index: {}]   ;;  %s10225_s3 = inlined_call_operand.vmem [shape: f32[1,2], index: 3, kind: input, shape index: {}]   ;;  %s10226_s4 = inlined_call_operand.vmem [shape: bf16[2,32], index: 4, kind: input, shape index: {}]   ;;  %s10227_s5 = inlined_call_operand.vmem [shape: f32[1,32], index: 5, kind: input, shape index: {}]   ;;  %s10228_s6 = inlined_call_operand.vmem [shape: bf16[16,1], index: 6, kind: input, shape index: {}]   ;;  %s10229_s7 = inlined_call_operand.vmem [shape: bf16[16,1], index: 7, kind: input, shape index: {}]   ;;  %s10230_s8 = inlined_call_operand.<no memory space> [shape: f32[1,1], index: 8, kind: input, shape index: {}]   ;;  %s10231_s9 = inlined_call_operand.vmem [shape: bf16[3,96,8], index: 9, kind: input, shape index: {}]   ;;  %s10232_s10 = inlined_call_operand.vmem [shape: f32[1,2], index: 10, kind: input, shape index: {}]   ;;  %s10233_s11 = inlined_call_operand.vmem [shape: f32[1,2], index: 11, kind: input, shape index: {}]   ;;  %s10234_s12 = inlined_call_operand.vmem [shape: f32[1,2], index: 12, kind: input, shape index: {}]   ;;  %s10235_s13 = inlined_call_operand.vmem [shape: f32[1,2], index: 13, kind: input, shape index: {}]   ;;  %s10236_s14 = inlined_call_operand.vmem [shape: f32[1,4], index: 14, kind: input, shape index: {}]   ;;  %s10237_s15 = inlined_call_operand.vmem [shape: f32[1,4], index: 15, kind: input, shape index: {}]   ;;  %s10238_s16 = inlined_call_operand.vmem [shape: bf16[3,12,4], index: 16, kind: input, shape index: {}]   ;;  %s10239_s17 = inlined_call_operand.vmem [shape: f32[1,4], index: 17, kind: input, shape index: {}]   ;;  %s10240_s18 = inlined_call_operand.vmem [shape: f32[1,4], index: 18, kind: input, shape index: {}]   ;;  %s10241_s19 = inlined_call_operand.vmem [shape: f32[2,16,16,4], index: 19, kind: output, shape index: {}]  }
   0x1   :  { %10386 = sst [smem:[#allocation67_spill]] %s10222_s0  ;;  %v24_v0 = vstv %s10230_s8 }
   0x2   :  { %10387 = sst [smem:[#allocation68_spill]] %s10223_s1  ;;  %25 = vst [vmem:[#allocation2] sm:$0x1] %v24_v0 }
   0x3   :  { %10388 = sst [smem:[#allocation69_spill]] %s10224_s2 }
   0x4   :  { %10389 = sst [smem:[#allocation70_spill]] %s10225_s3 }
   0x5 LB: > { %s5702_s21 = sadd.s32 4294967295, %s6698_s20   ;;  %p5706_p0 = scmp.ge.s32.totalorder %s6698_s20, 1  ;;  %s6698_s20 = sphi %s6816_s20, %s31_s20  }
   0x6   : > { %p549_p1 = scmp.lt.s32.totalorder %s6698_s20, 3 }
   0x8   : > { %p550_p2 = pnand %p5706_p0, %p549_p1 }
   0xa   : > { %553 = sbr.rel (%p550_p2) target bundleno = 2006 (0x7d6), region = 96 }
   0xf   : > { %p610_p3 = scmp.lt.s32.totalorder %s5702_s21, 1  ;;  %v6700_v1 = vmov 0.0   ;;  %s10390_s22 = sld [smem:[#allocation69_spill]]  ;;  %vm722_vm0 = vcmask 130048   ;;  %vm6701_vm1 = vmmov 0   ;;  %vm919_vm2 = vcmask 261120  }
  0x10   : > { %6127 = vmatprep.subr.bf16.mxu0 %v6700_v1  ;;  %6135 = vmatprep.subr.bf16.mxu1 %v6700_v1  ;;  %s10391_s25 = sld [smem:[#allocation68_spill]]  ;;  %s6702_s8 = smov 16   ;;  %vm971_vm3 = vcmask 1040384   ;;  %vm967_vm4 = vcmask 15360   ;;  %vm2605_vm5 = vcmask 1047552   ;;  %vm3008_vm10 = vcmask 392192  }
  0x11   : > { %s10637_s21 = smov (!%p610_p3, %s5702_s21), 1  ;;  %s10392_s28 = sld [smem:[#allocation67_spill]]  ;;  %6131 = vmatprep.mubr.msk.bf16.mxu0 %vm6701_vm1, %v6700_v1  ;;  %6137 = vmatprep.mubr.msk.bf16.mxu1 %vm6701_vm1, %v6700_v1  ;;  %vm2606_vm6 = vsmask.f32 7424  ;;  %vm2395_vm8 = vsmask.f32 256 }
  0x12   : > { %s5968_s2 = sshll.u32 %s10637_s21, 7  ;;  %s6704_s30 = smov 112   ;;  %vm7423_vm7 = vmand %vm2605_vm5, %vm2606_vm6  ;;  %vm3041_vm11 = vcmask 523264   ;;  %vm3074_vm12 = vcmask 654336   ;;  %vm3168_vm13 = vcmask 785408   ;;  %vm4793_vm14 = vcmask 1045504  }
  0x13   : > { %s6705_s1 = smov 32   ;;  %vm7873_vm9 = vmand %vm971_vm3, %vm2395_vm8  ;;  %vm4668_vm15 = vcmask 31744   ;;  %vm4760_vm1 = vcmask 97280   ;;  %s6712_s24 = smov 124  }
  0x15   : > { %v6469_v2 = vld [vmem:[%s10390_s22 + $0x8] sm:$0xff]  }
  0x16   : > { %6128 = vmatpush3.bf16.msra.mxu0 %v6469_v2  ;;  %s6838_s3 = scalar_lea.vmem %s10391_s25, %s5968_s2 }
  0x17   : > { %6129 = vmatprep.subr.bf16.mxu0 %v6700_v1  ;;  %v6841_v3 = vld [vmem:[%s6838_s3] sm:$0xff]   ;;  %v6844_v4 = vld [vmem:[%s6838_s3 + $0x8] sm:$0xff]   ;;  %v6850_v8 = vld [vmem:[%s6838_s3 + $0x10] sm:$0xff]   ;;  %s6941_s29 = scalar_lea.vmem %s10392_s28, %s5968_s2  ;;  %s10395_s28 = sld [smem:[#allocation70_spill]] }
  0x18   : > { %v10272_v5 = vunpack.c.l.bf16 %v6841_v3  ;;  %v10271_v6 = vunpack.c.h.bf16 %v6841_v3  ;;  %v10274_v7 = vunpack.c.l.bf16 %v6844_v4  ;;  %v10273_v9 = vunpack.c.h.bf16 %v6844_v4  ;;  %v6864_v14 = vld [vmem:[%s6838_s3 + $0x18] sm:$0xff]   ;;  %v6871_v18 = vld [vmem:[%s6838_s3 + $0x20] sm:$0xff]   ;;  %v6883_v27 = vld [vmem:[%s6838_s3 + $0x28] sm:$0xff]   ;;  %s6706_s2 = smov 64  }
  0x19   : > { %v10268_v10 = vunpack.c.l.bf16 %v6850_v8  ;;  %v10267_v16 = vunpack.c.h.bf16 %v6850_v8  ;;  %v10270_v20 = vunpack.c.l.bf16 %v6864_v14  ;;  %v10269_v23 = vunpack.c.h.bf16 %v6864_v14  ;;  %v6897_v35 = vld [vmem:[%s6838_s3 + $0x30] sm:$0xff]   ;;  %v6908_v42 = vld [vmem:[%s6838_s3 + $0x38] sm:$0xff]   ;;  %v6919_v49 = vld [vmem:[%s6838_s3 + $0x40] sm:$0xff]  }
  0x1a   : > { %v826_v11 = vsel %vm722_vm0, %v10272_v5, 0.0  ;;  %v827_v12 = vsel %vm722_vm0, %v10271_v6, 0.0  ;;  %v829_v13 = vsel %vm722_vm0, %v10274_v7, 0.0  ;;  %v831_v17 = vsel %vm722_vm0, %v10273_v9, 0.0  ;;  %v6930_v56 = vld [vmem:[%s6838_s3 + $0x48] sm:$0xff]   ;;  %v6948_v63 = vld [vmem:[%s6838_s3 + $0x50] sm:$0xff]  }
  0x1b   : > { %v828_v15 = vadd.f32 %v827_v12, %v826_v11  ;;  %v833_v21 = vsel %vm722_vm0, %v10268_v10, 0.0  ;;  %v10264_v24 = vunpack.c.l.bf16 %v6871_v18  ;;  %v835_v25 = vsel %vm722_vm0, %v10267_v16, 0.0  ;;  %v6955_v12 = vld [vmem:[%s6941_s29] sm:$0xff]   ;;  %v7092_v1 = vld [vmem:[%s6941_s29 + $0x30] sm:$0xff]  }
  0x1c   : > { %v837_v28 = vsel %vm722_vm0, %v10270_v20, 0.0  ;;  %v10263_v30 = vunpack.c.h.bf16 %v6871_v18  ;;  %v839_v31 = vsel %vm722_vm0, %v10269_v23, 0.0  ;;  %v10266_v34 = vunpack.c.l.bf16 %v6883_v27 }
  0x1d   : > { %v830_v19 = vadd.f32 %v829_v13, %v828_v15  ;;  %v841_v32 = vsel %vm722_vm0, %v10264_v24, 0.0  ;;  %v10265_v37 = vunpack.c.h.bf16 %v6883_v27  ;;  %v10260_v40 = vunpack.c.l.bf16 %v6897_v35 }
  0x1e   : > { %v843_v38 = vsel %vm722_vm0, %v10263_v30, 0.0  ;;  %v845_v41 = vsel %vm722_vm0, %v10266_v34, 0.0  ;;  %v10259_v44 = vunpack.c.h.bf16 %v6897_v35  ;;  %v10262_v47 = vunpack.c.l.bf16 %v6908_v42 }
  0x1f   : > { %v832_v22 = vadd.f32 %v831_v17, %v830_v19  ;;  %v847_v45 = vsel %vm722_vm0, %v10265_v37, 0.0  ;;  %v849_v48 = vsel %vm722_vm0, %v10260_v40, 0.0  ;;  %v10261_v51 = vunpack.c.h.bf16 %v6908_v42  ;;  %v6962_v19 = vld [vmem:[%s6838_s3 + $0x58] sm:$0xff]  }
  0x20   : > { %v851_v52 = vsel %vm722_vm0, %v10259_v44, 0.0  ;;  %v10256_v54 = vunpack.c.l.bf16 %v6919_v49  ;;  %v853_v55 = vsel %vm722_vm0, %v10262_v47, 0.0  ;;  %v10254_v58 = vunpack.c.h.bf16 %v6919_v49 }
  0x21   : > { %v834_v26 = vadd.f32 %v833_v21, %v832_v22  ;;  %v855_v59 = vsel %vm722_vm0, %v10261_v51, 0.0  ;;  %v10258_v61 = vunpack.c.l.bf16 %v6930_v56  ;;  %v10257_v2 = vunpack.c.h.bf16 %v6930_v56 }
  0x22   : > { %v857_v62 = vsel %vm722_vm0, %v10256_v54, 0.0  ;;  %v859_v11 = vsel %vm722_vm0, %v10254_v58, 0.0  ;;  %v10247_v15 = vunpack.c.l.bf16 %v6948_v63  ;;  %v10306_v22 = vunpack.c.l.bf16 %v6955_v12 }
  0x23   : > { %v836_v29 = vadd.f32 %v835_v25, %v834_v26  ;;  %v861_v17 = vsel %vm722_vm0, %v10258_v61, 0.0  ;;  %v10305_v25 = vunpack.c.h.bf16 %v6955_v12  ;;  %v10244_v26 = vunpack.c.h.bf16 %v6948_v63 }
  0x25   : > { %v838_v33 = vadd.f32 %v837_v28, %v836_v29  ;;  %v863_v28 = vsel %vm722_vm0, %v10257_v2, 0.0  ;;  %v6971_v29 = vld [vmem:[%s6941_s29 + $0x8] sm:$0xff]  }
  0x27   : > { %v840_v36 = vadd.f32 %v839_v31, %v838_v33  ;;  %v865_v33 = vsel %vm722_vm0, %v10247_v15, 0.0 }
  0x29   : > { %v842_v39 = vadd.f32 %v841_v32, %v840_v36  ;;  %v10251_v32 = vunpack.c.l.bf16 %v6962_v19  ;;  %v6978_v36 = vld [vmem:[%s6838_s3 + $0x60] sm:$0xff]  }
  0x2b   : > { %v844_v43 = vadd.f32 %v843_v38, %v842_v39  ;;  %v10308_v39 = vunpack.c.l.bf16 %v6971_v29 }
  0x2d   : > { %v846_v46 = vadd.f32 %v845_v41, %v844_v43  ;;  %v723_v41 = vsel %vm722_vm0, %v10306_v22, 0.0  ;;  %v724_v43 = vsel %vm722_vm0, %v10305_v25, 0.0 }
  0x2f   : > { %v848_v50 = vadd.f32 %v847_v45, %v846_v46  ;;  %v10249_v45 = vunpack.c.h.bf16 %v6962_v19  ;;  %v867_v46 = vsel %vm722_vm0, %v10244_v26, 0.0 }
  0x31   : > { %v850_v53 = vadd.f32 %v849_v48, %v848_v50  ;;  %v10243_v50 = vunpack.c.l.bf16 %v6978_v36 }
  0x33   : > { %v852_v57 = vadd.f32 %v851_v52, %v850_v53  ;;  %v869_v52 = vsel %vm722_vm0, %v10251_v32, 0.0  ;;  %v725_v53 = vadd.f32 %v724_v43, %v723_v41  ;;  %v7065_v32 = vld [vmem:[%s6941_s29 + $0x20] sm:$0xff]  }
  0x35   : > { %v854_v60 = vadd.f32 %v853_v55, %v852_v57  ;;  %v6996_v55 = vld [vmem:[%s6838_s3 + $0x68] sm:$0xff]  }
  0x36   : > { %v10248_v43 = vunpack.c.h.bf16 %v6996_v55 }
  0x37   : > { %v856_v0 = vadd.f32 %v855_v59, %v854_v60  ;;  %v10307_v59 = vunpack.c.h.bf16 %v6971_v29  ;;  %v726_v60 = vsel %vm722_vm0, %v10308_v39, 0.0 }
  0x39   : > { %v858_v13 = vadd.f32 %v857_v62, %v856_v0  ;;  %v10245_v62 = vunpack.c.h.bf16 %v6978_v36  ;;  %v871_v0 = vsel %vm722_vm0, %v10249_v45, 0.0  ;;  %v728_v41 = vsel %vm722_vm0, %v10307_v59, 0.0 }
  0x3b   : > { %v860_v21 = vadd.f32 %v859_v11, %v858_v13  ;;  %v7007_v11 = vld [vmem:[%s6941_s29 + $0x10] sm:$0xff]  }
  0x3d   : > { %v862_v31 = vadd.f32 %v861_v17, %v860_v21  ;;  %v10246_v17 = vunpack.c.l.bf16 %v6996_v55  ;;  %v873_v21 = vsel %vm722_vm0, %v10243_v50, 0.0 }
  0x3f   : > { %v864_v38 = vadd.f32 %v863_v28, %v862_v31  ;;  %v727_v28 = vadd.f32 %v726_v60, %v725_v53  ;;  %v7014_v31 = vld [vmem:[%s6838_s3 + $0x70] sm:$0xff]   ;;  %v877_v53 = vsel %vm722_vm0, %v10246_v17, 0.0  ;;  %v7029_v60 = vld [vmem:[%s6838_s3 + $0x78] sm:$0xff]  }
  0x40   : > { %10393 = vst [vmem:[#allocation3_spill] sm:$0xff] %v7014_v31  ;;  %10394 = vst [vmem:[#allocation4_spill] sm:$0xff] %v7029_v60  ;;  %v10252_v26 = vunpack.c.h.bf16 %v7014_v31 }
  0x41   : > { %v866_v48 = vadd.f32 %v865_v33, %v864_v38  ;;  %v10302_v38 = vunpack.c.l.bf16 %v7007_v11 }
  0x43   : > { %v868_v57 = vadd.f32 %v867_v46, %v866_v48  ;;  %v875_v46 = vsel %vm722_vm0, %v10245_v62, 0.0  ;;  %v730_v50 = vsel %vm722_vm0, %v10302_v38, 0.0 }
  0x45   : > { %v870_v13 = vadd.f32 %v869_v52, %v868_v57  ;;  %v10250_v52 = vunpack.c.l.bf16 %v7014_v31  ;;  %v729_v57 = vadd.f32 %v728_v41, %v727_v28  ;;  %v10253_v28 = vunpack.c.l.bf16 %v7029_v60 }
  0x47   : > { %v872_v33 = vadd.f32 %v871_v0, %v870_v13  ;;  %v10301_v13 = vunpack.c.h.bf16 %v7007_v11  ;;  %v881_v41 = vsel %vm722_vm0, %v10250_v52, 0.0  ;;  %v885_v45 = vsel %vm722_vm0, %v10253_v28, 0.0 }
  0x48   : > { %v10298_v28 = vunpack.c.l.bf16 %v7065_v32 }
  0x49   : > { %v874_v48 = vadd.f32 %v873_v21, %v872_v33  ;;  %v879_v21 = vsel %vm722_vm0, %v10248_v43, 0.0  ;;  %v7040_v33 = vld [vmem:[%s6941_s29 + $0x18] sm:$0xff]   ;;  %v732_v15 = vsel %vm722_vm0, %v10301_v13, 0.0  ;;  %v10255_v43 = vunpack.c.h.bf16 %v7029_v60 }
  0x4a   : > { %v10304_v17 = vunpack.c.l.bf16 %v7040_v33 }
  0x4b   : > { %v876_v0 = vadd.f32 %v875_v46, %v874_v48  ;;  %v731_v46 = vadd.f32 %v730_v50, %v729_v57 }
  0x4c   : > { %v734_v57 = vsel %vm722_vm0, %v10304_v17, 0.0 }
  0x4d   : > { %v878_v62 = vadd.f32 %v877_v53, %v876_v0  ;;  %v883_v53 = vsel %vm722_vm0, %v10252_v26, 0.0  ;;  %v733_v52 = vadd.f32 %v732_v15, %v731_v46  ;;  %v6470_v46 = vld [vmem:[%s10390_s22] sm:$0xff]  }
  0x4e   : > { %6130 = vmatpush3.bf16.msra.mxu0 %v6470_v46 }
  0x4f   : > { %v880_v48 = vadd.f32 %v879_v21, %v878_v62  ;;  %v10303_v62 = vunpack.c.h.bf16 %v7040_v33  ;;  %v887_v21 = vsel %vm722_vm0, %v10255_v43, 0.0  ;;  %v10297_v43 = vunpack.c.h.bf16 %v7065_v32 }
  0x51   : > { %v882_v0 = vadd.f32 %v881_v41, %v880_v48  ;;  %v735_v48 = vadd.f32 %v734_v57, %v733_v52  ;;  %v736_v15 = vsel %vm722_vm0, %v10303_v62, 0.0  ;;  %v7079_v52 = vld [vmem:[%s6941_s29 + $0x28] sm:$0xff]  }
  0x53   : > { %v884_v50 = vadd.f32 %v883_v53, %v882_v0  ;;  %v737_v0 = vadd.f32 %v736_v15, %v735_v48 }
  0x55   : > { %v886_v41 = vadd.f32 %v885_v45, %v884_v50  ;;  %v738_v45 = vsel %vm722_vm0, %v10298_v28, 0.0  ;;  %v7302_v28 = vld [vmem:[#allocation2] ss:$0 sm:$0xff] }
  0x56   : > { %v739_v57 = vadd.f32 %v738_v45, %v737_v0  ;;  %v10294_v45 = vunpack.c.l.bf16 %v7092_v1 }
  0x57   : > { %v888_v26 = vadd.f32 %v887_v21, %v886_v41  ;;  %v10300_v41 = vunpack.c.l.bf16 %v7079_v52 }
  0x59   : > { %v889_v53 = vrot.slane %v888_v26, 4  ;;  %v742_v54 = vsel %vm722_vm0, %v10300_v41, 0.0 }
  0x5b   : > { %v890_v58 = vadd.f32 %v889_v53, %v888_v26  ;;  %v740_v26 = vsel %vm722_vm0, %v10297_v43, 0.0  ;;  %v10299_v53 = vunpack.c.h.bf16 %v7079_v52 }
  0x5c   : > { %v741_v15 = vadd.f32 %v740_v26, %v739_v57  ;;  %v746_v26 = vsel %vm722_vm0, %v10294_v45, 0.0 }
  0x5d   : > { %v891_v50 = vrot.slane %v890_v58, 2 }
  0x5f   : > { %v892_v21 = vadd.f32 %v891_v50, %v890_v58  ;;  %v743_v58 = vadd.f32 %v742_v54, %v741_v15  ;;  %v744_v50 = vsel %vm722_vm0, %v10299_v53, 0.0 }
  0x61   : > { %v893_v48 = vrot.slane %v892_v21, 1  ;;  %v745_v57 = vadd.f32 %v744_v50, %v743_v58  ;;  %v7115_v50 = vld [vmem:[%s6941_s29 + $0x40] sm:$0xff]  }
  0x62   : > { %v10285_v44 = vunpack.c.l.bf16 %v7115_v50  ;;  %v10284_v40 = vunpack.c.h.bf16 %v7115_v50 }
  0x63   : > { %v894_v46 = vadd.f32 %v893_v48, %v892_v21  ;;  %v10289_v21 = vunpack.c.h.bf16 %v7092_v1  ;;  %v7104_v48 = vld [vmem:[%s6941_s29 + $0x38] sm:$0xff]   ;;  %v747_v54 = vadd.f32 %v746_v26, %v745_v57 }
  0x64   : > { %v10296_v15 = vunpack.c.l.bf16 %v7104_v48  ;;  %v10295_v2 = vunpack.c.h.bf16 %v7104_v48 }
  0x65   : > { %v895_v0 = vmul.f32 0.00390625, %v894_v46  ;;  %v748_v46 = vsel %vm722_vm0, %v10289_v21, 0.0 }
  0x66   : > { %v750_v58 = vsel %vm722_vm0, %v10296_v15, 0.0  ;;  %v752_v57 = vsel %vm722_vm0, %v10295_v2, 0.0 }
  0x67   : > { %897 = vrot.lane.b32.xlu0 %v895_v0, %s6702_s8  ;;  %v749_v0 = vadd.f32 %v748_v46, %v747_v54  ;;  %v754_v54 = vsel %vm722_vm0, %v10285_v44, 0.0  ;;  %v7126_v46 = vld [vmem:[%s6941_s29 + $0x48] sm:$0xff]  }
  0x68   : > { %v10286_v47 = vunpack.c.l.bf16 %v7126_v46  ;;  %v10287_v30 = vunpack.c.h.bf16 %v7126_v46 }
  0x69   : > { %v751_v61 = vadd.f32 %v750_v58, %v749_v0  ;;  %v756_v0 = vsel %vm722_vm0, %v10284_v40, 0.0 }
  0x6b   : > { %v753_v26 = vadd.f32 %v752_v57, %v751_v61  ;;  %v758_v61 = vsel %vm722_vm0, %v10286_v47, 0.0  ;;  %v7137_v57 = vld [vmem:[%s6941_s29 + $0x50] sm:$0xff]  }
  0x6c   : > { %v10276_v37 = vunpack.c.l.bf16 %v7137_v57  ;;  %v10275_v34 = vunpack.c.h.bf16 %v7137_v57 }
  0x6d   : > { %v755_v51 = vadd.f32 %v754_v54, %v753_v26  ;;  %v760_v26 = vsel %vm722_vm0, %v10287_v30, 0.0 }
  0x6f   : > { %v757_v58 = vadd.f32 %v756_v0, %v755_v51  ;;  %v762_v51 = vsel %vm722_vm0, %v10276_v37, 0.0  ;;  %v7148_v0 = vld [vmem:[%s6941_s29 + $0x58] sm:$0xff]  }
  0x70   : > { %v10281_v10 = vunpack.c.l.bf16 %v7148_v0  ;;  %v10278_v23 = vunpack.c.h.bf16 %v7148_v0 }
  0x71   : > { %v759_v24 = vadd.f32 %v758_v61, %v757_v58  ;;  %v764_v58 = vsel %vm722_vm0, %v10275_v34, 0.0 }
  0x73   : > { %v761_v54 = vadd.f32 %v760_v26, %v759_v24  ;;  %v766_v24 = vsel %vm722_vm0, %v10281_v10, 0.0  ;;  %v7159_v26 = vld [vmem:[%s6941_s29 + $0x60] sm:$0xff]  }
  0x74   : > { %v10277_v6 = vunpack.c.l.bf16 %v7159_v26  ;;  %v10279_v5 = vunpack.c.h.bf16 %v7159_v26 }
  0x75   : > { %v763_v16 = vadd.f32 %v762_v51, %v761_v54  ;;  %v768_v54 = vsel %vm722_vm0, %v10278_v23, 0.0 }
  0x77   : > { %v765_v61 = vadd.f32 %v764_v58, %v763_v16  ;;  %v770_v16 = vsel %vm722_vm0, %v10277_v6, 0.0  ;;  %v7170_v58 = vld [vmem:[%s6941_s29 + $0x68] sm:$0xff]  }
  0x78   : > { %v10280_v7 = vunpack.c.l.bf16 %v7170_v58  ;;  %v10283_v34 = vunpack.c.h.bf16 %v7170_v58 }
  0x79   : > { %v767_v20 = vadd.f32 %v766_v24, %v765_v61  ;;  %v772_v61 = vsel %vm722_vm0, %v10279_v5, 0.0 }
  0x7b   : > { %v769_v51 = vadd.f32 %v768_v54, %v767_v20  ;;  %v774_v20 = vsel %vm722_vm0, %v10280_v7, 0.0  ;;  %v7181_v54 = vld [vmem:[%s6941_s29 + $0x70] sm:$0xff]  }
  0x7c   : > { %v10282_v6 = vunpack.c.l.bf16 %v7181_v54  ;;  %v10288_v23 = vunpack.c.h.bf16 %v7181_v54 }
  0x7d   : > { %v771_v9 = vadd.f32 %v770_v16, %v769_v51  ;;  %v776_v51 = vsel %vm722_vm0, %v10283_v34, 0.0 }
  0x7f   : > { %v773_v24 = vadd.f32 %v772_v61, %v771_v9  ;;  %v778_v9 = vsel %vm722_vm0, %v10282_v6, 0.0  ;;  %v7192_v61 = vld [vmem:[%s6941_s29 + $0x78] sm:$0xff]  }
  0x80   : > { %v10293_v7 = vunpack.c.l.bf16 %v7192_v61  ;;  %v10290_v10 = vunpack.c.h.bf16 %v7192_v61 }
  0x81   : > { %v775_v37 = vadd.f32 %v774_v20, %v773_v24  ;;  %v780_v24 = vsel %vm722_vm0, %v10288_v23, 0.0 }
  0x82   : > { %v784_v6 = vsel %vm722_vm0, %v10290_v10, 0.0 }
  0x83   : > { %v777_v16 = vadd.f32 %v776_v51, %v775_v37  ;;  %v782_v37 = vsel %vm722_vm0, %v10293_v7, 0.0 }
  0x85   : > { %v779_v5 = vadd.f32 %v778_v9, %v777_v16 }
  0x87   : > { %v781_v20 = vadd.f32 %v780_v24, %v779_v5 }
  0x89   : > { %v783_v51 = vadd.f32 %v782_v37, %v781_v20  ;;  %v965_v20 = vld [vmem:[%s10226_s4] sm:$0x1] }
  0x8b   : > { %v785_v34 = vadd.f32 %v784_v6, %v783_v51  ;;  %v973_v6 = vsel %vm971_vm3, %v965_v20, 0 }
  0x8c   : > { %6136 = vmatpush3.bf16.msra.mxu1 %v973_v6 }
  0x8d   : > { %v786_v16 = vrot.slane %v785_v34, 4 }
  0x8f   : > { %v787_v9 = vadd.f32 %v786_v16, %v785_v34  ;;  %v6471_v34 = vld [vmem:[%s10228_s6] sm:$0xff]  }
  0x90   : > { %6175 = vmatprep.subr.bf16.mxu0 %v6471_v34 }
  0x91   : > { %v788_v40 = vrot.slane %v787_v9, 2 }
  0x93   : > { %v789_v44 = vadd.f32 %v788_v40, %v787_v9  ;;  %v10291_v9 = vmov 0  }
  0x94   : > { %6467 = vset.pattern.permute.xlu1 %v10291_v9  ;;  %6468 = vset.pattern.permute.xlu0 %v10291_v9 }
  0x95   : > { %v790_v47 = vrot.slane %v789_v44, 1 }
  0x97   : > { %v791_v30 = vadd.f32 %v790_v47, %v789_v44 }
  0x99   : > { %v793_v23 = vmul.f32 0.00390625, %v791_v30  ;;  %v906_v30 = vld [vmem:[%s10395_s28] sm:$0x1]  ;;  %s6709_s28 = smov 2  }
  0xd9   : > { %v898_v5 = vpop.permute.xlu0 %897 }
  0xda   : > { %v900_v24 = vsel %vm722_vm0, %v793_v23, %v898_v5  ;;  %v6472_v23 = vld [vmem:[%s10229_s7] sm:$0xff]  }
  0xdb   : > { %v901_v21 = vpack.c.bf16 %v900_v24, %v900_v24  ;;  %6141 = vmatprep.subr.bf16.mxu1 %v6472_v23 }
  0xdd   : > { %6132 = vmatmul.mubr.msk.bf16.vlgmr.msra.gmra.mxu0 %vm919_vm2, %v901_v21 }
  0xde   : > { %6176 = vmatpush3.bf16.msra.mxu0 %v6471_v34  ;;  %6177 = vmatprep.mubr.msk.bf16.mxu0 %vm722_vm0, %v6955_v12 }
  0xe5   : > { %6178 = vmatmul.mubr.msk.bf16.vlgmr.msra.gmra.mxu0 %vm722_vm0, %v6971_v29 }
  0xe6   : > { %6181 = vmatprep.mubr.msk.bf16.mxu0 %vm722_vm0, %v7007_v11 }
  0xed   : > { %6182 = vmatmul.mubr.msk.bf16.gmra.mxu0 %vm722_vm0, %v7040_v33 }
  0xee   : > { %6185 = vmatprep.mubr.msk.bf16.mxu0 %vm722_vm0, %v7065_v32 }
  0xf5   : > { %6186 = vmatmul.mubr.msk.bf16.gmra.mxu0 %vm722_vm0, %v7079_v52 }
  0xf6   : > { %6189 = vmatprep.mubr.msk.bf16.mxu0 %vm722_vm0, %v7092_v1 }
  0xfd   : > { %6190 = vmatmul.mubr.msk.bf16.gmra.mxu0 %vm722_vm0, %v7104_v48 }
  0xfe   : > { %6193 = vmatprep.mubr.msk.bf16.mxu0 %vm722_vm0, %v7115_v50 }
 0x105   : > { %6194 = vmatmul.mubr.msk.bf16.gmra.mxu0 %vm722_vm0, %v7126_v46 }
 0x106   : > { %6197 = vmatprep.mubr.msk.bf16.mxu0 %vm722_vm0, %v7137_v57 }
 0x10d   : > { %6198 = vmatmul.mubr.msk.bf16.gmra.mxu0 %vm722_vm0, %v7148_v0 }
 0x10e   : > { %6201 = vmatprep.mubr.msk.bf16.mxu0 %vm722_vm0, %v7159_v26 }
 0x115   : > { %6202 = vmatmul.mubr.msk.bf16.gmra.mxu0 %vm722_vm0, %v7170_v58 }
 0x116   : > { %6205 = vmatprep.mubr.msk.bf16.mxu0 %vm722_vm0, %v7181_v54 }
 0x11d   : > { %6206 = vmatmul.mubr.msk.bf16.gmra.mxu0 %vm722_vm0, %v7192_v61 }
 0x11e   : > { %6265 = vmatprep.mubr.bf16.mxu0 %v10291_v9 }
 0x19d   : > { %v957_v40 = vpop.f32.mrf.mxu0 }
 0x19e   : > { %v958_v44 = vadd.f32 %v957_v40, %v906_v30 }
 0x19f   : > { %v6133_v47 = vpop.f32.mrf.mxu0 }
 0x1a0   : > { %v963_v21 = vmax.f32 %v958_v44, 0.0 }
 0x1a1   : > { %v960_v37 = vpop.f32.mrf.mxu0 }
 0x1a2   : > { %v964_v51 = vpack.c.bf16 %v963_v21, %v963_v21 }
 0x1a3   : > { %v6134_v16 = vpop.f32.mrf.mxu0 }
 0x1a4   : > { %6138 = vmatmul.mubr.msk.bf16.vlgmr.msra.gmra.mxu1 %vm967_vm4, %v964_v51 }
 0x1a5   : > { %6142 = vmatpush3.bf16.msra.mxu1 %v6472_v23  ;;  %6143 = vmatprep.mubr.msk.bf16.mxu1 %vm722_vm0, %v6841_v3  ;;  %v6179_v5 = vpop.f32.mrf.mxu0 }
 0x1a7   : > { %v1488_v24 = vpop.f32.mrf.mxu0 }
 0x1a9   : > { %v6180_v20 = vpop.f32.mrf.mxu0 }
 0x1ab   : > { %v1491_v6 = vpop.f32.mrf.mxu0 }
 0x1ac   : > { %6144 = vmatmul.mubr.msk.bf16.vlgmr.msra.gmra.mxu1 %vm722_vm0, %v6844_v4 }
 0x1ad   : > { %6147 = vmatprep.mubr.msk.bf16.mxu1 %vm722_vm0, %v6850_v8  ;;  %v6183_v34 = vpop.f32.mrf.mxu0 }
 0x1af   : > { %v1504_v23 = vpop.f32.mrf.mxu0 }
 0x1b1   : > { %v6184_v30 = vpop.f32.mrf.mxu0 }
 0x1b3   : > { %v1507_v40 = vpop.f32.mrf.mxu0 }
 0x1b4   : > { %6148 = vmatmul.mubr.msk.bf16.gmra.mxu1 %vm722_vm0, %v6864_v14 }
 0x1b5   : > { %6151 = vmatprep.mubr.msk.bf16.mxu1 %vm722_vm0, %v6871_v18  ;;  %v6187_v44 = vpop.f32.mrf.mxu0 }
 0x1b7   : > { %v1520_v47 = vpop.f32.mrf.mxu0 }
 0x1b9   : > { %v7288_v21 = vpop.f32.mrf.mxu0 }
 0x1bb   : > { %v7290_v37 = vpop.f32.mrf.mxu0 }
 0x1bc   : > { %6152 = vmatmul.mubr.msk.bf16.gmra.mxu1 %vm722_vm0, %v6883_v27 }
 0x1bd   : > { %6155 = vmatprep.mubr.msk.bf16.mxu1 %vm722_vm0, %v6897_v35  ;;  %v7292_v51 = vpop.f32.mrf.mxu0 }
 0x1bf   : > { %v7294_v16 = vpop.f32.mrf.mxu0 }
 0x1c1   : > { %v7298_v7 = vpop.f32.mrf.mxu0 }
 0x1c3   : > { %v7300_v15 = vpop.f32.mrf.mxu0 }
 0x1c4   : > { %6156 = vmatmul.mubr.msk.bf16.gmra.mxu1 %vm722_vm0, %v6908_v42 }
 0x1c5   : > { %6159 = vmatprep.mubr.msk.bf16.mxu1 %vm722_vm0, %v6919_v49  ;;  %v7304_v13 = vpop.f32.mrf.mxu0 }
 0x1cc   : > { %6160 = vmatmul.mubr.msk.bf16.gmra.mxu1 %vm722_vm0, %v6930_v56 }
 0x1cd   : > { %6163 = vmatprep.mubr.msk.bf16.mxu1 %vm722_vm0, %v6948_v63 }
 0x1d4   : > { %6164 = vmatmul.mubr.msk.bf16.gmra.mxu1 %vm722_vm0, %v6962_v19 }
 0x1d5   : > { %6167 = vmatprep.mubr.msk.bf16.mxu1 %vm722_vm0, %v6978_v36 }
 0x1dc   : > { %6168 = vmatmul.mubr.msk.bf16.gmra.mxu1 %vm722_vm0, %v6996_v55 }
 0x1dd   : > { %6171 = vmatprep.mubr.msk.bf16.mxu1 %vm722_vm0, %v7014_v31 }
 0x1e4   : > { %6172 = vmatmul.mubr.msk.bf16.gmra.mxu1 %vm722_vm0, %v7029_v60 }
 0x264   : > { %v7296_v10 = vpop.f32.mrf.mxu1 }
 0x266   : > { %v6139_v9 = vpop.f32.mrf.mxu1 }
 0x268   : > { %v1012_v45 = vpop.f32.mrf.mxu1 }
 0x269   : > { %v7308_v45 = vpop.f32.mrf.mxu0 }
 0x26a   : > { %v6140_v2 = vpop.f32.mrf.mxu1 }
 0x26c   : > { %v6145_v43 = vpop.f32.mrf.mxu1 }
 0x26d   : > { %v1497_v53 = vadd.f32 %v6179_v5, %v6145_v43 }
 0x26e   : > { %v1193_v41 = vpop.f32.mrf.mxu1 }
 0x26f   : > { %v1624_v38 = vadd.f32 %v7302_v28, %v1497_v53  ;;  %v1489_v62 = vadd.f32 %v1488_v24, %v1193_v41  ;;  %v7312_v24 = vpop.f32.mrf.mxu0 }
 0x270   : > { %v6146_v17 = vpop.f32.mrf.mxu1 }
 0x271   : > { %v5787_v25 = vmul.f32 -1.442695, %v1624_v38  ;;  %v1622_v9 = vadd.f32 %v7302_v28, %v1489_v62  ;;  %v1500_v22 = vadd.f32 %v6180_v20, %v6146_v17 }
 0x272   : > { %v1196_v59 = vpop.f32.mrf.mxu1 }
 0x273   : > { %6558 = vpow2.f32 %v5787_v25  ;;  %v5785_v2 = vmul.f32 -1.442695, %v1622_v9  ;;  %v1625_v39 = vadd.f32 %v7302_v28, %v1500_v22  ;;  %v1492_v31 = vadd.f32 %v1491_v6, %v1196_v59  ;;  %v7316_v6 = vpop.f32.mrf.mxu0 }
 0x274   : > { %v6149_v43 = vpop.f32.mrf.mxu1 }
 0x275   : > { %6560 = vpow2.f32 %v5785_v2  ;;  %v5788_v5 = vmul.f32 -1.442695, %v1625_v39  ;;  %v1623_v60 = vadd.f32 %v7302_v28, %v1492_v31  ;;  %v1513_v53 = vadd.f32 %v6183_v34, %v6149_v43 }
 0x276   : > { %v1209_v41 = vpop.f32.mrf.mxu1 }
 0x277   : > { %6562 = vpow2.f32 %v5788_v5  ;;  %v5786_v38 = vmul.f32 -1.442695, %v1623_v60  ;;  %v1628_v17 = vadd.f32 %v7302_v28, %v1513_v53  ;;  %v1505_v62 = vadd.f32 %v1504_v23, %v1209_v41  ;;  %v7320_v53 = vpop.f32.mrf.mxu0 }
 0x278   : > { %v6150_v20 = vpop.f32.mrf.mxu1 }
 0x279   : > { %v5791_v25 = vmul.f32 -1.442695, %v1628_v17  ;;  %v1516_v9 = vadd.f32 %v6184_v30, %v6150_v20  ;;  %6564 = vpow2.f32 %v5786_v38  ;;  %v1626_v22 = vadd.f32 %v7302_v28, %v1505_v62 }
 0x27a   : > { %v1212_v59 = vpop.f32.mrf.mxu1 }
 0x27b   : > { %6566 = vpow2.f32 %v5791_v25  ;;  %v1629_v39 = vadd.f32 %v7302_v28, %v1516_v9  ;;  %v1508_v31 = vadd.f32 %v1507_v40, %v1212_v59  ;;  %v5789_v34 = vmul.f32 -1.442695, %v1626_v22  ;;  %v7325_v59 = vpop.f32.mrf.mxu0 }
 0x27c   : > { %v6153_v2 = vpop.f32.mrf.mxu1 }
 0x27d   : > { %v5792_v43 = vmul.f32 -1.442695, %v1629_v39  ;;  %v1627_v60 = vadd.f32 %v7302_v28, %v1508_v31  ;;  %v1529_v5 = vadd.f32 %v6187_v44, %v6153_v2  ;;  %6568 = vpow2.f32 %v5789_v34 }
 0x27e   : > { %v1225_v23 = vpop.f32.mrf.mxu1 }
 0x27f   : > { %6570 = vpow2.f32 %v5792_v43  ;;  %v5790_v30 = vmul.f32 -1.442695, %v1627_v60  ;;  %v1632_v41 = vadd.f32 %v7302_v28, %v1529_v5  ;;  %v1521_v38 = vadd.f32 %v1520_v47, %v1225_v23 }
 0x280   : > { %v6559_v17 = vpop.eup %6558  ;;  %v6154_v62 = vpop.f32.mrf.mxu1 }
 0x281   : > { %v1752_v20 = vadd.f32 1.0, %v6559_v17  ;;  %6572 = vpow2.f32 %v5790_v30  ;;  %v5795_v40 = vmul.f32 -1.442695, %v1632_v41  ;;  %v1630_v25 = vadd.f32 %v7302_v28, %v1521_v38  ;;  %v7331_v41 = vpop.f32.mrf.mxu0 }
 0x282   : > { %v6561_v9 = vpop.eup %6560  ;;  %v1532_v22 = vadd.f32 %v7288_v21, %v6154_v62  ;;  %v1228_v44 = vpop.f32.mrf.mxu1 }
 0x283   : > { %6574 = vrcp.f32 %v1752_v20  ;;  %v1750_v39 = vadd.f32 1.0, %v6561_v9  ;;  %v5793_v31 = vmul.f32 -1.442695, %v1630_v25  ;;  %v1524_v34 = vadd.f32 %v7290_v37, %v1228_v44 }
 0x284   : > { %v6563_v2 = vpop.eup %6562  ;;  %6576 = vpow2.f32 %v5795_v40  ;;  %v1633_v47 = vadd.f32 %v7302_v28, %v1532_v22  ;;  %v6157_v43 = vpop.f32.mrf.mxu1 }
 0x285   : > { %6578 = vrcp.f32 %v1750_v39  ;;  %v1753_v60 = vadd.f32 1.0, %v6563_v2  ;;  %v1631_v5 = vadd.f32 %v7302_v28, %v1524_v34  ;;  %v1545_v23 = vadd.f32 %v7292_v51, %v6157_v43 }
 0x286   : > { %6580 = vpow2.f32 %v5793_v31  ;;  %v5796_v21 = vmul.f32 -1.442695, %v1633_v47  ;;  %v1241_v30 = vpop.f32.mrf.mxu1  ;;  %v6565_v38 = vpop.eup %6564 }
 0x287   : > { %6582 = vrcp.f32 %v1753_v60  ;;  %v5794_v17 = vmul.f32 -1.442695, %v1631_v5  ;;  %v1636_v37 = vadd.f32 %v7302_v28, %v1545_v23  ;;  %v1751_v20 = vadd.f32 1.0, %v6565_v38  ;;  %v7337_v31 = vpop.f32.mrf.mxu0 }
 0x288   : > { %v6567_v62 = vpop.eup %6566  ;;  %6584 = vpow2.f32 %v5796_v21  ;;  %v1537_v40 = vadd.f32 %v7294_v16, %v1241_v30  ;;  %v6158_v25 = vpop.f32.mrf.mxu1 }
 0x289   : > { %v1756_v9 = vadd.f32 1.0, %v6567_v62  ;;  %6586 = vpow2.f32 %v5794_v17  ;;  %v5799_v22 = vmul.f32 -1.442695, %v1636_v37  ;;  %v1548_v51 = vadd.f32 %v7298_v7, %v6158_v25  ;;  %v7343_v37 = vpop.f32.mrf.mxu0 }
 0x28a   : > { %6588 = vrcp.f32 %v1751_v20  ;;  %v1634_v44 = vadd.f32 %v7302_v28, %v1537_v40  ;;  %v1244_v39 = vpop.f32.mrf.mxu1  ;;  %v6569_v34 = vpop.eup %6568 }
 0x28b   : > { %6590 = vrcp.f32 %v1756_v9  ;;  %v1637_v2 = vadd.f32 %v7302_v28, %v1548_v51  ;;  %v1540_v47 = vadd.f32 %v7300_v15, %v1244_v39  ;;  %v1754_v16 = vadd.f32 1.0, %v6569_v34 }
 0x28c   : > { %v6571_v43 = vpop.eup %6570  ;;  %6592 = vpow2.f32 %v5799_v22  ;;  %v5797_v60 = vmul.f32 -1.442695, %v1634_v44  ;;  %v6161_v5 = vpop.f32.mrf.mxu1 }
 0x28d   : > { %v1757_v23 = vadd.f32 1.0, %v6571_v43  ;;  %v1635_v7 = vadd.f32 %v7302_v28, %v1540_v47  ;;  %v1561_v21 = vadd.f32 %v7304_v13, %v6161_v5  ;;  %6594 = vrcp.f32 %v1754_v16  ;;  %v7349_v47 = vpop.f32.mrf.mxu0 }
 0x28e   : > { %v6573_v30 = vpop.eup %6572  ;;  %v5800_v38 = vmul.f32 -1.442695, %v1637_v2  ;;  %v1257_v17 = vpop.f32.mrf.mxu1 }
 0x28f   : > { %6596 = vrcp.f32 %v1757_v23  ;;  %v1755_v62 = vadd.f32 1.0, %v6573_v30  ;;  %v5798_v20 = vmul.f32 -1.442695, %v1635_v7  ;;  %v1640_v15 = vadd.f32 %v7302_v28, %v1561_v21 }
 0x290   : > { %v6575_v40 = vpop.eup %6574  ;;  %6598 = vpow2.f32 %v5797_v60  ;;  %v1553_v25 = vadd.f32 %v7308_v45, %v1257_v17  ;;  %v6162_v9 = vpop.f32.mrf.mxu1 }
 0x291   : > { %v6577_v22 = vpop.eup %6576  ;;  %6600 = vrcp.f32 %v1755_v62  ;;  %v5803_v51 = vmul.f32 -1.442695, %v1640_v15  ;;  %v1564_v13 = vadd.f32 %v7312_v24, %v6162_v9  ;;  %1862 = vperm.xlu1 %6467, %v6575_v40   ;;  %v6204_v15 = vpop.f32.mrf.mxu0 }
 0x292   : > { %v6579_v44 = vpop.eup %6578  ;;  %v1760_v39 = vadd.f32 1.0, %v6577_v22  ;;  %6602 = vpow2.f32 %v5800_v38  ;;  %v1638_v34 = vadd.f32 %v7302_v28, %v1553_v25  ;;  %v1260_v2 = vpop.f32.mrf.mxu1 }
 0x293   : > { %v6581_v43 = vpop.eup %6580  ;;  %6604 = vpow2.f32 %v5798_v20  ;;  %v1641_v16 = vadd.f32 %v7302_v28, %v1564_v13  ;;  %v1556_v45 = vadd.f32 %v7316_v6, %v1260_v2  ;;  %1852 = vperm.xlu0 %6468, %v6579_v44  }
 0x294   : > { %v6583_v60 = vpop.eup %6582  ;;  %6606 = vrcp.f32 %v1760_v39  ;;  %v1758_v5 = vadd.f32 1.0, %v6581_v43  ;;  %v5801_v24 = vmul.f32 -1.442695, %v1638_v34  ;;  %v6165_v23 = vpop.f32.mrf.mxu1 }
 0x295   : > { %v6585_v7 = vpop.eup %6584  ;;  %6608 = vpow2.f32 %v5803_v51  ;;  %v1639_v21 = vadd.f32 %v7302_v28, %v1556_v45  ;;  %v1577_v30 = vadd.f32 %v7320_v53, %v6165_v23  ;;  %1867 = vperm.xlu1 %6467, %v6583_v60   ;;  %v5804_v62 = vmul.f32 -1.442695, %v1641_v16  ;;  %v1587_v16 = vpop.f32.mrf.mxu0 }
 0x296   : > { %v6587_v38 = vpop.eup %6586  ;;  %6610 = vrcp.f32 %v1758_v5  ;;  %v1761_v17 = vadd.f32 1.0, %v6585_v7  ;;  %v1273_v20 = vpop.f32.mrf.mxu1 }
 0x297   : > { %v6589_v6 = vpop.eup %6588  ;;  %v1759_v40 = vadd.f32 1.0, %v6587_v38  ;;  %6612 = vpow2.f32 %v5801_v24  ;;  %v5802_v25 = vmul.f32 -1.442695, %v1639_v21  ;;  %v1644_v9 = vadd.f32 %v7302_v28, %v1577_v30 }
 0x298   : > { %v6591_v22 = vpop.eup %6590  ;;  %6614 = vrcp.f32 %v1761_v17  ;;  %v1569_v51 = vadd.f32 %v7325_v59, %v1273_v20  ;;  %v6166_v13 = vpop.f32.mrf.mxu1 }
 0x299   : > { %v6593_v44 = vpop.eup %6592  ;;  %6616 = vrcp.f32 %v1759_v40  ;;  %v5807_v53 = vmul.f32 -1.442695, %v1644_v9  ;;  %v1580_v39 = vadd.f32 %v7331_v41, %v6166_v13  ;;  %1857 = vperm.xlu1 %6467, %v6589_v6   ;;  %1882 = vperm.xlu0 %6468, %v6591_v22   ;;  %v6207_v20 = vpop.f32.mrf.mxu0 }
 0x29a   : > { %v1764_v34 = vadd.f32 1.0, %v6593_v44  ;;  %6618 = vpow2.f32 %v5804_v62  ;;  %v1642_v2 = vadd.f32 %v7302_v28, %v1569_v51  ;;  %v1276_v43 = vpop.f32.mrf.mxu1  ;;  %v6595_v45 = vpop.eup %6594 }
 0x29b   : > { %6620 = vpow2.f32 %v5802_v25  ;;  %v1645_v60 = vadd.f32 %v7302_v28, %v1580_v39  ;;  %v1572_v59 = vadd.f32 %v7337_v31, %v1276_v43  ;;  %v1600_v43 = vpop.f32.mrf.mxu0 }
 0x29c   : > { %v6597_v5 = vpop.eup %6596  ;;  %6622 = vrcp.f32 %v1764_v34  ;;  %v5805_v24 = vmul.f32 -1.442695, %v1642_v2  ;;  %v6169_v23 = vpop.f32.mrf.mxu1 }
 0x29d   : > { %v6599_v7 = vpop.eup %6598  ;;  %6624 = vpow2.f32 %v5807_v53  ;;  %v5808_v41 = vmul.f32 -1.442695, %v1645_v60  ;;  %v1643_v21 = vadd.f32 %v7302_v28, %v1572_v59  ;;  %v1593_v30 = vadd.f32 %v7343_v37, %v6169_v23  ;;  %1887 = vperm.xlu1 %6467, %v6597_v5   ;;  %1872 = vperm.xlu0 %6468, %v6595_v45  }
 0x29e   : > { %v6601_v38 = vpop.eup %6600  ;;  %v1762_v17 = vadd.f32 1.0, %v6599_v7  ;;  %6626 = vpow2.f32 %v5805_v24  ;;  %v1289_v62 = vpop.f32.mrf.mxu1 }
 0x29f   : > { %v6603_v6 = vpop.eup %6602  ;;  %6628 = vpow2.f32 %v5808_v41  ;;  %v5806_v31 = vmul.f32 -1.442695, %v1643_v21  ;;  %v1648_v40 = vadd.f32 %v7302_v28, %v1593_v30  ;;  %v1585_v25 = vadd.f32 %v7349_v47, %v1289_v62  ;;  %v6208_v62 = vpop.f32.mrf.mxu0 }
 0x2a0   : > { %v6605_v9 = vpop.eup %6604  ;;  %6630 = vrcp.f32 %v1762_v17  ;;  %v1765_v22 = vadd.f32 1.0, %v6603_v6  ;;  %v6170_v51 = vpop.f32.mrf.mxu1 }
 0x2a1   : > { %v6607_v13 = vpop.eup %6606  ;;  %v1763_v37 = vadd.f32 1.0, %v6605_v9  ;;  %6632 = vpow2.f32 %v5806_v31  ;;  %v5811_v44 = vmul.f32 -1.442695, %v1648_v40  ;;  %v1646_v53 = vadd.f32 %v7302_v28, %v1585_v25  ;;  %1877 = vperm.xlu1 %6467, %v6601_v38  }
 0x2a2   : > { %v6609_v39 = vpop.eup %6608  ;;  %6634 = vrcp.f32 %v1765_v22  ;;  %v1596_v34 = vadd.f32 %v6204_v15, %v6170_v51  ;;  %1902 = vperm.xlu0 %6468, %v6607_v13   ;;  %v1292_v2 = vpop.f32.mrf.mxu1 }
 0x2a3   : > { %v6611_v45 = vpop.eup %6610  ;;  %6636 = vrcp.f32 %v1763_v37  ;;  %v1768_v47 = vadd.f32 1.0, %v6609_v39  ;;  %v5809_v60 = vmul.f32 -1.442695, %v1646_v53  ;;  %v1588_v59 = vadd.f32 %v1587_v16, %v1292_v2  ;;  %v1603_v51 = vpop.f32.mrf.mxu0 }
 0x2a4   : > { %v6613_v5 = vpop.eup %6612  ;;  %6638 = vpow2.f32 %v5811_v44  ;;  %v1649_v24 = vadd.f32 %v7302_v28, %v1596_v34  ;;  %v6173_v23 = vpop.f32.mrf.mxu1 }
 0x2a5   : > { %v6615_v7 = vpop.eup %6614  ;;  %6640 = vrcp.f32 %v1768_v47  ;;  %v1766_v41 = vadd.f32 1.0, %v6613_v5  ;;  %v1647_v21 = vadd.f32 %v7302_v28, %v1588_v59  ;;  %v1609_v30 = vadd.f32 %v6207_v20, %v6173_v23 }
 0x2a6   : > { %v6617_v15 = vpop.eup %6616  ;;  %6642 = vpow2.f32 %v5809_v60  ;;  %v5812_v38 = vmul.f32 -1.442695, %v1649_v24  ;;  %1907 = vperm.xlu1 %6467, %v6615_v7   ;;  %1892 = vperm.xlu0 %6468, %v6611_v45   ;;  %v1305_v17 = vpop.f32.mrf.mxu1 }
 0x2a7   : > { %v6619_v6 = vpop.eup %6618  ;;  %6644 = vrcp.f32 %v1766_v41  ;;  %v5810_v16 = vmul.f32 -1.442695, %v1647_v21  ;;  %v1652_v31 = vadd.f32 %v7302_v28, %v1609_v30  ;;  %v1601_v40 = vadd.f32 %v1600_v43, %v1305_v17 }
 0x2a8   : > { %v6621_v25 = vpop.eup %6620  ;;  %v1769_v9 = vadd.f32 1.0, %v6619_v6  ;;  %6646 = vpow2.f32 %v5812_v38  ;;  %v6174_v22 = vpop.f32.mrf.mxu1 }
 0x2a9   : > { %v6623_v13 = vpop.eup %6622  ;;  %v1767_v20 = vadd.f32 1.0, %v6621_v25  ;;  %6648 = vpow2.f32 %v5810_v16  ;;  %v5815_v37 = vmul.f32 -1.442695, %v1652_v31  ;;  %v1650_v44 = vadd.f32 %v7302_v28, %v1601_v40 }
 0x2aa   : > { %v6625_v53 = vpop.eup %6624  ;;  %6650 = vrcp.f32 %v1769_v9  ;;  %v1612_v39 = vadd.f32 %v6208_v62, %v6174_v22  ;;  %1897 = vperm.xlu1 %6467, %v6617_v15   ;;  %1922 = vperm.xlu0 %6468, %v6623_v13   ;;  %v1308_v34 = vpop.f32.mrf.mxu1 }
 0x2ab   : > { %v6627_v2 = vpop.eup %6626  ;;  %6652 = vrcp.f32 %v1767_v20  ;;  %v1772_v43 = vadd.f32 1.0, %v6625_v53  ;;  %v1604_v45 = vadd.f32 %v1603_v51, %v1308_v34  ;;  %v5813_v59 = vmul.f32 -1.442695, %v1650_v44 }
 0x2ac   : > { %v6629_v47 = vpop.eup %6628  ;;  %v1770_v60 = vadd.f32 1.0, %v6627_v2  ;;  %6654 = vpow2.f32 %v5815_v37  ;;  %v1653_v5 = vadd.f32 %v7302_v28, %v1612_v39 }
 0x2ad   : > { %v6631_v24 = vpop.eup %6630  ;;  %6656 = vrcp.f32 %v1772_v43  ;;  %v1773_v23 = vadd.f32 1.0, %v6629_v47  ;;  %v1651_v7 = vadd.f32 %v7302_v28, %v1604_v45 }
 0x2ae   : > { %v6633_v41 = vpop.eup %6632  ;;  %6658 = vrcp.f32 %v1770_v60  ;;  %v5816_v21 = vmul.f32 -1.442695, %v1653_v5  ;;  %1912 = vperm.xlu0 %6468, %v6631_v24  }
 0x2af   : > { %v6635_v30 = vpop.eup %6634  ;;  %6660 = vrcp.f32 %v1773_v23  ;;  %v1771_v15 = vadd.f32 1.0, %v6633_v41  ;;  %v5814_v38 = vmul.f32 -1.442695, %v1651_v7 }
 0x2b0   : > { %v6637_v17 = vpop.eup %6636  ;;  %6662 = vpow2.f32 %v5813_v59  ;;  %1927 = vperm.xlu1 %6467, %v6635_v30  }
 0x2b1   : > { %v6639_v62 = vpop.eup %6638  ;;  %6664 = vrcp.f32 %v1771_v15 }
 0x2b2   : > { %v6641_v6 = vpop.eup %6640  ;;  %v1776_v16 = vadd.f32 1.0, %v6639_v62  ;;  %6666 = vpow2.f32 %v5816_v21 }
 0x2b3   : > { %v6643_v31 = vpop.eup %6642  ;;  %6668 = vpow2.f32 %v5814_v38  ;;  %1942 = vperm.xlu0 %6468, %v6641_v6  }
 0x2b4   : > { %v6645_v28 = vpop.eup %6644  ;;  %6670 = vrcp.f32 %v1776_v16  ;;  %v1774_v40 = vadd.f32 1.0, %v6643_v31  ;;  %1917 = vperm.xlu1 %6467, %v6637_v17   ;;  %v966_v17 = vld [vmem:[%s10227_s5] sm:$0x1] }
 0x2b5   : > { %v6647_v25 = vpop.eup %6646  ;;  %v1010_v62 = vadd.f32 %v7296_v10, %v966_v17 }
 0x2b6   : > { %v6649_v9 = vpop.eup %6648  ;;  %v1777_v22 = vadd.f32 1.0, %v6647_v25  ;;  %6672 = vrcp.f32 %v1774_v40 }
 0x2b7   : > { %v6651_v51 = vpop.eup %6650  ;;  %v1775_v13 = vadd.f32 1.0, %v6649_v9  ;;  %1932 = vperm.xlu0 %6468, %v6645_v28   ;;  %v5717_v6 = vmul.f32 -1.442695, %v1010_v62  ;;  %v1846_v28 = vlaneseq }
 0x2b8   : > { %v6653_v20 = vpop.eup %6652  ;;  %6674 = vrcp.f32 %v1777_v22  ;;  %1947 = vperm.xlu1 %6467, %v6651_v51  }
 0x2b9   : > { %v6655_v37 = vpop.eup %6654  ;;  %6676 = vrcp.f32 %v1775_v13  ;;  %v1847_v40 = vshrl.u32 %v1846_v28, 7 }
 0x2ba   : > { %v6657_v44 = vpop.eup %6656  ;;  %v1780_v53 = vadd.f32 1.0, %v6655_v37 }
 0x2bb   : > { %v6659_v39 = vpop.eup %6658  ;;  %1962 = vperm.xlu0 %6468, %v6657_v44   ;;  %v1848_v25 = vsub.s32 0, %v1847_v40 }
 0x2bc   : > { %v6661_v34 = vpop.eup %6660  ;;  %6678 = vrcp.f32 %v1780_v53  ;;  %1937 = vperm.xlu1 %6467, %v6653_v20   ;;  %v10396_v53 = vunpack.c.l.bf16 %v6971_v29 }
 0x2bd   : > { %v6663_v2 = vpop.eup %6662 }
 0x2be   : > { %v6665_v43 = vpop.eup %6664  ;;  %v1778_v45 = vadd.f32 1.0, %v6663_v2 }
 0x2bf   : > { %v6667_v47 = vpop.eup %6666  ;;  %1952 = vperm.xlu0 %6468, %v6659_v39  }
 0x2c0   : > { %v6669_v60 = vpop.eup %6668  ;;  %6680 = vrcp.f32 %v1778_v45  ;;  %v1781_v59 = vadd.f32 1.0, %v6667_v47  ;;  %1967 = vperm.xlu1 %6467, %v6661_v34   ;;  %v10397_v34 = vunpack.c.h.bf16 %v6971_v29 }
 0x2c1   : > { %v6671_v5 = vpop.eup %6670  ;;  %v1779_v24 = vadd.f32 1.0, %v6669_v60 }
 0x2c2   : > { %6682 = vrcp.f32 %v1781_v59 }
 0x2c3   : > { %1982 = vperm.xlu0 %6468, %v6671_v5   ;;  %v6673_v23 = vpop.eup %6672  ;;  %6684 = vrcp.f32 %v1779_v24  ;;  %v10398_v5 = vunpack.c.l.bf16 %v6955_v12 }
 0x2c4   : > { %1957 = vperm.xlu1 %6467, %v6665_v43   ;;  %6686 = vpow2.f32 %v5717_v6  ;;  %v10400_v6 = vunpack.c.l.bf16 %v7040_v33 }
 0x2c5   : > { %v6675_v7 = vpop.eup %6674 }
 0x2c6   : > { %v6677_v41 = vpop.eup %6676 }
 0x2c7   : > { %1972 = vperm.xlu0 %6468, %v6673_v23   ;;  %v10399_v23 = vunpack.c.h.bf16 %v6955_v12  ;;  %v10401_v12 = vunpack.c.h.bf16 %v7040_v33  ;;  %v10402_v33 = vunpack.c.l.bf16 %v7007_v11 }
 0x2c8   : > { %1987 = vperm.xlu1 %6467, %v6675_v7  }
 0x2c9   : > { %v6679_v21 = vpop.eup %6678 }
 0x2cb   : > { %2002 = vperm.xlu0 %6468, %v6679_v21  }
 0x2cc   : > { %1977 = vperm.xlu1 %6467, %v6677_v41  }
 0x2cd   : > { %v6681_v30 = vpop.eup %6680 }
 0x2cf   : > { %v6683_v15 = vpop.eup %6682  ;;  %1992 = vperm.xlu0 %6468, %v6681_v30  }
 0x2d0   : > { %2007 = vperm.xlu1 %6467, %v6683_v15   ;;  %v6685_v38 = vpop.eup %6684 }
 0x2d1   : > { %v6687_v16 = vpop.eup %6686 }
 0x2d2   : > { %v1018_v31 = vadd.f32 1.0, %v6687_v16 }
 0x2d4   : > { %1997 = vperm.xlu1 %6467, %v6685_v38   ;;  %6688 = vrcp.f32 %v1018_v31 }
 0x2e1   : > { %v6689_v9 = vpop.eup %6688 }
 0x2e2   : > { %v7376_v22 = vrot.slane %v6689_v9, %v1848_v25 }
 0x30c   : > { %v1863_v51 = vpop.permute.xlu1 %1862 }
 0x30d   : > { %v2012_v13 = vadd.f32 %v1863_v51, %v7376_v22 }
 0x30e   : > { %v1853_v20 = vpop.permute.xlu0 %1852 }
 0x30f   : > { %2126 = vrot.lane.b32.xlu0 %v2012_v13, %s6704_s30  ;;  %v2010_v10 = vadd.f32 %v1853_v20, %v7376_v22  ;;  %v2044_v39 = vmul.f32 %v2012_v13, %v10396_v53 }
 0x310   : > { %v1868_v37 = vpop.permute.xlu1 %1867 }
 0x311   : > { %v2013_v44 = vadd.f32 %v1868_v37, %v7376_v22  ;;  %v2042_v24 = vmul.f32 %v2010_v10, %v10398_v5 }
 0x313   : > { %v2045_v2 = vmul.f32 %v2013_v44, %v10397_v34  ;;  %2128 = vrot.lane.b32.xlu1 %v2013_v44, %s6704_s30  ;;  %2122 = vrot.lane.b32.xlu0 %v2010_v10, %s6704_s30 }
 0x314   : > { %v1858_v43 = vpop.permute.xlu1 %1857  ;;  %v1883_v45 = vpop.permute.xlu0 %1882 }
 0x315   : > { %v2011_v47 = vadd.f32 %v1858_v43, %v7376_v22  ;;  %v2016_v60 = vadd.f32 %v1883_v45, %v7376_v22  ;;  %v2075_v59 = vpack.c.bf16 %v2045_v2, %v2044_v39  ;;  %v10403_v39 = vunpack.c.h.bf16 %v7007_v11 }
 0x317   : > { %v2043_v7 = vmul.f32 %v2011_v47, %v10399_v23  ;;  %2124 = vrot.lane.b32.xlu1 %v2011_v47, %s6704_s30  ;;  %2134 = vrot.lane.b32.xlu0 %v2016_v60, %s6704_s30  ;;  %v2274_v29 = vshrl.u32 %v2075_v59, 16  ;;  %v2277_v62 = vshll.u32 %v2075_v59, 16  ;;  %v2048_v16 = vmul.f32 %v2016_v60, %v10400_v6 }
 0x318   : > { %v1888_v41 = vpop.permute.xlu1 %1887  ;;  %v1873_v21 = vpop.permute.xlu0 %1872 }
 0x319   : > { %v2017_v30 = vadd.f32 %v1888_v41, %v7376_v22  ;;  %v2014_v15 = vadd.f32 %v1873_v21, %v7376_v22  ;;  %v2074_v38 = vpack.c.bf16 %v2043_v7, %v2042_v24  ;;  %v2276_v17 = vrot.slane %v2274_v29, 7 }
 0x31a   : > { %v2559_v10 = vrot.slane %v2277_v62, 1  ;;  %v10404_v41 = vmov 0 }
 0x31b   : > { %v2049_v31 = vmul.f32 %v2017_v30, %v10401_v12  ;;  %2754 = vrot.lane.b32.xlu1 %v2075_v59, %s6705_s1  ;;  %2130 = vrot.lane.b32.xlu0 %v2014_v15, %s6704_s30  ;;  %v2267_v28 = vshrl.u32 %v2074_v38, 16  ;;  %v2270_v40 = vshll.u32 %v2074_v38, 16  ;;  %v7404_v9 = vor.u32 %v2277_v62, %v2276_v17 }
 0x31c   : > { %v1878_v25 = vpop.permute.xlu1 %1877  ;;  %v2046_v53 = vmul.f32 %v2014_v15, %v10402_v33  ;;  %v2560_v23 = vor.u32 %v2559_v10, %v2274_v29  ;;  %v10405_v41 = vsel %vm7423_vm7, 4294967295, %v10404_v41  ;;  %v10407_v15 = vunpack.c.l.bf16 %v7079_v52 }
 0x31d   : > { %v2015_v51 = vadd.f32 %v1878_v25, %v7376_v22  ;;  %v1903_v13 = vpop.permute.xlu0 %1902  ;;  %v2269_v20 = vrot.slane %v2267_v28, 7  ;;  %v7407_v37 = vpack.c.bf16 %v2049_v31, %v2048_v16  ;;  %v2557_v44 = vrot.slane %v2270_v40, 1  ;;  %10406 = vst [vmem:[#allocation5_spill] sm:$0xff] %v10405_v41 }
 0x31e   : > { %v2020_v43 = vadd.f32 %v1903_v13, %v7376_v22  ;;  %v10408_v17 = vunpack.c.h.bf16 %v7079_v52  ;;  %v10409_v13 = vunpack.c.l.bf16 %v7065_v32  ;;  %v10410_v10 = vunpack.c.h.bf16 %v7065_v32 }
 0x31f   : > { %v2047_v34 = vmul.f32 %v2015_v51, %v10403_v39  ;;  %2136 = vrot.lane.b32.xlu1 %v2017_v30, %s6704_s30  ;;  %2752 = vrot.lane.b32.xlu0 %v2074_v38, %s6705_s1  ;;  %v2288_v2 = vshrl.u32 %v7407_v37, 16  ;;  %v7417_v45 = vor.u32 %v2270_v40, %v2269_v20  ;;  %v2291_v5 = vshll.u32 %v7407_v37, 16 }
 0x320   : > { %v2558_v7 = vor.u32 %v2557_v44, %v2267_v28  ;;  %v2052_v38 = vmul.f32 %v2020_v43, %v10407_v15  ;;  %v2609_v40 = vsel %vm7423_vm7, %v2560_v23, 0  ;;  %v10411_v23 = vunpack.c.l.bf16 %v7104_v48 }
 0x321   : > { %v1908_v47 = vpop.permute.xlu1 %1907  ;;  %v1893_v60 = vpop.permute.xlu0 %1892  ;;  %v2076_v59 = vpack.c.bf16 %v2047_v34, %v2046_v53  ;;  %v2290_v24 = vrot.slane %v2288_v2, 7  ;;  %v2563_v15 = vrot.slane %v2291_v5, 1 }
 0x322   : > { %v2021_v11 = vadd.f32 %v1908_v47, %v7376_v22  ;;  %v2018_v29 = vadd.f32 %v1893_v60, %v7376_v22  ;;  %v2608_v25 = vsel %vm7423_vm7, %v2558_v7, 0 }
 0x323   : > { %2132 = vrot.lane.b32.xlu1 %v2015_v51, %s6704_s30  ;;  %2142 = vrot.lane.b32.xlu0 %v2020_v43, %s6704_s30  ;;  %v2281_v21 = vshrl.u32 %v2076_v59, 16  ;;  %v7427_v30 = vor.u32 %v2291_v5, %v2290_v24  ;;  %v2284_v31 = vshll.u32 %v2076_v59, 16 }
 0x324   : > { %v2053_v62 = vmul.f32 %v2021_v11, %v10408_v17  ;;  %v2050_v20 = vmul.f32 %v2018_v29, %v10409_v13  ;;  %v10413_v13 = vunpack.c.l.bf16 %v7092_v1 }
 0x325   : > { %v1898_v6 = vpop.permute.xlu1 %1897  ;;  %v1923_v16 = vpop.permute.xlu0 %1922  ;;  %v2283_v12 = vrot.slane %v2281_v21, 7 }
 0x326   : > { %v2019_v28 = vadd.f32 %v1898_v6, %v7376_v22  ;;  %v7439_v51 = vpack.c.bf16 %v2053_v62, %v2052_v38  ;;  %v2024_v53 = vadd.f32 %v1923_v16, %v7376_v22  ;;  %v2561_v38 = vrot.slane %v2284_v31, 1 }
 0x327   : > { %2850 = vrot.lane.b32.xlu1 %v2609_v40, %s6706_s2  ;;  %2848 = vrot.lane.b32.xlu0 %v2608_v25, %s6706_s2  ;;  %v7443_v52 = vor.u32 %v2284_v31, %v2283_v12  ;;  %v10412_v62 = vunpack.c.h.bf16 %v7104_v48  ;;  %v2564_v25 = vor.u32 %v2563_v15, %v2288_v2  ;;  %v10415_v15 = vunpack.c.h.bf16 %v7126_v46 }
 0x328   : > { %v2051_v44 = vmul.f32 %v2019_v28, %v10410_v10  ;;  %v2302_v33 = vshrl.u32 %v7439_v51, 16  ;;  %v2305_v60 = vshll.u32 %v7439_v51, 16  ;;  %v2056_v7 = vmul.f32 %v2024_v53, %v10411_v23 }
 0x329   : > { %v1913_v39 = vpop.permute.xlu0 %1912  ;;  %v10414_v10 = vunpack.c.h.bf16 %v7092_v1 }
 0x32a   : > { %v7451_v34 = vpack.c.bf16 %v2051_v44, %v2050_v20  ;;  %v2304_v43 = vrot.slane %v2302_v33, 7 }
 0x32b   : > { %v1928_v47 = vpop.permute.xlu1 %1927  ;;  %2758 = vrot.lane.b32.xlu1 %v7407_v37, %s6705_s1  ;;  %2138 = vrot.lane.b32.xlu0 %v2018_v29, %s6704_s30  ;;  %v2022_v29 = vadd.f32 %v1913_v39, %v7376_v22 }
 0x32c   : > { %v7460_v32 = vadd.f32 %v1928_v47, %v7376_v22  ;;  %v2295_v24 = vshrl.u32 %v7451_v34, 16  ;;  %v7465_v17 = vor.u32 %v2305_v60, %v2304_v43  ;;  %v2298_v12 = vshll.u32 %v7451_v34, 16 }
 0x32d   : > { %v2054_v20 = vmul.f32 %v2022_v29, %v10413_v13  ;;  %v2562_v43 = vor.u32 %v2561_v38, %v2281_v21  ;;  %v2611_v21 = vsel %vm7423_vm7, %v2564_v25, 0 }
 0x32e   : > { %v2057_v37 = vmul.f32 %v7460_v32, %v10412_v62  ;;  %v1943_v6 = vpop.permute.xlu0 %1942  ;;  %v2297_v16 = vrot.slane %v2295_v24, 7 }
 0x32f   : > { %v1918_v40 = vpop.permute.xlu1 %1917  ;;  %2144 = vrot.lane.b32.xlu1 %v2021_v11, %s6704_s30  ;;  %2756 = vrot.lane.b32.xlu0 %v2076_v59, %s6705_s1  ;;  %v2028_v59 = vadd.f32 %v1943_v6, %v7376_v22  ;;  %v2610_v62 = vsel %vm7423_vm7, %v2562_v43, 0  ;;  %v10416_v6 = vunpack.c.l.bf16 %v7126_v46  ;;  %v10417_v46 = vunpack.c.l.bf16 %v7115_v50 }
 0x330   : > { %v7477_v5 = vadd.f32 %v1918_v40, %v7376_v22  ;;  %v7479_v31 = vpack.c.bf16 %v2057_v37, %v2056_v7  ;;  %v7481_v48 = vor.u32 %v2298_v12, %v2297_v16  ;;  %v10418_v43 = vunpack.c.h.bf16 %v7115_v50 }
 0x331   : > { %v2060_v16 = vmul.f32 %v2028_v59, %v10416_v6 }
 0x332   : > { %v2055_v44 = vmul.f32 %v7477_v5, %v10414_v10  ;;  %v1933_v39 = vpop.permute.xlu0 %1932  ;;  %v10315_v11 = vshrl.u32 %v7479_v31, 16  ;;  %v2319_v7 = vshll.u32 %v7479_v31, 16 }
 0x333   : > { %v1948_v47 = vpop.permute.xlu1 %1947  ;;  %2140 = vrot.lane.b32.xlu1 %v2019_v28, %s6704_s30  ;;  %2150 = vrot.lane.b32.xlu0 %v2024_v53, %s6704_s30  ;;  %v7506_v28 = vadd.f32 %v1933_v39, %v7376_v22 }
 0x334   : > { %v7493_v2 = vadd.f32 %v1948_v47, %v7376_v22  ;;  %v7495_v23 = vpack.c.bf16 %v2055_v44, %v2054_v20  ;;  %v2318_v1 = vrot.slane %v10315_v11, 7 }
 0x335   : > { %v2058_v39 = vmul.f32 %v7506_v28, %v10417_v46  ;;  %v10419_v46 = vunpack.c.l.bf16 %v7148_v0 }
 0x336   : > { %v2061_v38 = vmul.f32 %v7493_v2, %v10415_v15  ;;  %v1963_v53 = vpop.permute.xlu0 %1962  ;;  %v10313_v37 = vshrl.u32 %v7495_v23, 16  ;;  %v7517_v25 = vor.u32 %v2319_v7, %v2318_v1  ;;  %v10317_v10 = vshll.u32 %v7495_v23, 16 }
 0x337   : > { %v1938_v40 = vpop.permute.xlu1 %1937  ;;  %2854 = vrot.lane.b32.xlu1 %v2611_v21, %s6706_s2  ;;  %2852 = vrot.lane.b32.xlu0 %v2610_v62, %s6706_s2  ;;  %v7534_v1 = vadd.f32 %v1963_v53, %v7376_v22  ;;  %v2567_v53 = vrot.slane %v2305_v60, 1 }
 0x338   : > { %v7520_v13 = vadd.f32 %v1938_v40, %v7376_v22  ;;  %v2311_v20 = vrot.slane %v10313_v37, 7  ;;  %v7525_v44 = vpack.c.bf16 %v2061_v38, %v2060_v16  ;;  %v2565_v16 = vrot.slane %v2298_v12, 1 }
 0x33a   : > { %v2059_v47 = vmul.f32 %v7520_v13, %v10418_v43  ;;  %v1953_v21 = vpop.permute.xlu0 %1952  ;;  %v7538_v15 = vor.u32 %v10317_v10, %v2311_v20  ;;  %v10314_v38 = vshrl.u32 %v7525_v44, 16  ;;  %v10316_v40 = vshll.u32 %v7525_v44, 16 }
 0x33b   : > { %v1968_v62 = vpop.permute.xlu1 %1967  ;;  %2762 = vrot.lane.b32.xlu1 %v7439_v51, %s6705_s1  ;;  %2146 = vrot.lane.b32.xlu0 %v2022_v29, %s6704_s30  ;;  %v2064_v43 = vmul.f32 %v7534_v1, %v10419_v46  ;;  %v10420_v29 = vunpack.c.h.bf16 %v7148_v0  ;;  %v2566_v10 = vor.u32 %v2565_v16, %v2295_v24 }
 0x33c   : > { %v7545_v50 = vadd.f32 %v1968_v62, %v7376_v22  ;;  %v7547_v6 = vpack.c.bf16 %v2059_v47, %v2058_v39  ;;  %v2332_v20 = vrot.slane %v10314_v38, 7  ;;  %v7559_v62 = vadd.f32 %v1953_v21, %v7376_v22 }
 0x33d   : > { %v10421_v38 = vunpack.c.l.bf16 %v7137_v57 }
 0x33e   : > { %v2065_v37 = vmul.f32 %v7545_v50, %v10420_v29  ;;  %v1983_v39 = vpop.permute.xlu0 %1982  ;;  %v10322_v60 = vshrl.u32 %v7547_v6, 16  ;;  %v7568_v47 = vor.u32 %v10316_v40, %v2332_v20  ;;  %v2568_v29 = vor.u32 %v2567_v53, %v2302_v33 }
 0x33f   : > { %v1958_v12 = vpop.permute.xlu1 %1957  ;;  %2152 = vrot.lane.b32.xlu1 %v7460_v32, %s6704_s30  ;;  %2760 = vrot.lane.b32.xlu0 %v7451_v34, %s6705_s1  ;;  %v10323_v32 = vshll.u32 %v7547_v6, 16  ;;  %v2062_v11 = vmul.f32 %v7559_v62, %v10421_v38  ;;  %v10422_v20 = vunpack.c.h.bf16 %v7137_v57 }
 0x340   : > { %v7571_v0 = vadd.f32 %v1958_v12, %v7376_v22  ;;  %v2325_v21 = vrot.slane %v10322_v60, 7  ;;  %v7575_v46 = vpack.c.bf16 %v2065_v37, %v2064_v43  ;;  %v7590_v43 = vadd.f32 %v1983_v39, %v7376_v22 }
 0x341   : > { %v2613_v24 = vsel %vm7423_vm7, %v2568_v29, 0 }
 0x342   : > { %v2063_v40 = vmul.f32 %v7571_v0, %v10422_v20  ;;  %v1973_v12 = vpop.permute.xlu0 %1972  ;;  %v10318_v37 = vshrl.u32 %v7575_v46, 16  ;;  %v7597_v57 = vor.u32 %v10323_v32, %v2325_v21  ;;  %v10320_v38 = vshll.u32 %v7575_v46, 16 }
 0x343   : > { %v1988_v51 = vpop.permute.xlu1 %1987  ;;  %2148 = vrot.lane.b32.xlu1 %v7477_v5, %s6704_s30  ;;  %2158 = vrot.lane.b32.xlu0 %v2028_v59, %s6704_s30  ;;  %v10423_v5 = vunpack.c.h.bf16 %v7170_v58  ;;  %v7613_v16 = vadd.f32 %v1973_v12, %v7376_v22  ;;  %v10424_v21 = vunpack.c.l.bf16 %v7170_v58 }
 0x344   : > { %v7600_v33 = vadd.f32 %v1988_v51, %v7376_v22  ;;  %v7602_v34 = vpack.c.bf16 %v2063_v40, %v2062_v11  ;;  %v2346_v53 = vrot.slane %v10318_v37, 7  ;;  %v2612_v11 = vsel %vm7423_vm7, %v2566_v10, 0 }
 0x345   : > { %v2068_v29 = vmul.f32 %v7590_v43, %v10424_v21  ;;  %v10426_v21 = vunpack.c.l.bf16 %v7159_v26 }
 0x346   : > { %v2069_v59 = vmul.f32 %v7600_v33, %v10423_v5  ;;  %v2003_v39 = vpop.permute.xlu0 %2002  ;;  %v10319_v40 = vshrl.u32 %v7602_v34, 16  ;;  %v7625_v51 = vor.u32 %v10320_v38, %v2346_v53  ;;  %v10321_v5 = vshll.u32 %v7602_v34, 16 }
 0x347   : > { %v1978_v20 = vpop.permute.xlu1 %1977  ;;  %2858 = vrot.lane.b32.xlu1 %v2613_v24, %s6706_s2  ;;  %2856 = vrot.lane.b32.xlu0 %v2612_v11, %s6706_s2  ;;  %v2066_v24 = vmul.f32 %v7613_v16, %v10426_v21  ;;  %v10427_v11 = vunpack.c.h.bf16 %v7159_v26  ;;  %v7642_v53 = vadd.f32 %v2003_v39, %v7376_v22  ;;  %v2571_v39 = vrot.slane %v2319_v7, 1 }
 0x348   : > { %10425 = vst [vmem:[#allocation6_spill] sm:$0xff] %v7625_v51  ;;  %v7628_v12 = vadd.f32 %v1978_v20, %v7376_v22  ;;  %v2339_v10 = vrot.slane %v10319_v40, 7  ;;  %v7633_v58 = vpack.c.bf16 %v2069_v59, %v2068_v29 }
 0x34a   : > { %v2067_v37 = vmul.f32 %v7628_v12, %v10427_v11  ;;  %v7646_v20 = vor.u32 %v10321_v5, %v2339_v10  ;;  %v1993_v38 = vpop.permute.xlu0 %1992  ;;  %v10324_v59 = vshrl.u32 %v7633_v58, 16  ;;  %v10429_v10 = vshll.u32 %v7495_v23, 16 }
 0x34b   : > { %v2008_v40 = vpop.permute.xlu1 %2007  ;;  %2766 = vrot.lane.b32.xlu1 %v7479_v31, %s6705_s1  ;;  %2154 = vrot.lane.b32.xlu0 %v7506_v28, %s6704_s30  ;;  %v10325_v11 = vshll.u32 %v7633_v58, 16  ;;  %v10430_v28 = vunpack.c.l.bf16 %v7192_v61 }
 0x34c   : > { %10428 = vst [vmem:[#allocation7_spill] sm:$0xff] %v7646_v20  ;;  %v7654_v26 = vadd.f32 %v2008_v40, %v7376_v22  ;;  %v7656_v29 = vpack.c.bf16 %v2067_v37, %v2066_v24  ;;  %v2569_v21 = vrot.slane %v10429_v10, 1  ;;  %v2360_v5 = vrot.slane %v10324_v59, 7 }
 0x34d   : > { %v2072_v60 = vmul.f32 %v7642_v53, %v10430_v28  ;;  %v10431_v40 = vunpack.c.h.bf16 %v7192_v61  ;;  %v7672_v24 = vadd.f32 %v1993_v38, %v7376_v22  ;;  %v10433_v20 = vunpack.c.l.bf16 %v7181_v54 }
 0x34e   : > { %v10326_v7 = vshrl.u32 %v7656_v29, 16  ;;  %v7681_v10 = vor.u32 %v10325_v11, %v2360_v5  ;;  %v10434_v5 = vunpack.c.h.bf16 %v7181_v54 }
 0x34f   : > { %v2073_v37 = vmul.f32 %v7654_v26, %v10431_v40  ;;  %v1998_v32 = vpop.permute.xlu1 %1997  ;;  %2160 = vrot.lane.b32.xlu1 %v7493_v2, %s6704_s30  ;;  %2764 = vrot.lane.b32.xlu0 %v7495_v23, %s6705_s1  ;;  %v10432_v40 = vshrl.u32 %v7479_v31, 16  ;;  %v2354_v2 = vshll.u32 %v7656_v29, 16  ;;  %v2070_v51 = vmul.f32 %v7672_v24, %v10433_v20 }
 0x350   : > { %v7684_v61 = vadd.f32 %v1998_v32, %v7376_v22  ;;  %v2353_v38 = vrot.slane %v10326_v7, 7  ;;  %v10435_v22 = vshrl.u32 %v7495_v23, 16 }
 0x351   : > { %v7688_v28 = vpack.c.bf16 %v2073_v37, %v2072_v60  ;;  %v2572_v59 = vor.u32 %v2571_v39, %v10432_v40 }
 0x352   : > { %v2071_v11 = vmul.f32 %v7684_v61, %v10434_v5  ;;  %v2570_v32 = vor.u32 %v2569_v21, %v10435_v22  ;;  %v7706_v31 = vor.u32 %v2354_v2, %v2353_v38  ;;  %v10437_v38 = vshll.u32 %v7547_v6, 16 }
 0x353   : > { %v2372_v7 = vshrl.u32 %v7688_v28, 16  ;;  %2156 = vrot.lane.b32.xlu1 %v7520_v13, %s6704_s30  ;;  %2166 = vrot.lane.b32.xlu0 %v7534_v1, %s6704_s30  ;;  %v2375_v20 = vshll.u32 %v7688_v28, 16  ;;  %v2615_v23 = vsel %vm7423_vm7, %v2572_v59, 0  ;;  %v10436_v59 = vshll.u32 %v7525_v44, 16 }
 0x354   : > { %v7708_v60 = vpack.c.bf16 %v2071_v11, %v2070_v51  ;;  %v2614_v39 = vsel %vm7423_vm7, %v2570_v32, 0  ;;  %v2573_v40 = vrot.slane %v10437_v38, 1  ;;  %v10438_v5 = vshrl.u32 %v7525_v44, 16  ;;  %v6509_v38 = vld [vmem:[%s10231_s9 + $0x18] sm:$0xff]  }
 0x355   : > { %v2374_v54 = vrot.slane %v2372_v7, 7  ;;  %v2575_v37 = vrot.slane %v10436_v59, 1  ;;  %v10439_v32 = vshrl.u32 %v7547_v6, 16 }
 0x356   : > { %v2365_v13 = vshrl.u32 %v7708_v60, 16  ;;  %v2368_v51 = vshll.u32 %v7708_v60, 16 }
 0x357   : > { %v7720_v1 = vor.u32 %v2375_v20, %v2374_v54  ;;  %2862 = vrot.lane.b32.xlu1 %v2615_v23, %s6706_s2  ;;  %2860 = vrot.lane.b32.xlu0 %v2614_v39, %s6706_s2  ;;  %v2576_v22 = vor.u32 %v2575_v37, %v10438_v5  ;;  %v2574_v54 = vor.u32 %v2573_v40, %v10439_v32  ;;  %v10442_v23 = vshrl.u32 %v7575_v46, 16  ;;  %v6508_v37 = vld [vmem:[%s10231_s9 + $0x50] sm:$0xff]   ;;  %v6510_v32 = vld [vmem:[%s10231_s9 + $0x48] sm:$0xff]  }
 0x358   : > { %v2367_v21 = vrot.slane %v2365_v13, 7  ;;  %v10445_v5 = vshll.u32 %v7633_v58, 16 }
 0x35a   : > { %v7727_v11 = vor.u32 %v2368_v51, %v2367_v21  ;;  %v10443_v21 = vshrl.u32 %v7602_v34, 16 }
 0x35b   : > { %2770 = vrot.lane.b32.xlu1 %v7525_v44, %s6705_s1  ;;  %2162 = vrot.lane.b32.xlu0 %v7559_v62, %s6704_s30  ;;  %v2617_v62 = vsel %vm7423_vm7, %v2576_v22, 0  ;;  %v10440_v44 = vshll.u32 %v7575_v46, 16  ;;  %v2583_v22 = vrot.slane %v10445_v5, 1 }
 0x35f   : > { %2168 = vrot.lane.b32.xlu1 %v7545_v50, %s6704_s30  ;;  %2768 = vrot.lane.b32.xlu0 %v7547_v6, %s6705_s1  ;;  %v2616_v50 = vsel %vm7423_vm7, %v2574_v54, 0  ;;  %v2579_v6 = vrot.slane %v10440_v44, 1 }
 0x361   : > { %v2580_v39 = vor.u32 %v2579_v6, %v10442_v23  ;;  %v2585_v6 = vrot.slane %v2368_v51, 1  ;;  %v10447_v51 = vunpack.c.l.bf16 %v6844_v4 }
 0x363   : > { %2164 = vrot.lane.b32.xlu1 %v7571_v0, %s6704_s30  ;;  %2174 = vrot.lane.b32.xlu0 %v7590_v43, %s6704_s30  ;;  %v10441_v0 = vshll.u32 %v7602_v34, 16 }
 0x365   : > { %v2577_v43 = vrot.slane %v10441_v0, 1  ;;  %v6512_v0 = vld [vmem:[%s10231_s9 + $0x40] sm:$0xff]  }
 0x367   : > { %2866 = vrot.lane.b32.xlu1 %v2617_v62, %s6706_s2  ;;  %2864 = vrot.lane.b32.xlu0 %v2616_v50, %s6706_s2  ;;  %v2578_v59 = vor.u32 %v2577_v43, %v10443_v21  ;;  %v10446_v50 = vshrl.u32 %v7633_v58, 16 }
 0x369   : > { %v2584_v44 = vor.u32 %v2583_v22, %v10446_v50  ;;  %v10451_v50 = vunpack.c.l.bf16 %v6864_v14 }
 0x36b   : > { %2774 = vrot.lane.b32.xlu1 %v7575_v46, %s6705_s1  ;;  %2170 = vrot.lane.b32.xlu0 %v7613_v16, %s6704_s30  ;;  %v2619_v16 = vsel %vm7423_vm7, %v2580_v39, 0  ;;  %v6505_v46 = vld [vmem:[%s10231_s9 + $0x28] sm:$0xff]   ;;  %v10448_v39 = vunpack.c.h.bf16 %v6844_v4 }
 0x36c   : > { %6253 = vmatprep.subr.bf16.mxu0 %v6505_v46 }
 0x36d   : > { %6254 = vmatpush3.bf16.msra.mxu0 %v6505_v46 }
 0x36f   : > { %2176 = vrot.lane.b32.xlu1 %v7600_v33, %s6704_s30  ;;  %2772 = vrot.lane.b32.xlu0 %v7602_v34, %s6705_s1  ;;  %v2618_v33 = vsel %vm7423_vm7, %v2578_v59, 0  ;;  %v6506_v34 = vld [vmem:[%s10231_s9 + $0x58] sm:$0xff]   ;;  %v2621_v59 = vsel %vm7423_vm7, %v2584_v44, 0 }
 0x370   : > { %6209 = vmatprep.subr.bf16.mxu1 %v6506_v34 }
 0x371   : > { %6210 = vmatpush3.bf16.msra.mxu1 %v6506_v34 }
 0x372   : > { %6211 = vmatprep.subr.bf16.mxu1 %v6508_v37 }
 0x373   : > { %2172 = vrot.lane.b32.xlu1 %v7628_v12, %s6704_s30  ;;  %2182 = vrot.lane.b32.xlu0 %v7642_v53, %s6704_s30  ;;  %v2581_v12 = vrot.slane %v2354_v2, 1  ;;  %v6507_v53 = vld [vmem:[%s10231_s9 + $0x20] sm:$0xff]   ;;  %v10444_v2 = vshrl.u32 %v7656_v29, 16 }
 0x374   : > { %6255 = vmatprep.subr.bf16.mxu0 %v6507_v53 }
 0x375   : > { %6256 = vmatpush3.bf16.msra.mxu0 %v6507_v53  ;;  %v2582_v40 = vor.u32 %v2581_v12, %v10444_v2  ;;  %6212 = vmatpush3.bf16.msra.mxu1 %v6508_v37  ;;  %v10449_v12 = vunpack.c.l.bf16 %v6841_v3  ;;  %v10450_v37 = vunpack.c.h.bf16 %v6841_v3 }
 0x376   : > { %6257 = vmatprep.subr.bf16.mxu0 %v6509_v38  ;;  %6213 = vmatprep.subr.bf16.mxu1 %v6510_v32 }
 0x377   : > { %2870 = vrot.lane.b32.xlu1 %v2619_v16, %s6706_s2  ;;  %2868 = vrot.lane.b32.xlu0 %v2618_v33, %s6706_s2  ;;  %v2620_v62 = vsel %vm7423_vm7, %v2582_v40, 0 }
 0x379   : > { %6258 = vmatpush3.bf16.msra.mxu0 %v6509_v38  ;;  %6214 = vmatpush3.bf16.msra.mxu1 %v6510_v32 }
 0x37a   : > { %6215 = vmatprep.subr.bf16.mxu1 %v6512_v0 }
 0x37b   : > { %2778 = vrot.lane.b32.xlu1 %v7633_v58, %s6705_s1  ;;  %2178 = vrot.lane.b32.xlu0 %v7672_v24, %s6704_s30  ;;  %v6511_v24 = vld [vmem:[%s10231_s9 + $0x10] sm:$0xff]   ;;  %v2587_v58 = vrot.slane %v2375_v20, 1  ;;  %v6514_v20 = vld [vmem:[%s10231_s9 + $0x38] sm:$0xff]  }
 0x37c   : > { %6259 = vmatprep.subr.bf16.mxu0 %v6511_v24 }
 0x37d   : > { %6260 = vmatpush3.bf16.msra.mxu0 %v6511_v24  ;;  %v2588_v46 = vor.u32 %v2587_v58, %v2372_v7  ;;  %6216 = vmatpush3.bf16.msra.mxu1 %v6512_v0  ;;  %v6516_v7 = vld [vmem:[%s10231_s9 + $0x30] sm:$0xff]  }
 0x37e   : > { %6217 = vmatprep.subr.bf16.mxu1 %v6514_v20 }
 0x37f   : > { %2184 = vrot.lane.b32.xlu1 %v7654_v26, %s6704_s30  ;;  %2776 = vrot.lane.b32.xlu0 %v7656_v29, %s6705_s1  ;;  %v6513_v26 = vld [vmem:[%s10231_s9 + $0x8] sm:$0xff]   ;;  %v2623_v3 = vsel %vm7423_vm7, %v2588_v46, 0  ;;  %v10457_v46 = vunpack.c.h.bf16 %v6850_v8 }
 0x380   : > { %6261 = vmatprep.subr.bf16.mxu0 %v6513_v26 }
 0x381   : > { %v2127_v54 = vpop.permute.xlu0 %2126  ;;  %6262 = vmatpush3.bf16.msra.mxu0 %v6513_v26  ;;  %6218 = vmatpush3.bf16.msra.mxu1 %v6514_v20  ;;  %v10452_v26 = vunpack.c.h.bf16 %v6864_v14 }
 0x382   : > { %v2220_v23 = vmul.f32 %v2127_v54, %v10447_v51  ;;  %6219 = vmatprep.subr.bf16.mxu1 %v6516_v7 }
 0x383   : > { %2180 = vrot.lane.b32.xlu1 %v7684_v61, %s6704_s30  ;;  %2872 = vrot.lane.b32.xlu0 %v2620_v62, %s6706_s2  ;;  %v2586_v61 = vor.u32 %v2585_v6, %v2365_v13  ;;  %v6515_v13 = vld [vmem:[%s10231_s9] sm:$0xff]  }
 0x384   : > { %6263 = vmatprep.subr.bf16.mxu0 %v6515_v13 }
 0x385   : > { %v2129_v29 = vpop.permute.xlu1 %2128  ;;  %v2123_v43 = vpop.permute.xlu0 %2122  ;;  %6264 = vmatpush3.bf16.msra.mxu0 %v6515_v13  ;;  %6220 = vmatpush3.bf16.msra.mxu1 %v6516_v7 }
 0x386   : > { %v2221_v21 = vmul.f32 %v2129_v29, %v10448_v39  ;;  %v2218_v53 = vmul.f32 %v2123_v43, %v10449_v12 }
 0x387   : > { %2874 = vrot.lane.b32.xlu1 %v2621_v59, %s6706_s2  ;;  %2780 = vrot.lane.b32.xlu0 %v7708_v60, %s6705_s1  ;;  %v2622_v60 = vsel %vm7423_vm7, %v2586_v61, 0  ;;  %v10456_v61 = vunpack.c.l.bf16 %v6850_v8 }
 0x388   : > { %v2251_v16 = vpack.c.bf16 %v2221_v21, %v2220_v23  ;;  %v10453_v23 = vmov 0 }
 0x389   : > { %v2125_v4 = vpop.permute.xlu1 %2124  ;;  %v2135_v33 = vpop.permute.xlu0 %2134  ;;  %v10454_v23 = vsel %vm7873_vm9, 4294967295, %v10453_v23 }
 0x38a   : > { %v2421_v34 = vshrl.u32 %v2251_v16, 16  ;;  %v2219_v38 = vmul.f32 %v2125_v4, %v10450_v37  ;;  %v2224_v44 = vmul.f32 %v2135_v33, %v10451_v50  ;;  %10455 = vst [vmem:[#allocation8_spill] sm:$0xff] %v10454_v23 }
 0x38b   : > { %2782 = vrot.lane.b32.xlu1 %v7688_v28, %s6705_s1  ;;  %2876 = vrot.lane.b32.xlu0 %v2622_v60, %s6706_s2  ;;  %v2424_v28 = vshll.u32 %v2251_v16, 16  ;;  %s6707_s1 = smov 48  }
 0x38c   : > { %v2250_v2 = vpack.c.bf16 %v2219_v38, %v2218_v53  ;;  %v2423_v24 = vrot.slane %v2421_v34, 7 }
 0x38d   : > { %v7860_v40 = vpop.permute.xlu1 %2754  ;;  %v2131_v5 = vpop.permute.xlu0 %2130  ;;  %v2626_v51 = vrot.slane %v2424_v28, 1 }
 0x38e   : > { %v2414_v22 = vshrl.u32 %v2250_v2, 16  ;;  %v2417_v32 = vshll.u32 %v2250_v2, 16  ;;  %v2426_v58 = vor.u32 %v2424_v28, %v2423_v24  ;;  %v2222_v20 = vmul.f32 %v2131_v5, %v10456_v61 }
 0x38f   : > { %2878 = vrot.lane.b32.xlu1 %v2623_v3, %s6706_s2  ;;  %2800 = vrot.lane.b32.xlu0 %v2250_v2, %s6707_s1  ;;  %s6708_s2 = smov 80  }
 0x390   : > { %v2416_v54 = vrot.slane %v2414_v22, 7  ;;  %v2624_v62 = vrot.slane %v2417_v32, 1  ;;  %v2542_v12 = vsel %vm7873_vm9, 0, %v2426_v58 }
 0x391   : > { %v2137_v6 = vpop.permute.xlu1 %2136  ;;  %v7868_v0 = vpop.permute.xlu0 %2752 }
 0x392   : > { %v2225_v29 = vmul.f32 %v2137_v6, %v10452_v26  ;;  %v2419_v43 = vor.u32 %v2417_v32, %v2416_v54  ;;  %v2625_v59 = vor.u32 %v2624_v62, %v2414_v22 }
 0x393   : > { %2802 = vrot.lane.b32.xlu1 %v2251_v16, %s6707_s1  ;;  %v2627_v16 = vor.u32 %v2626_v51, %v2421_v34  ;;  %v10459_v51 = vunpack.c.h.bf16 %v6883_v27 }
 0x394   : > { %v2253_v39 = vpack.c.bf16 %v2225_v29, %v2224_v44  ;;  %v2541_v21 = vsel %vm7873_vm9, 0, %v2419_v43  ;;  %v2672_v37 = vsel %vm7423_vm7, %v2625_v59, 0  ;;  %v10458_v43 = vunpack.c.l.bf16 %v6883_v27 }
 0x395   : > { %v2133_v14 = vpop.permute.xlu1 %2132  ;;  %2704 = vrot.lane.b32.xlu0 %v2541_v21, %s6702_s8  ;;  %v2143_v4 = vpop.permute.xlu0 %2142  ;;  %v2673_v2 = vsel %vm7423_vm7, %v2627_v16, 0 }
 0x396   : > { %v2435_v33 = vshrl.u32 %v2253_v39, 16  ;;  %v2223_v13 = vmul.f32 %v2133_v14, %v10457_v46  ;;  %v2438_v7 = vshll.u32 %v2253_v39, 16  ;;  %v2228_v58 = vmul.f32 %v2143_v4, %v10458_v43 }
 0x397   : > { %2706 = vrot.lane.b32.xlu1 %v2542_v12, %s6702_s8  ;;  %v10460_v4 = vunpack.c.l.bf16 %v6871_v18 }
 0x398   : > { %v2252_v53 = vpack.c.bf16 %v2223_v13, %v2222_v20  ;;  %v2437_v34 = vrot.slane %v2435_v33, 7  ;;  %v2630_v28 = vrot.slane %v2438_v7, 1  ;;  %v10461_v13 = vunpack.c.h.bf16 %v6871_v18 }
 0x399   : > { %v7890_v38 = vpop.permute.xlu1 %2850  ;;  %2896 = vrot.lane.b32.xlu0 %v2672_v37, %s6708_s2  ;;  %v7893_v60 = vpop.permute.xlu0 %2848 }
 0x39a   : > { %v2428_v8 = vshrl.u32 %v2252_v53, 16  ;;  %v2431_v5 = vshll.u32 %v2252_v53, 16  ;;  %v2440_v62 = vor.u32 %v2438_v7, %v2437_v34  ;;  %v2631_v29 = vor.u32 %v2630_v28, %v2435_v33 }
 0x39b   : > { %2898 = vrot.lane.b32.xlu1 %v2673_v2, %s6708_s2 }
 0x39c   : > { %v2430_v3 = vrot.slane %v2428_v8, 7  ;;  %v2628_v22 = vrot.slane %v2431_v5, 1  ;;  %v2544_v59 = vsel %vm7873_vm9, 0, %v2440_v62  ;;  %v2675_v33 = vsel %vm7423_vm7, %v2631_v29, 0 }
 0x39d   : > { %v7898_v32 = vpop.permute.xlu1 %2758  ;;  %2804 = vrot.lane.b32.xlu0 %v2252_v53, %s6707_s1  ;;  %v2139_v24 = vpop.permute.xlu0 %2138 }
 0x39e   : > { %v2433_v54 = vor.u32 %v2431_v5, %v2430_v3  ;;  %v2629_v44 = vor.u32 %v2628_v22, %v2428_v8  ;;  %v2226_v27 = vmul.f32 %v2139_v24, %v10460_v4 }
 0x39f   : > { %2806 = vrot.lane.b32.xlu1 %v2253_v39, %s6707_s1 }
 0x3a0   : > { %v2543_v50 = vsel %vm7873_vm9, 0, %v2433_v54  ;;  %v2674_v61 = vsel %vm7423_vm7, %v2629_v44, 0 }
 0x3a1   : > { %v2145_v6 = vpop.permute.xlu1 %2144  ;;  %2708 = vrot.lane.b32.xlu0 %v2543_v50, %s6702_s8  ;;  %v7905_v26 = vpop.permute.xlu0 %2756 }
 0x3a2   : > { %v2229_v21 = vmul.f32 %v2145_v6, %v10459_v51 }
 0x3a3   : > { %2710 = vrot.lane.b32.xlu1 %v2544_v59, %s6702_s8 }
 0x3a4   : > { %v2255_v39 = vpack.c.bf16 %v2229_v21, %v2228_v58  ;;  %v10462_v58 = vunpack.c.l.bf16 %v6908_v42  ;;  %v10463_v21 = vunpack.c.h.bf16 %v6908_v42  ;;  %v10465_v42 = vunpack.c.h.bf16 %v6897_v35 }
 0x3a5   : > { %v2141_v20 = vpop.permute.xlu1 %2140  ;;  %2900 = vrot.lane.b32.xlu0 %v2674_v61, %s6708_s2  ;;  %v2151_v14 = vpop.permute.xlu0 %2150 }
 0x3a6   : > { %v2449_v46 = vshrl.u32 %v2255_v39, 16  ;;  %v2227_v12 = vmul.f32 %v2141_v20, %v10461_v13  ;;  %v2452_v16 = vshll.u32 %v2255_v39, 16  ;;  %v2232_v51 = vmul.f32 %v2151_v14, %v10462_v58 }
 0x3a7   : > { %2902 = vrot.lane.b32.xlu1 %v2675_v33, %s6708_s2 }
 0x3a8   : > { %v2254_v53 = vpack.c.bf16 %v2227_v12, %v2226_v27  ;;  %v2451_v37 = vrot.slane %v2449_v46, 7  ;;  %v2634_v3 = vrot.slane %v2452_v16, 1  ;;  %v10464_v27 = vunpack.c.l.bf16 %v6897_v35 }
 0x3a9   : > { %v7924_v7 = vpop.permute.xlu1 %2854  ;;  %v7926_v8 = vpop.permute.xlu0 %2852 }
 0x3aa   : > { %v2442_v2 = vshrl.u32 %v2254_v53, 16  ;;  %2808 = vrot.lane.b32.xlu0 %v2254_v53, %s6707_s1  ;;  %v2454_v5 = vor.u32 %v2452_v16, %v2451_v37  ;;  %v2445_v34 = vshll.u32 %v2254_v53, 16  ;;  %v2635_v50 = vor.u32 %v2634_v3, %v2449_v46 }
 0x3ab   : > { %2810 = vrot.lane.b32.xlu1 %v2255_v39, %s6707_s1 }
 0x3ac   : > { %v2444_v22 = vrot.slane %v2442_v2, 7  ;;  %v2632_v18 = vrot.slane %v2445_v34, 1  ;;  %v2546_v54 = vsel %vm7873_vm9, 0, %v2454_v5  ;;  %v2677_v39 = vsel %vm7423_vm7, %v2635_v50, 0 }
 0x3ad   : > { %v7930_v24 = vpop.permute.xlu1 %2762  ;;  %v2147_v28 = vpop.permute.xlu0 %2146 }
 0x3ae   : > { %v2447_v62 = vor.u32 %v2445_v34, %v2444_v22  ;;  %v2633_v6 = vor.u32 %v2632_v18, %v2442_v2  ;;  %v2230_v46 = vmul.f32 %v2147_v28, %v10464_v27 }
 0x3af   : > { %2714 = vrot.lane.b32.xlu1 %v2546_v54, %s6702_s8 }
 0x3b0   : > { %v2545_v44 = vsel %vm7873_vm9, 0, %v2447_v62  ;;  %v2676_v20 = vsel %vm7423_vm7, %v2633_v6, 0 }
 0x3b1   : > { %v2153_v29 = vpop.permute.xlu1 %2152  ;;  %2712 = vrot.lane.b32.xlu0 %v2545_v44, %s6702_s8  ;;  %v7938_v43 = vpop.permute.xlu0 %2760 }
 0x3b2   : > { %v2233_v59 = vmul.f32 %v2153_v29, %v10463_v21 }
 0x3b3   : > { %2906 = vrot.lane.b32.xlu1 %v2677_v39, %s6708_s2  ;;  %v10466_v39 = vunpack.c.l.bf16 %v6930_v56 }
 0x3b4   : > { %v2257_v61 = vpack.c.bf16 %v2233_v59, %v2232_v51  ;;  %v7976_v59 = vld [vmem:[%s10231_s9 + $0x88] sm:$0xff]  }
 0x3b5   : > { %v2149_v33 = vpop.permute.xlu1 %2148  ;;  %2904 = vrot.lane.b32.xlu0 %v2676_v20, %s6708_s2  ;;  %v2159_v4 = vpop.permute.xlu0 %2158  ;;  %v10467_v20 = vunpack.c.h.bf16 %v6930_v56  ;;  %6297 = vmatprep.subr.bf16.mxu1 %v7976_v59 }
 0x3b6   : > { %v2463_v14 = vshrl.u32 %v2257_v61, 16  ;;  %v2231_v13 = vmul.f32 %v2149_v33, %v10465_v42  ;;  %v2466_v12 = vshll.u32 %v2257_v61, 16 }
 0x3b7   : > { %2814 = vrot.lane.b32.xlu1 %v2257_v61, %s6707_s1  ;;  %v2236_v61 = vmul.f32 %v2159_v4, %v10466_v39 }
 0x3b8   : > { %v2256_v16 = vpack.c.bf16 %v2231_v13, %v2230_v46  ;;  %v2465_v53 = vrot.slane %v2463_v14, 7  ;;  %v2638_v37 = vrot.slane %v2466_v12, 1  ;;  %v10468_v13 = vunpack.c.l.bf16 %v6919_v49 }
 0x3b9   : > { %v7955_v2 = vpop.permute.xlu1 %2858  ;;  %v7957_v5 = vpop.permute.xlu0 %2856 }
 0x3ba   : > { %v2456_v34 = vshrl.u32 %v2256_v16, 16  ;;  %2812 = vrot.lane.b32.xlu0 %v2256_v16, %s6707_s1  ;;  %v2468_v3 = vor.u32 %v2466_v12, %v2465_v53  ;;  %v2459_v22 = vshll.u32 %v2256_v16, 16  ;;  %v2639_v35 = vor.u32 %v2638_v37, %v2463_v14 }
 0x3bb   : > { %v10469_v53 = vunpack.c.h.bf16 %v6919_v49 }
 0x3bc   : > { %v2548_v18 = vsel %vm7873_vm9, 0, %v2468_v3  ;;  %v2458_v28 = vrot.slane %v2456_v34, 7  ;;  %v2636_v54 = vrot.slane %v2459_v22, 1  ;;  %v2679_v6 = vsel %vm7423_vm7, %v2639_v35, 0 }
 0x3bd   : > { %v7962_v62 = vpop.permute.xlu1 %2766  ;;  %2718 = vrot.lane.b32.xlu1 %v2548_v18, %s6702_s8  ;;  %v2155_v50 = vpop.permute.xlu0 %2154 }
 0x3be   : > { %v2461_v44 = vor.u32 %v2459_v22, %v2458_v28  ;;  %v2637_v58 = vor.u32 %v2636_v54, %v2456_v34  ;;  %v2234_v12 = vmul.f32 %v2155_v50, %v10468_v13  ;;  %v10471_v13 = vunpack.c.h.bf16 %v6962_v19 }
 0x3c0   : > { %v2547_v29 = vsel %vm7873_vm9, 0, %v2461_v44  ;;  %v2678_v46 = vsel %vm7423_vm7, %v2637_v58, 0 }
 0x3c1   : > { %v2161_v51 = vpop.permute.xlu1 %2160  ;;  %2910 = vrot.lane.b32.xlu1 %v2679_v6, %s6708_s2  ;;  %2716 = vrot.lane.b32.xlu0 %v2547_v29, %s6702_s8  ;;  %v7971_v21 = vpop.permute.xlu0 %2764 }
 0x3c2   : > { %v2237_v33 = vmul.f32 %v2161_v51, %v10467_v20 }
 0x3c4   : > { %v2259_v27 = vpack.c.bf16 %v2237_v33, %v2236_v61 }
 0x3c5   : > { %v2157_v14 = vpop.permute.xlu1 %2156  ;;  %2908 = vrot.lane.b32.xlu0 %v2678_v46, %s6708_s2  ;;  %v2167_v42 = vpop.permute.xlu0 %2166  ;;  %v10470_v46 = vunpack.c.l.bf16 %v6962_v19 }
 0x3c6   : > { %v2477_v16 = vshrl.u32 %v2259_v27, 16  ;;  %v2235_v4 = vmul.f32 %v2157_v14, %v10469_v53  ;;  %2818 = vrot.lane.b32.xlu1 %v2259_v27, %s6707_s1  ;;  %v2480_v56 = vshll.u32 %v2259_v27, 16 }
 0x3c7   : > { %v2240_v14 = vmul.f32 %v2167_v42, %v10470_v46 }
 0x3c8   : > { %v2258_v37 = vpack.c.bf16 %v2235_v4, %v2234_v12  ;;  %v2479_v34 = vrot.slane %v2477_v16, 7  ;;  %v2642_v3 = vrot.slane %v2480_v56, 1 }
 0x3c9   : > { %v7991_v22 = vpop.permute.xlu1 %2862  ;;  %v7993_v18 = vpop.permute.xlu0 %2860 }
 0x3ca   : > { %v2470_v35 = vshrl.u32 %v2258_v37, 16  ;;  %2816 = vrot.lane.b32.xlu0 %v2258_v37, %s6707_s1  ;;  %v2482_v28 = vor.u32 %v2480_v56, %v2479_v34  ;;  %v2473_v54 = vshll.u32 %v2258_v37, 16  ;;  %v2643_v49 = vor.u32 %v2642_v3, %v2477_v16 }
 0x3cb   : > { %v10472_v37 = vunpack.c.l.bf16 %v6948_v63 }
 0x3cc   : > { %v2550_v50 = vsel %vm7873_vm9, 0, %v2482_v28  ;;  %v2472_v44 = vrot.slane %v2470_v35, 7  ;;  %v2640_v6 = vrot.slane %v2473_v54, 1  ;;  %v2681_v39 = vsel %vm7423_vm7, %v2643_v49, 0 }
 0x3cd   : > { %v7998_v29 = vpop.permute.xlu1 %2770  ;;  %2722 = vrot.lane.b32.xlu1 %v2550_v50, %s6702_s8  ;;  %v2163_v58 = vpop.permute.xlu0 %2162 }
 0x3ce   : > { %v2475_v51 = vor.u32 %v2473_v54, %v2472_v44  ;;  %v2641_v20 = vor.u32 %v2640_v6, %v2470_v35  ;;  %v2238_v34 = vmul.f32 %v2163_v58, %v10472_v37  ;;  %v10473_v35 = vunpack.c.h.bf16 %v6948_v63 }
 0x3cf   : > { %v10474_v37 = vunpack.c.l.bf16 %v6996_v55 }
 0x3d0   : > { %v2549_v61 = vsel %vm7873_vm9, 0, %v2475_v51  ;;  %v2680_v53 = vsel %vm7423_vm7, %v2641_v20, 0 }
 0x3d1   : > { %v2169_v33 = vpop.permute.xlu1 %2168  ;;  %2914 = vrot.lane.b32.xlu1 %v2681_v39, %s6708_s2  ;;  %2720 = vrot.lane.b32.xlu0 %v2549_v61, %s6702_s8  ;;  %v8007_v27 = vpop.permute.xlu0 %2768 }
 0x3d2   : > { %v2241_v12 = vmul.f32 %v2169_v33, %v10471_v13 }
 0x3d4   : > { %v2261_v16 = vpack.c.bf16 %v2241_v12, %v2240_v14 }
 0x3d5   : > { %v2165_v4 = vpop.permute.xlu1 %2164  ;;  %2912 = vrot.lane.b32.xlu0 %v2680_v53, %s6708_s2  ;;  %v2175_v56 = vpop.permute.xlu0 %2174 }
 0x3d6   : > { %v2491_v3 = vshrl.u32 %v2261_v16, 16  ;;  %v2239_v28 = vmul.f32 %v2165_v4, %v10473_v35  ;;  %2822 = vrot.lane.b32.xlu1 %v2261_v16, %s6707_s1  ;;  %v2494_v42 = vshll.u32 %v2261_v16, 16 }
 0x3d8   : > { %v2260_v19 = vpack.c.bf16 %v2239_v28, %v2238_v34  ;;  %v2493_v54 = vrot.slane %v2491_v3, 7  ;;  %v2646_v50 = vrot.slane %v2494_v42, 1  ;;  %v2244_v34 = vmul.f32 %v2175_v56, %v10474_v37 }
 0x3d9   : > { %v8021_v49 = vpop.permute.xlu1 %2866  ;;  %v8023_v44 = vpop.permute.xlu0 %2864 }
 0x3da   : > { %v2484_v6 = vshrl.u32 %v2260_v19, 16  ;;  %2820 = vrot.lane.b32.xlu0 %v2260_v19, %s6707_s1  ;;  %v2496_v51 = vor.u32 %v2494_v42, %v2493_v54  ;;  %v2487_v39 = vshll.u32 %v2260_v19, 16  ;;  %v2647_v63 = vor.u32 %v2646_v50, %v2491_v3 }
 0x3db   : > { %v10475_v3 = vunpack.c.h.bf16 %v6996_v55  ;;  %v10476_v50 = vunpack.c.l.bf16 %v6978_v36 }
 0x3dc   : > { %v2552_v58 = vsel %vm7873_vm9, 0, %v2496_v51  ;;  %v2486_v61 = vrot.slane %v2484_v6, 7  ;;  %v2644_v20 = vrot.slane %v2487_v39, 1  ;;  %v2683_v13 = vsel %vm7423_vm7, %v2647_v63, 0 }
 0x3dd   : > { %v8028_v33 = vpop.permute.xlu1 %2774  ;;  %2726 = vrot.lane.b32.xlu1 %v2552_v58, %s6702_s8  ;;  %v2171_v46 = vpop.permute.xlu0 %2170 }
 0x3de   : > { %v2489_v14 = vor.u32 %v2487_v39, %v2486_v61  ;;  %v2645_v16 = vor.u32 %v2644_v20, %v2484_v6  ;;  %v2242_v6 = vmul.f32 %v2171_v46, %v10476_v50  ;;  %v10477_v39 = vunpack.c.h.bf16 %v6978_v36 }
 0x3e0   : > { %v2551_v12 = vsel %vm7873_vm9, 0, %v2489_v14  ;;  %v2682_v42 = vsel %vm7423_vm7, %v2645_v16, 0 }
 0x3e1   : > { %v2177_v53 = vpop.permute.xlu1 %2176  ;;  %2918 = vrot.lane.b32.xlu1 %v2683_v13, %s6708_s2  ;;  %2724 = vrot.lane.b32.xlu0 %v2551_v12, %s6702_s8  ;;  %v8037_v4 = vpop.permute.xlu0 %2772 }
 0x3e2   : > { %v2245_v35 = vmul.f32 %v2177_v53, %v10475_v3 }
 0x3e4   : > { %v2263_v28 = vpack.c.bf16 %v2245_v35, %v2244_v34 }
 0x3e5   : > { %v2173_v19 = vpop.permute.xlu1 %2172  ;;  %2916 = vrot.lane.b32.xlu0 %v2682_v42, %s6708_s2  ;;  %v2183_v54 = vpop.permute.xlu0 %2182 }
 0x3e6   : > { %v2505_v51 = vshrl.u32 %v2263_v28, 16  ;;  %v2243_v58 = vmul.f32 %v2173_v19, %v10477_v39  ;;  %2826 = vrot.lane.b32.xlu1 %v2263_v28, %s6707_s1  ;;  %v2508_v56 = vshll.u32 %v2263_v28, 16 }
 0x3e8   : > { %v2262_v55 = vpack.c.bf16 %v2243_v58, %v2242_v6  ;;  %v2507_v63 = vrot.slane %v2505_v51, 7  ;;  %v2650_v61 = vrot.slane %v2508_v56, 1 }
 0x3e9   : > { %v8051_v20 = vpop.permute.xlu1 %2870  ;;  %v8053_v14 = vpop.permute.xlu0 %2868 }
 0x3ea   : > { %v2498_v13 = vshrl.u32 %v2262_v55, 16  ;;  %2824 = vrot.lane.b32.xlu0 %v2262_v55, %s6707_s1  ;;  %v2510_v12 = vor.u32 %v2508_v56, %v2507_v63  ;;  %v2501_v16 = vshll.u32 %v2262_v55, 16  ;;  %v2651_v36 = vor.u32 %v2650_v61, %v2505_v51  ;;  %v10478_v51 = vld [vmem:[#allocation4_spill] sm:$0xff] }
 0x3eb   : > { %v10479_v39 = vunpack.c.l.bf16 %v10478_v51  ;;  %v10480_v56 = vunpack.c.h.bf16 %v10478_v51 }
 0x3ec   : > { %v2554_v46 = vsel %vm7873_vm9, 0, %v2510_v12  ;;  %v2500_v53 = vrot.slane %v2498_v13, 7  ;;  %v2648_v37 = vrot.slane %v2501_v16, 1  ;;  %v2685_v28 = vsel %vm7423_vm7, %v2651_v36, 0 }
 0x3ed   : > { %v8058_v34 = vpop.permute.xlu1 %2778  ;;  %2730 = vrot.lane.b32.xlu1 %v2554_v46, %s6702_s8  ;;  %v2179_v3 = vpop.permute.xlu0 %2178  ;;  %v2248_v58 = vmul.f32 %v2183_v54, %v10479_v39 }
 0x3ee   : > { %v2503_v35 = vor.u32 %v2501_v16, %v2500_v53  ;;  %v2649_v19 = vor.u32 %v2648_v37, %v2498_v13  ;;  %v10481_v16 = vld [vmem:[#allocation3_spill] sm:$0xff] }
 0x3ef   : > { %v10482_v46 = vunpack.c.l.bf16 %v10481_v16  ;;  %v10483_v37 = vunpack.c.h.bf16 %v10481_v16 }
 0x3f0   : > { %v2553_v42 = vsel %vm7873_vm9, 0, %v2503_v35  ;;  %v2684_v61 = vsel %vm7423_vm7, %v2649_v19, 0 }
 0x3f1   : > { %v2185_v50 = vpop.permute.xlu1 %2184  ;;  %2922 = vrot.lane.b32.xlu1 %v2685_v28, %s6708_s2  ;;  %2728 = vrot.lane.b32.xlu0 %v2553_v42, %s6702_s8  ;;  %v8067_v6 = vpop.permute.xlu0 %2776  ;;  %v2246_v36 = vmul.f32 %v2179_v3, %v10482_v46 }
 0x3f2   : > { %v2249_v55 = vmul.f32 %v2185_v50, %v10480_v56 }
 0x3f4   : > { %v2265_v63 = vpack.c.bf16 %v2249_v55, %v2248_v58 }
 0x3f5   : > { %v2181_v12 = vpop.permute.xlu1 %2180  ;;  %2920 = vrot.lane.b32.xlu0 %v2684_v61, %s6708_s2  ;;  %v8076_v13 = vpop.permute.xlu0 %2872 }
 0x3f6   : > { %v2519_v53 = vshrl.u32 %v2265_v63, 16  ;;  %v2247_v35 = vmul.f32 %v2181_v12, %v10483_v37  ;;  %2830 = vrot.lane.b32.xlu1 %v2265_v63, %s6707_s1  ;;  %v2522_v54 = vshll.u32 %v2265_v63, 16 }
 0x3f8   : > { %v2264_v28 = vpack.c.bf16 %v2247_v35, %v2246_v36  ;;  %v2521_v42 = vrot.slane %v2519_v53, 7  ;;  %v2654_v50 = vrot.slane %v2522_v54, 1 }
 0x3f9   : > { %v8083_v51 = vpop.permute.xlu1 %2874  ;;  %v8085_v19 = vpop.permute.xlu0 %2780 }
 0x3fa   : > { %v2512_v39 = vshrl.u32 %v2264_v28, 16  ;;  %2828 = vrot.lane.b32.xlu0 %v2264_v28, %s6707_s1  ;;  %v2524_v58 = vor.u32 %v2522_v54, %v2521_v42  ;;  %v2515_v56 = vshll.u32 %v2264_v28, 16  ;;  %v2655_v55 = vor.u32 %v2654_v50, %v2519_v53 }
 0x3fb   : > { %v2397_v50 = vsel %vm7873_vm9, 0, %v7417_v45 }
 0x3fc   : > { %v2556_v3 = vsel %vm7873_vm9, 0, %v2524_v58  ;;  %v2514_v61 = vrot.slane %v2512_v39, 7  ;;  %v2652_v12 = vrot.slane %v2515_v56, 1  ;;  %v2687_v36 = vsel %vm7423_vm7, %v2655_v55, 0 }
 0x3fd   : > { %v8090_v16 = vpop.permute.xlu1 %2782  ;;  %2734 = vrot.lane.b32.xlu1 %v2556_v3, %s6702_s8  ;;  %v8093_v63 = vpop.permute.xlu0 %2876  ;;  %v2398_v3 = vsel %vm7873_vm9, 0, %v7404_v9 }
 0x3fe   : > { %v2517_v46 = vor.u32 %v2515_v56, %v2514_v61  ;;  %v2653_v35 = vor.u32 %v2652_v12, %v2512_v39 }
 0x400   : > { %v2555_v37 = vsel %vm7873_vm9, 0, %v2517_v46  ;;  %v2686_v28 = vsel %vm7423_vm7, %v2653_v35, 0 }
 0x401   : > { %v8099_v54 = vpop.permute.xlu1 %2878  ;;  %2926 = vrot.lane.b32.xlu1 %v2687_v36, %s6708_s2  ;;  %2732 = vrot.lane.b32.xlu0 %v2555_v37, %s6702_s8  ;;  %v2801_v53 = vpop.permute.xlu0 %2800  ;;  %s6711_s8 = smov 8  }
 0x405   : > { %v2803_v42 = vpop.permute.xlu1 %2802  ;;  %2924 = vrot.lane.b32.xlu0 %v2686_v28, %s6708_s2  ;;  %v6519_v28 = vld [vmem:[%s10231_s9 + $0x78] sm:$0xff]   ;;  %s6710_s2 = smov 4  }
 0x407   : > { %v2705_v58 = vpop.permute.xlu0 %2704 }
 0x408   : > { %v2930_v39 = vsel %vm722_vm0, %v2397_v50, %v2705_v58 }
 0x409   : > { %v2977_v56 = vsel %vm919_vm2, %v2930_v39, %v7868_v0  ;;  %v2707_v55 = vpop.permute.xlu1 %2706 }
 0x40a   : > { %v2933_v61 = vsel %vm722_vm0, %v2398_v3, %v2707_v55  ;;  %v3010_v12 = vsel %vm3008_vm10, %v2977_v56, %v2801_v53 }
 0x40b   : > { %v2979_v45 = vsel %vm919_vm2, %v2933_v61, %v7860_v40  ;;  %v3043_v46 = vsel %vm3041_vm11, %v3010_v12, %v7893_v60  ;;  %v2897_v36 = vpop.permute.xlu0 %2896  ;;  %v6518_v40 = vld [vmem:[%s10231_s9 + $0x80] sm:$0xff]  }
 0x40c   : > { %v3076_v0 = vsel %vm3074_vm12, %v3043_v46, %v2897_v36  ;;  %v3012_v37 = vsel %vm3008_vm10, %v2979_v45, %v2803_v42  ;;  %v2399_v42 = vsel %vm7873_vm9, 0, %v7443_v52  ;;  %v6520_v52 = vld [vmem:[%s10231_s9 + $0x70] sm:$0xff]  }
 0x40d   : > { %v3045_v9 = vsel %vm3041_vm11, %v3012_v37, %v7890_v38  ;;  %v2899_v35 = vpop.permute.xlu1 %2898  ;;  %6221 = vmatprep.mubr.msk.bf16.mxu1 %vm3168_vm13, %v3076_v0  ;;  %6266 = vmatmul.mubr.msk.bf16.vlgmr.msra.gmra.mxu0 %vm3168_vm13, %v3076_v0  ;;  %v6522_v0 = vld [vmem:[%s10231_s9 + $0x60] sm:$0xff]  }
 0x40e   : > { %v8131_v53 = vsel %vm3074_vm12, %v3045_v9, %v2899_v35  ;;  %v2402_v9 = vsel %vm7873_vm9, 0, %v7465_v17 }
 0x40f   : > { %6222 = vmatmul.mubr.msk.bf16.vlgmr.msra.gmra.mxu1 %vm3168_vm13, %v8131_v53  ;;  %6269 = vmatprep.mubr.msk.bf16.mxu0 %vm3168_vm13, %v8131_v53  ;;  %v2805_v60 = vpop.permute.xlu0 %2804 }
 0x410   : > { %6298 = vmatpush3.bf16.msra.mxu1 %v7976_v59  ;;  %v2400_v59 = vsel %vm7873_vm9, 0, %v7427_v30 }
 0x411   : > { %v2807_v38 = vpop.permute.xlu1 %2806  ;;  %6299 = vmatprep.subr.bf16.mxu1 %v6518_v40 }
 0x413   : > { %v2709_v50 = vpop.permute.xlu0 %2708 }
 0x414   : > { %v2936_v58 = vsel %vm722_vm0, %v2399_v42, %v2709_v50  ;;  %6300 = vmatpush3.bf16.msra.mxu1 %v6518_v40 }
 0x415   : > { %v2981_v39 = vsel %vm919_vm2, %v2936_v58, %v7905_v26  ;;  %v2711_v56 = vpop.permute.xlu1 %2710  ;;  %6301 = vmatprep.subr.bf16.mxu1 %v6519_v28 }
 0x416   : > { %v2939_v3 = vsel %vm722_vm0, %v2400_v59, %v2711_v56  ;;  %v3014_v55 = vsel %vm3008_vm10, %v2981_v39, %v2805_v60 }
 0x417   : > { %v2983_v61 = vsel %vm919_vm2, %v2939_v3, %v7898_v32  ;;  %v3047_v26 = vsel %vm3041_vm11, %v3014_v55, %v7926_v8  ;;  %v2901_v12 = vpop.permute.xlu0 %2900  ;;  %v6521_v32 = vld [vmem:[%s10231_s9 + $0x68] sm:$0xff]  }
 0x418   : > { %v8160_v45 = vsel %vm3074_vm12, %v3047_v26, %v2901_v12  ;;  %v3016_v30 = vsel %vm3008_vm10, %v2983_v61, %v2807_v38  ;;  %6302 = vmatpush3.bf16.msra.mxu1 %v6519_v28  ;;  %v2401_v38 = vsel %vm7873_vm9, 0, %v7481_v48  ;;  %v2403_v12 = vsel %vm7873_vm9, 0, %v7538_v15 }
 0x419   : > { %v3049_v46 = vsel %vm3041_vm11, %v3016_v30, %v7924_v7  ;;  %v2903_v36 = vpop.permute.xlu1 %2902  ;;  %6225 = vmatprep.mubr.msk.bf16.mxu1 %vm3168_vm13, %v8160_v45  ;;  %6270 = vmatmul.mubr.msk.bf16.gmra.mxu0 %vm3168_vm13, %v8160_v45 }
 0x41a   : > { %v8173_v8 = vsel %vm3074_vm12, %v3049_v46, %v2903_v36  ;;  %6303 = vmatprep.subr.bf16.mxu1 %v6520_v52 }
 0x41b   : > { %6226 = vmatmul.mubr.msk.bf16.gmra.mxu1 %vm3168_vm13, %v8173_v8  ;;  %6273 = vmatprep.mubr.msk.bf16.mxu0 %vm3168_vm13, %v8173_v8 }
 0x41c   : > { %6304 = vmatpush3.bf16.msra.mxu1 %v6520_v52  ;;  %v2809_v37 = vpop.permute.xlu0 %2808 }
 0x41d   : > { %v2811_v7 = vpop.permute.xlu1 %2810  ;;  %6305 = vmatprep.subr.bf16.mxu1 %v6521_v32 }
 0x420   : > { %6306 = vmatpush3.bf16.msra.mxu1 %v6521_v32 }
 0x421   : > { %v2715_v35 = vpop.permute.xlu1 %2714  ;;  %6307 = vmatprep.subr.bf16.mxu1 %v6522_v0 }
 0x422   : > { %v2945_v40 = vsel %vm722_vm0, %v2402_v9, %v2715_v35 }
 0x423   : > { %v2987_v60 = vsel %vm919_vm2, %v2945_v40, %v7930_v24  ;;  %v2713_v28 = vpop.permute.xlu0 %2712 }
 0x424   : > { %v2942_v42 = vsel %vm722_vm0, %v2401_v38, %v2713_v28  ;;  %v3020_v50 = vsel %vm3008_vm10, %v2987_v60, %v2811_v7  ;;  %6308 = vmatpush3.bf16.msra.mxu1 %v6522_v0  ;;  %v2405_v38 = vsel %vm7873_vm9, 0, %v7597_v57 }
 0x425   : > { %v2985_v17 = vsel %vm919_vm2, %v2942_v42, %v7938_v43  ;;  %v2907_v58 = vpop.permute.xlu1 %2906  ;;  %v3053_v39 = vsel %vm3041_vm11, %v3020_v50, %v7955_v2 }
 0x426   : > { %v3018_v59 = vsel %vm3008_vm10, %v2985_v17, %v2809_v37  ;;  %v8204_v3 = vsel %vm3074_vm12, %v3053_v39, %v2907_v58 }
 0x427   : > { %v3051_v24 = vsel %vm3041_vm11, %v3018_v59, %v7957_v5  ;;  %v2905_v56 = vpop.permute.xlu0 %2904  ;;  %v2404_v5 = vsel %vm7873_vm9, 0, %v7517_v25 }
 0x428   : > { %v8201_v48 = vsel %vm3074_vm12, %v3051_v24, %v2905_v56 }
 0x429   : > { %6229 = vmatprep.mubr.msk.bf16.mxu1 %vm3168_vm13, %v8201_v48  ;;  %6274 = vmatmul.mubr.msk.bf16.gmra.mxu0 %vm3168_vm13, %v8201_v48  ;;  %v2815_v43 = vpop.permute.xlu1 %2814 }
 0x42a   : > { %6230 = vmatmul.mubr.msk.bf16.gmra.mxu1 %vm3168_vm13, %v8204_v3  ;;  %6277 = vmatprep.mubr.msk.bf16.mxu0 %vm3168_vm13, %v8204_v3 }
 0x42c   : > { %v2813_v2 = vpop.permute.xlu0 %2812 }
 0x42f   : > { %v2719_v55 = vpop.permute.xlu1 %2718 }
 0x430   : > { %v2951_v52 = vsel %vm722_vm0, %v2404_v5, %v2719_v55  ;;  %v5907_v5 = vld [vmem:[%s10234_s12] ss:$0 sm:$0xff] }
 0x431   : > { %v2991_v61 = vsel %vm919_vm2, %v2951_v52, %v7962_v62  ;;  %v10485_v52 = vld [vmem:[#allocation7_spill] sm:$0xff]  ;;  %4126 = vrot.lane.b32.xlu0 %v5907_v5, %s6709_s28 }
 0x432   : > { %v3024_v26 = vsel %vm3008_vm10, %v2991_v61, %v2815_v43  ;;  %v2407_v61 = vsel %vm7873_vm9, 0, %v10485_v52 }
 0x433   : > { %v2717_v30 = vpop.permute.xlu0 %2716  ;;  %v2911_v36 = vpop.permute.xlu1 %2910  ;;  %v3057_v25 = vsel %vm3041_vm11, %v3024_v26, %v7991_v22 }
 0x434   : > { %v2948_v46 = vsel %vm722_vm0, %v2403_v12, %v2717_v30  ;;  %v8236_v15 = vsel %vm3074_vm12, %v3057_v25, %v2911_v36  ;;  %v5908_v30 = vld [vmem:[%s10235_s13] ss:$0 sm:$0xff] }
 0x435   : > { %v2989_v32 = vsel %vm919_vm2, %v2948_v46, %v7971_v21  ;;  %4167 = vrot.lane.b32.xlu1 %v5908_v30, %s6709_s28 }
 0x436   : > { %v3022_v7 = vsel %vm3008_vm10, %v2989_v32, %v2813_v2 }
 0x437   : > { %v3055_v62 = vsel %vm3041_vm11, %v3022_v7, %v7993_v18  ;;  %v2909_v0 = vpop.permute.xlu0 %2908  ;;  %v2406_v18 = vsel %vm7873_vm9, 0, %v7568_v47 }
 0x438   : > { %v8233_v37 = vsel %vm3074_vm12, %v3055_v62, %v2909_v0  ;;  %v2819_v21 = vpop.permute.xlu1 %2818 }
 0x439   : > { %6233 = vmatprep.mubr.msk.bf16.mxu1 %vm3168_vm13, %v8233_v37  ;;  %6278 = vmatmul.mubr.msk.bf16.gmra.mxu0 %vm3168_vm13, %v8233_v37 }
 0x43a   : > { %6234 = vmatmul.mubr.msk.bf16.gmra.mxu1 %vm3168_vm13, %v8236_v15  ;;  %6281 = vmatprep.mubr.msk.bf16.mxu0 %vm3168_vm13, %v8236_v15 }
 0x43c   : > { %v2817_v22 = vpop.permute.xlu0 %2816 }
 0x43f   : > { %v2723_v9 = vpop.permute.xlu1 %2722 }
 0x440   : > { %v2957_v35 = vsel %vm722_vm0, %v2406_v18, %v2723_v9 }
 0x441   : > { %v2995_v40 = vsel %vm919_vm2, %v2957_v35, %v7998_v29  ;;  %v2409_v35 = vsel %vm7873_vm9, 0, %v7706_v31 }
 0x442   : > { %v3028_v60 = vsel %vm3008_vm10, %v2995_v40, %v2819_v21  ;;  %v2410_v21 = vsel %vm7873_vm9, 0, %v7681_v10 }
 0x443   : > { %v2721_v28 = vpop.permute.xlu0 %2720  ;;  %v2915_v50 = vpop.permute.xlu1 %2914  ;;  %v3061_v47 = vsel %vm3041_vm11, %v3028_v60, %v8021_v49 }
 0x444   : > { %v2954_v42 = vsel %vm722_vm0, %v2405_v38, %v2721_v28  ;;  %v8268_v57 = vsel %vm3074_vm12, %v3061_v47, %v2915_v50  ;;  %v2412_v47 = vsel %vm7873_vm9, 0, %v7720_v1 }
 0x445   : > { %v2993_v17 = vsel %vm919_vm2, %v2954_v42, %v8007_v27 }
 0x446   : > { %v3026_v58 = vsel %vm3008_vm10, %v2993_v17, %v2817_v22 }
 0x447   : > { %v3059_v29 = vsel %vm3041_vm11, %v3026_v58, %v8023_v44  ;;  %v2913_v39 = vpop.permute.xlu0 %2912  ;;  %v10484_v44 = vld [vmem:[#allocation6_spill] sm:$0xff] }
 0x448   : > { %v8265_v59 = vsel %vm3074_vm12, %v3059_v29, %v2913_v39  ;;  %v2823_v27 = vpop.permute.xlu1 %2822  ;;  %v2408_v24 = vsel %vm7873_vm9, 0, %v10484_v44 }
 0x449   : > { %6237 = vmatprep.mubr.msk.bf16.mxu1 %vm3168_vm13, %v8265_v59  ;;  %6282 = vmatmul.mubr.msk.bf16.gmra.mxu0 %vm3168_vm13, %v8265_v59 }
 0x44a   : > { %6238 = vmatmul.mubr.msk.bf16.gmra.mxu1 %vm3168_vm13, %v8268_v57  ;;  %6285 = vmatprep.mubr.msk.bf16.mxu0 %vm3168_vm13, %v8268_v57 }
 0x44c   : > { %v2821_v49 = vpop.permute.xlu0 %2820 }
 0x44f   : > { %v2727_v56 = vpop.permute.xlu1 %2726 }
 0x450   : > { %v2963_v43 = vsel %vm722_vm0, %v2408_v24, %v2727_v56 }
 0x451   : > { %v2999_v2 = vsel %vm919_vm2, %v2963_v43, %v8028_v33 }
 0x452   : > { %v3032_v55 = vsel %vm3008_vm10, %v2999_v2, %v2823_v27  ;;  %v2411_v27 = vsel %vm7873_vm9, 0, %v7727_v11 }
 0x453   : > { %v2725_v26 = vpop.permute.xlu0 %2724  ;;  %v2919_v33 = vpop.permute.xlu1 %2918  ;;  %v3065_v36 = vsel %vm3041_vm11, %v3032_v55, %v8051_v20 }
 0x454   : > { %v2960_v12 = vsel %vm722_vm0, %v2407_v61, %v2725_v26  ;;  %v3098_v0 = vsel %vm3074_vm12, %v3065_v36, %v2919_v33 }
 0x455   : > { %v2997_v46 = vsel %vm919_vm2, %v2960_v12, %v8037_v4 }
 0x456   : > { %v3030_v32 = vsel %vm3008_vm10, %v2997_v46, %v2821_v49 }
 0x457   : > { %v3063_v25 = vsel %vm3041_vm11, %v3030_v32, %v8053_v14  ;;  %v2917_v7 = vpop.permute.xlu0 %2916 }
 0x458   : > { %v3096_v62 = vsel %vm3074_vm12, %v3063_v25, %v2917_v7  ;;  %v2827_v4 = vpop.permute.xlu1 %2826 }
 0x459   : > { %6241 = vmatprep.mubr.msk.bf16.mxu1 %vm3168_vm13, %v3096_v62  ;;  %6286 = vmatmul.mubr.msk.bf16.gmra.mxu0 %vm3168_vm13, %v3096_v62 }
 0x45a   : > { %6242 = vmatmul.mubr.msk.bf16.gmra.mxu1 %vm3168_vm13, %v3098_v0  ;;  %6289 = vmatprep.mubr.msk.bf16.mxu0 %vm3168_vm13, %v3098_v0 }
 0x45c   : > { %v2825_v20 = vpop.permute.xlu0 %2824 }
 0x45f   : > { %v2731_v14 = vpop.permute.xlu1 %2730 }
 0x460   : > { %v2969_v22 = vsel %vm722_vm0, %v2410_v21, %v2731_v14 }
 0x461   : > { %v3003_v18 = vsel %vm919_vm2, %v2969_v22, %v8058_v34 }
 0x462   : > { %v3036_v9 = vsel %vm3008_vm10, %v3003_v18, %v2827_v4 }
 0x463   : > { %v2729_v40 = vpop.permute.xlu0 %2728  ;;  %v2923_v38 = vpop.permute.xlu1 %2922  ;;  %v3069_v10 = vsel %vm3041_vm11, %v3036_v9, %v8083_v51 }
 0x464   : > { %v2966_v60 = vsel %vm722_vm0, %v2409_v35, %v2729_v40  ;;  %v3102_v31 = vsel %vm3074_vm12, %v3069_v10, %v2923_v38 }
 0x465   : > { %v3001_v28 = vsel %vm919_vm2, %v2966_v60, %v8067_v6 }
 0x466   : > { %v3034_v42 = vsel %vm3008_vm10, %v3001_v28, %v2825_v20 }
 0x467   : > { %v3067_v34 = vsel %vm3041_vm11, %v3034_v42, %v8076_v13  ;;  %v2921_v50 = vpop.permute.xlu0 %2920 }
 0x468   : > { %v3100_v17 = vsel %vm3074_vm12, %v3067_v34, %v2921_v50  ;;  %v2831_v6 = vpop.permute.xlu1 %2830 }
 0x469   : > { %6245 = vmatprep.mubr.msk.bf16.mxu1 %vm3168_vm13, %v3100_v17  ;;  %6290 = vmatmul.mubr.msk.bf16.gmra.mxu0 %vm3168_vm13, %v3100_v17 }
 0x46a   : > { %6246 = vmatmul.mubr.msk.bf16.gmra.mxu1 %vm3168_vm13, %v3102_v31  ;;  %6293 = vmatprep.mubr.msk.bf16.mxu0 %vm3168_vm13, %v3102_v31 }
 0x46c   : > { %v2829_v51 = vpop.permute.xlu0 %2828 }
 0x46f   : > { %v2735_v13 = vpop.permute.xlu1 %2734 }
 0x470   : > { %v2975_v58 = vsel %vm722_vm0, %v2412_v47, %v2735_v13 }
 0x471   : > { %v3007_v29 = vsel %vm919_vm2, %v2975_v58, %v8090_v16 }
 0x472   : > { %v3040_v39 = vsel %vm3008_vm10, %v3007_v29, %v2831_v6 }
 0x473   : > { %v2733_v49 = vpop.permute.xlu0 %2732  ;;  %v3073_v1 = vsel %vm3041_vm11, %v3040_v39, %v8099_v54  ;;  %v2927_v56 = vpop.permute.xlu1 %2926 }
 0x474   : > { %v2972_v44 = vsel %vm722_vm0, %v2411_v27, %v2733_v49  ;;  %v3106_v11 = vsel %vm3074_vm12, %v3073_v1, %v2927_v56  ;;  %vm4717_vm0 = vcmask 64512  }
 0x475   : > { %v3005_v24 = vsel %vm919_vm2, %v2972_v44, %v8085_v19  ;;  %v10486_v19 = vmov 0  }
 0x476   : > { %v3038_v43 = vsel %vm3008_vm10, %v3005_v24, %v2829_v51 }
 0x477   : > { %v3071_v16 = vsel %vm3041_vm11, %v3038_v43, %v8093_v63  ;;  %v2925_v2 = vpop.permute.xlu0 %2924 }
 0x478   : > { %v3104_v5 = vsel %vm3074_vm12, %v3071_v16, %v2925_v2 }
 0x479   : > { %6249 = vmatprep.mubr.msk.bf16.mxu1 %vm3168_vm13, %v3104_v5  ;;  %6294 = vmatmul.mubr.msk.bf16.gmra.mxu0 %vm3168_vm13, %v3104_v5 }
 0x47a   : > { %6250 = vmatmul.mubr.msk.bf16.gmra.mxu1 %vm3168_vm13, %v3106_v11 }
 0x47b   : > { %6309 = vmatprep.mubr.msk.bf16.mxu1 %vm3168_vm13, %v8131_v53 }
 0x482   : > { %6310 = vmatmul.mubr.msk.bf16.vlgmr.msra.gmra.mxu1 %vm3168_vm13, %v8160_v45 }
 0x483   : > { %6313 = vmatprep.mubr.msk.bf16.mxu1 %vm3168_vm13, %v8173_v8 }
 0x48a   : > { %6314 = vmatmul.mubr.msk.bf16.gmra.mxu1 %vm3168_vm13, %v8201_v48 }
 0x48b   : > { %6317 = vmatprep.mubr.msk.bf16.mxu1 %vm3168_vm13, %v8204_v3 }
 0x492   : > { %6318 = vmatmul.mubr.msk.bf16.gmra.mxu1 %vm3168_vm13, %v8233_v37 }
 0x493   : > { %6321 = vmatprep.mubr.msk.bf16.mxu1 %vm3168_vm13, %v8236_v15 }
 0x49a   : > { %6322 = vmatmul.mubr.msk.bf16.gmra.mxu1 %vm3168_vm13, %v8265_v59 }
 0x49b   : > { %6325 = vmatprep.mubr.msk.bf16.mxu1 %vm3168_vm13, %v8268_v57 }
 0x4a2   : > { %6326 = vmatmul.mubr.msk.bf16.gmra.mxu1 %vm3168_vm13, %v3096_v62 }
 0x4a3   : > { %6329 = vmatprep.mubr.msk.bf16.mxu1 %vm3168_vm13, %v3098_v0 }
 0x4aa   : > { %6330 = vmatmul.mubr.msk.bf16.gmra.mxu1 %vm3168_vm13, %v3100_v17 }
 0x4ab   : > { %6333 = vmatprep.mubr.msk.bf16.mxu1 %vm3168_vm13, %v3102_v31 }
 0x4b2   : > { %6334 = vmatmul.mubr.msk.bf16.gmra.mxu1 %vm3168_vm13, %v3104_v5 }
 0x4b3   : > { %6337 = vmatprep.mubr.msk.bf16.mxu1 %vm3168_vm13, %v3106_v11 }
 0x4ba   : > { %6338 = vmatmul.mubr.bf16.gmra.mxu1 %v10486_v19 }
 0x4bb   : > { %6377 = vmatprep.mubr.bf16.mxu1 %v10486_v19 }
 0x4cd   : > { %v6267_v12 = vpop.f32.mrf.mxu0 }
 0x4cf   : > { %v6223_v63 = vpop.f32.mrf.mxu1  ;;  %v3435_v46 = vpop.f32.mrf.mxu0 }
 0x4d0   : > { %v3444_v24 = vadd.f32 %v6267_v12, %v6223_v63 }
 0x4d1   : > { %v3235_v54 = vpop.f32.mrf.mxu1  ;;  %v6268_v32 = vpop.f32.mrf.mxu0 }
 0x4d2   : > { %v3436_v27 = vadd.f32 %v3435_v46, %v3235_v54 }
 0x4d3   : > { %v6224_v53 = vpop.f32.mrf.mxu1  ;;  %v3438_v7 = vpop.f32.mrf.mxu0 }
 0x4d4   : > { %v3447_v16 = vadd.f32 %v6268_v32, %v6224_v53 }
 0x4d5   : > { %v3238_v45 = vpop.f32.mrf.mxu1 }
 0x4d6   : > { %v3439_v1 = vadd.f32 %v3438_v7, %v3238_v45 }
 0x4d9   : > { %v6271_v62 = vpop.f32.mrf.mxu0 }
 0x4db   : > { %v8381_v8 = vpop.f32.mrf.mxu1  ;;  %v3451_v20 = vpop.f32.mrf.mxu0 }
 0x4dd   : > { %v3251_v48 = vpop.f32.mrf.mxu1  ;;  %v6272_v14 = vpop.f32.mrf.mxu0 }
 0x4de   : > { %v3452_v23 = vadd.f32 %v3451_v20, %v3251_v48  ;;  %v3460_v48 = vadd.f32 %v6271_v62, %v8381_v8 }
 0x4df   : > { %v8383_v3 = vpop.f32.mrf.mxu1  ;;  %v3454_v18 = vpop.f32.mrf.mxu0 }
 0x4e1   : > { %v8385_v37 = vpop.f32.mrf.mxu1 }
 0x4e2   : > { %v3455_v20 = vadd.f32 %v3454_v18, %v8385_v37 }
 0x4e9   : > { %v8417_v9 = vpop.f32.mrf.mxu0 }
 0x4ea   : > { %v8387_v15 = vpop.f32.mrf.mxu1 }
 0x4eb   : > { %v3467_v60 = vpop.f32.mrf.mxu0 }
 0x4ec   : > { %v8389_v59 = vpop.f32.mrf.mxu1 }
 0x4ed   : > { %v8425_v28 = vpop.f32.mrf.mxu0  ;;  %v3468_v8 = vadd.f32 %v3467_v60, %v8389_v59 }
 0x4ee   : > { %v8391_v57 = vpop.f32.mrf.mxu1 }
 0x4ef   : > { %v3470_v42 = vpop.f32.mrf.mxu0 }
 0x4f0   : > { %v8393_v55 = vpop.f32.mrf.mxu1 }
 0x4f1   : > { %v3471_v59 = vadd.f32 %v3470_v42, %v8393_v55 }
 0x4f9   : > { %v8429_v34 = vpop.f32.mrf.mxu0 }
 0x4fa   : > { %v8395_v52 = vpop.f32.mrf.mxu1 }
 0x4fb   : > { %v8435_v31 = vpop.f32.mrf.mxu0 }
 0x4fc   : > { %v8397_v61 = vpop.f32.mrf.mxu1 }
 0x4fd   : > { %v8441_v47 = vpop.f32.mrf.mxu0  ;;  %v3484_v55 = vadd.f32 %v8435_v31, %v8397_v61 }
 0x4fe   : > { %v8399_v26 = vpop.f32.mrf.mxu1 }
 0x4ff   : > { %v8445_v29 = vpop.f32.mrf.mxu0 }
 0x500   : > { %v8401_v30 = vpop.f32.mrf.mxu1 }
 0x501   : > { %v3487_v61 = vadd.f32 %v8445_v29, %v8401_v30 }
 0x509   : > { %v8447_v49 = vpop.f32.mrf.mxu0 }
 0x50a   : > { %v8403_v33 = vpop.f32.mrf.mxu1 }
 0x50b   : > { %v8455_v11 = vpop.f32.mrf.mxu0 }
 0x50c   : > { %v8405_v36 = vpop.f32.mrf.mxu1 }
 0x50d   : > { %v8467_v7 = vpop.f32.mrf.mxu0  ;;  %v3500_v30 = vadd.f32 %v8455_v11, %v8405_v36 }
 0x50e   : > { %v8407_v25 = vpop.f32.mrf.mxu1 }
 0x510   : > { %v8409_v0 = vpop.f32.mrf.mxu1 }
 0x51a   : > { %v8411_v4 = vpop.f32.mrf.mxu1 }
 0x51c   : > { %v8413_v21 = vpop.f32.mrf.mxu1 }
 0x51e   : > { %v8415_v22 = vpop.f32.mrf.mxu1 }
 0x520   : > { %v8419_v35 = vpop.f32.mrf.mxu1 }
 0x52a   : > { %v8421_v40 = vpop.f32.mrf.mxu1 }
 0x52c   : > { %v8423_v38 = vpop.f32.mrf.mxu1 }
 0x52e   : > { %v8427_v10 = vpop.f32.mrf.mxu1 }
 0x530   : > { %v8431_v50 = vpop.f32.mrf.mxu1 }
 0x53a   : > { %v8433_v17 = vpop.f32.mrf.mxu1 }
 0x53c   : > { %v8437_v6 = vpop.f32.mrf.mxu1 }
 0x53e   : > { %v8439_v51 = vpop.f32.mrf.mxu1 }
 0x540   : > { %v8443_v13 = vpop.f32.mrf.mxu1 }
 0x542   : > { %v6311_v58 = vpop.f32.mrf.mxu1 }
 0x543   : > { %v8451_v2 = vadd.f32 %v6311_v58, %v3444_v24 }
 0x544   : > { %v3645_v39 = vpop.f32.mrf.mxu1 }
 0x545   : > { %v8449_v56 = vadd.f32 %v3645_v39, %v3436_v27  ;;  %10488 = vst [vmem:[#allocation3_spill] sm:$0xff] %v8451_v2  ;;  %v3807_v53 = vsel %vm967_vm4, %v8451_v2, 0.0 }
 0x546   : > { %v6312_v44 = vpop.f32.mrf.mxu1 }
 0x547   : > { %10487 = vst [vmem:[#allocation4_spill] sm:$0xff] %v8449_v56  ;;  %v3804_v54 = vsel %vm967_vm4, %v8449_v56, 0.0  ;;  %v8459_v46 = vadd.f32 %v6312_v44, %v3447_v16 }
 0x548   : > { %v3648_v43 = vpop.f32.mrf.mxu1 }
 0x549   : > { %v8453_v5 = vadd.f32 %v3648_v43, %v3439_v1  ;;  %10490 = vst [vmem:[#allocation7_spill] sm:$0xff] %v8459_v46  ;;  %v3809_v27 = vsel %vm967_vm4, %v8459_v46, 0.0  ;;  %v3463_v1 = vadd.f32 %v6272_v14, %v8383_v3 }
 0x54a   : > { %v6315_v19 = vpop.f32.mrf.mxu1 }
 0x54b   : > { %10489 = vst [vmem:[#allocation6_spill] sm:$0xff] %v8453_v5  ;;  %v3805_v63 = vsel %vm967_vm4, %v8453_v5, 0.0  ;;  %v8474_v43 = vadd.f32 %v6315_v19, %v3460_v48  ;;  %v3476_v48 = vadd.f32 %v8417_v9, %v8387_v15 }
 0x54c   : > { %v3806_v45 = vadd.f32 %v3805_v63, %v3804_v54  ;;  %v3661_v12 = vpop.f32.mrf.mxu1  ;;  %v3502_v54 = vpop.f32.mrf.mxu0 }
 0x54d   : > { %v8465_v32 = vadd.f32 %v3661_v12, %v3452_v23  ;;  %10492 = vst [vmem:[#allocation10_spill] sm:$0xff] %v8474_v43  ;;  %v3815_v14 = vsel %vm967_vm4, %v8474_v43, 0.0  ;;  %v3503_v36 = vadd.f32 %v3502_v54, %v8409_v0 }
 0x54e   : > { %v3808_v58 = vadd.f32 %v3807_v53, %v3806_v45  ;;  %v6316_v39 = vpop.f32.mrf.mxu1  ;;  %v8485_v18 = vpop.f32.mrf.mxu0 }
 0x54f   : > { %10491 = vst [vmem:[#allocation9_spill] sm:$0xff] %v8465_v32  ;;  %v3811_v23 = vsel %vm967_vm4, %v8465_v32, 0.0  ;;  %v8481_v37 = vadd.f32 %v6316_v39, %v3463_v1 }
 0x550   : > { %v3810_v44 = vadd.f32 %v3809_v27, %v3808_v58  ;;  %v3664_v24 = vpop.f32.mrf.mxu1  ;;  %v3515_v39 = vpop.f32.mrf.mxu0 }
 0x551   : > { %v8478_v16 = vadd.f32 %v3664_v24, %v3455_v20  ;;  %10494 = vst [vmem:[#allocation12_spill] sm:$0xff] %v8481_v37  ;;  %v3817_v60 = vsel %vm967_vm4, %v8481_v37, 0.0  ;;  %v3516_v0 = vadd.f32 %v3515_v39, %v8413_v21 }
 0x552   : > { %v3812_v63 = vadd.f32 %v3811_v23, %v3810_v44  ;;  %v6319_v45 = vpop.f32.mrf.mxu1  ;;  %v3479_v44 = vadd.f32 %v8425_v28, %v8391_v57 }
 0x553   : > { %10493 = vst [vmem:[#allocation11_spill] sm:$0xff] %v8478_v16  ;;  %v3813_v62 = vsel %vm967_vm4, %v8478_v16, 0.0  ;;  %v8498_v24 = vadd.f32 %v6319_v45, %v3476_v48 }
 0x554   : > { %v3814_v3 = vadd.f32 %v3813_v62, %v3812_v63  ;;  %v3677_v19 = vpop.f32.mrf.mxu1 }
 0x555   : > { %v8489_v12 = vadd.f32 %v3677_v19, %v3468_v8  ;;  %10496 = vst [vmem:[#allocation14_spill] sm:$0xff] %v8498_v24  ;;  %v6288_v8 = vpop.f32.mrf.mxu0  ;;  %v3823_v28 = vsel %vm967_vm4, %v8498_v24, 0.0 }
 0x556   : > { %v3816_v53 = vadd.f32 %v3815_v14, %v3814_v3  ;;  %v6320_v58 = vpop.f32.mrf.mxu1  ;;  %v3492_v14 = vadd.f32 %v8429_v34, %v8395_v52 }
 0x557   : > { %10495 = vst [vmem:[#allocation13_spill] sm:$0xff] %v8489_v12  ;;  %v3819_v1 = vsel %vm967_vm4, %v8489_v12, 0.0  ;;  %v8506_v9 = vadd.f32 %v6320_v58, %v3479_v44 }
 0x558   : > { %v3818_v20 = vadd.f32 %v3817_v60, %v3816_v53  ;;  %v3680_v27 = vpop.f32.mrf.mxu1  ;;  %v3518_v53 = vpop.f32.mrf.mxu0 }
 0x559   : > { %v8502_v23 = vadd.f32 %v3680_v27, %v3471_v59  ;;  %10498 = vst [vmem:[#allocation16_spill] sm:$0xff] %v8506_v9  ;;  %v3825_v31 = vsel %vm967_vm4, %v8506_v9, 0.0  ;;  %v3495_v59 = vadd.f32 %v8441_v47, %v8399_v26  ;;  %v3519_v21 = vadd.f32 %v3518_v53, %v8419_v35 }
 0x55a   : > { %v3820_v63 = vadd.f32 %v3819_v1, %v3818_v20  ;;  %v6323_v15 = vpop.f32.mrf.mxu1  ;;  %v6291_v52 = vpop.f32.mrf.mxu0 }
 0x55b   : > { %10497 = vst [vmem:[#allocation15_spill] sm:$0xff] %v8502_v23  ;;  %v3821_v42 = vsel %vm967_vm4, %v8502_v23, 0.0  ;;  %v8522_v60 = vadd.f32 %v6323_v15, %v3492_v14 }
 0x55c   : > { %v3822_v62 = vadd.f32 %v3821_v42, %v3820_v63  ;;  %v3693_v57 = vpop.f32.mrf.mxu1 }
 0x55d   : > { %v8512_v45 = vadd.f32 %v3693_v57, %v3484_v55  ;;  %10500 = vst [vmem:[#allocation18_spill] sm:$0xff] %v8522_v60  ;;  %v3831_v47 = vsel %vm967_vm4, %v8522_v60, 0.0  ;;  %v3531_v55 = vpop.f32.mrf.mxu0  ;;  %v3508_v57 = vadd.f32 %v8447_v49, %v8403_v33 }
 0x55e   : > { %v3824_v3 = vadd.f32 %v3823_v28, %v3822_v62  ;;  %v6324_v19 = vpop.f32.mrf.mxu1 }
 0x55f   : > { %10499 = vst [vmem:[#allocation17_spill] sm:$0xff] %v8512_v45  ;;  %v3827_v20 = vsel %vm967_vm4, %v8512_v45, 0.0  ;;  %v8530_v29 = vadd.f32 %v6324_v19, %v3495_v59  ;;  %v3511_v19 = vadd.f32 %v8467_v7, %v8407_v25 }
 0x560   : > { %v3826_v58 = vadd.f32 %v3825_v31, %v3824_v3  ;;  %v3696_v48 = vpop.f32.mrf.mxu1 }
 0x561   : > { %v8526_v27 = vadd.f32 %v3696_v48, %v3487_v61  ;;  %10502 = vst [vmem:[#allocation20_spill] sm:$0xff] %v8530_v29  ;;  %v3833_v11 = vsel %vm967_vm4, %v8530_v29, 0.0 }
 0x562   : > { %v3828_v34 = vadd.f32 %v3827_v20, %v3826_v58  ;;  %v6327_v44 = vpop.f32.mrf.mxu1  ;;  %v6292_v58 = vpop.f32.mrf.mxu0 }
 0x563   : > { %10501 = vst [vmem:[#allocation19_spill] sm:$0xff] %v8526_v27  ;;  %v3829_v1 = vsel %vm967_vm4, %v8526_v27, 0.0  ;;  %v8545_v14 = vadd.f32 %v6327_v44, %v3508_v57 }
 0x564   : > { %v3830_v63 = vadd.f32 %v3829_v1, %v3828_v34  ;;  %v3709_v26 = vpop.f32.mrf.mxu1  ;;  %v3534_v34 = vpop.f32.mrf.mxu0  ;;  %v3524_v1 = vadd.f32 %v8485_v18, %v8411_v4  ;;  %v3532_v4 = vadd.f32 %v3531_v55, %v8423_v38 }
 0x565   : > { %v8536_v15 = vadd.f32 %v3709_v26, %v3500_v30  ;;  %10504 = vst [vmem:[#allocation22_spill] sm:$0xff] %v8545_v14  ;;  %v3839_v25 = vsel %vm967_vm4, %v8545_v14, 0.0 }
 0x566   : > { %v3832_v42 = vadd.f32 %v3831_v47, %v3830_v63  ;;  %v6328_v62 = vpop.f32.mrf.mxu1  ;;  %v6295_v63 = vpop.f32.mrf.mxu0 }
 0x567   : > { %10503 = vst [vmem:[#allocation21_spill] sm:$0xff] %v8536_v15  ;;  %v3835_v61 = vsel %vm967_vm4, %v8536_v15, 0.0  ;;  %v8552_v49 = vadd.f32 %v6328_v62, %v3511_v19 }
 0x568   : > { %v3834_v28 = vadd.f32 %v3833_v11, %v3832_v42  ;;  %v3712_v3 = vpop.f32.mrf.mxu1  ;;  %v3527_v42 = vadd.f32 %v6288_v8, %v8415_v22  ;;  %v3547_v53 = vpop.f32.mrf.mxu0 }
 0x569   : > { %v8549_v31 = vadd.f32 %v3712_v3, %v3503_v36  ;;  %10506 = vst [vmem:[#allocation24_spill] sm:$0xff] %v8552_v49  ;;  %v3841_v39 = vsel %vm967_vm4, %v8552_v49, 0.0 }
 0x56a   : > { %v3836_v48 = vadd.f32 %v3835_v61, %v3834_v28  ;;  %v6331_v33 = vpop.f32.mrf.mxu1  ;;  %v6296_v55 = vpop.f32.mrf.mxu0 }
 0x56b   : > { %10505 = vst [vmem:[#allocation23_spill] sm:$0xff] %v8549_v31  ;;  %v3837_v54 = vsel %vm967_vm4, %v8549_v31, 0.0  ;;  %v8566_v62 = vadd.f32 %v6331_v33, %v3524_v1  ;;  %v3540_v33 = vadd.f32 %v6291_v52, %v8421_v40  ;;  %v3548_v40 = vadd.f32 %v3547_v53, %v8437_v6 }
 0x56c   : > { %v3838_v59 = vadd.f32 %v3837_v54, %v3836_v48  ;;  %v3725_v20 = vpop.f32.mrf.mxu1 }
 0x56d   : > { %v8558_v7 = vadd.f32 %v3725_v20, %v3516_v0  ;;  %10508 = vst [vmem:[#allocation26_spill] sm:$0xff] %v8566_v62  ;;  %v3847_v22 = vsel %vm967_vm4, %v8566_v62, 0.0  ;;  %v3535_v0 = vadd.f32 %v3534_v34, %v8431_v50  ;;  %v3543_v20 = vadd.f32 %v6292_v58, %v8427_v10  ;;  %v3550_v34 = vpop.f32.mrf.mxu0 }
 0x56e   : > { %v3840_v44 = vadd.f32 %v3839_v25, %v3838_v59  ;;  %v6332_v30 = vpop.f32.mrf.mxu1 }
 0x56f   : > { %10507 = vst [vmem:[#allocation25_spill] sm:$0xff] %v8558_v7  ;;  %v3843_v57 = vsel %vm967_vm4, %v8558_v7, 0.0  ;;  %v8573_v35 = vadd.f32 %v6332_v30, %v3527_v42 }
 0x570   : > { %v3842_v26 = vadd.f32 %v3841_v39, %v3840_v44  ;;  %v3728_v47 = vpop.f32.mrf.mxu1 }
 0x571   : > { %v8570_v36 = vadd.f32 %v3728_v47, %v3519_v21  ;;  %10510 = vst [vmem:[#allocation28_spill] sm:$0xff] %v8573_v35  ;;  %v3849_v38 = vsel %vm967_vm4, %v8573_v35, 0.0 }
 0x572   : > { %v3844_v11 = vadd.f32 %v3843_v57, %v3842_v26  ;;  %v6335_v28 = vpop.f32.mrf.mxu1  ;;  %v3556_v57 = vadd.f32 %v6295_v63, %v8433_v17 }
 0x573   : > { %10509 = vst [vmem:[#allocation27_spill] sm:$0xff] %v8570_v36  ;;  %v3845_v18 = vsel %vm967_vm4, %v8570_v36, 0.0  ;;  %v8586_v25 = vadd.f32 %v6335_v28, %v3540_v33 }
 0x574   : > { %v3846_v3 = vadd.f32 %v3845_v18, %v3844_v11  ;;  %v3741_v19 = vpop.f32.mrf.mxu1  ;;  %v3551_v11 = vadd.f32 %v3550_v34, %v8443_v13  ;;  %v3559_v18 = vadd.f32 %v6296_v55, %v8439_v51 }
 0x575   : > { %v8579_v8 = vadd.f32 %v3741_v19, %v3532_v4  ;;  %10512 = vst [vmem:[#allocation30_spill] sm:$0xff] %v8586_v25  ;;  %v3855_v10 = vsel %vm967_vm4, %v8586_v25, 0.0 }
 0x576   : > { %v3848_v61 = vadd.f32 %v3847_v22, %v3846_v3  ;;  %v6336_v48 = vpop.f32.mrf.mxu1 }
 0x577   : > { %10511 = vst [vmem:[#allocation29_spill] sm:$0xff] %v8579_v8  ;;  %v3851_v44 = vsel %vm967_vm4, %v8579_v8, 0.0  ;;  %v8593_v50 = vadd.f32 %v6336_v48, %v3543_v20 }
 0x578   : > { %v3850_v54 = vadd.f32 %v3849_v38, %v3848_v61  ;;  %v3744_v59 = vpop.f32.mrf.mxu1 }
 0x579   : > { %v8590_v30 = vadd.f32 %v3744_v59, %v3535_v0  ;;  %10514 = vst [vmem:[#allocation32_spill] sm:$0xff] %v8593_v50  ;;  %v3857_v6 = vsel %vm967_vm4, %v8593_v50, 0.0 }
 0x57a   : > { %v3852_v1 = vadd.f32 %v3851_v44, %v3850_v54  ;;  %v6339_v21 = vpop.f32.mrf.mxu1 }
 0x57b   : > { %10513 = vst [vmem:[#allocation31_spill] sm:$0xff] %v8590_v30  ;;  %v3853_v52 = vsel %vm967_vm4, %v8590_v30, 0.0  ;;  %v8606_v53 = vadd.f32 %v6339_v21, %v3556_v57 }
 0x57c   : > { %v3854_v39 = vadd.f32 %v3853_v52, %v3852_v1  ;;  %v3757_v26 = vpop.f32.mrf.mxu1 }
 0x57d   : > { %v8599_v58 = vadd.f32 %v3757_v26, %v3548_v40  ;;  %10516 = vst [vmem:[#allocation34_spill] sm:$0xff] %v8606_v53  ;;  %v3863_v63 = vsel %vm967_vm4, %v8606_v53, 0.0 }
 0x57e   : > { %v3856_v47 = vadd.f32 %v3855_v10, %v3854_v39  ;;  %v6340_v42 = vpop.f32.mrf.mxu1 }
 0x57f   : > { %10515 = vst [vmem:[#allocation33_spill] sm:$0xff] %v8599_v58  ;;  %v3859_v3 = vsel %vm967_vm4, %v8599_v58, 0.0  ;;  %v8612_v61 = vadd.f32 %v6340_v42, %v3559_v18 }
 0x580   : > { %v3858_v28 = vadd.f32 %v3857_v6, %v3856_v47  ;;  %v3760_v4 = vpop.f32.mrf.mxu1 }
 0x581   : > { %v8610_v19 = vadd.f32 %v3760_v4, %v3551_v11  ;;  %10518 = vst [vmem:[#allocation36_spill] sm:$0xff] %v8612_v61  ;;  %v3865_v51 = vsel %vm967_vm4, %v8612_v61, 0.0 }
 0x582   : > { %v3860_v22 = vadd.f32 %v3859_v3, %v3858_v28 }
 0x583   : > { %10517 = vst [vmem:[#allocation35_spill] sm:$0xff] %v8610_v19  ;;  %v3861_v17 = vsel %vm967_vm4, %v8610_v19, 0.0 }
 0x584   : > { %v3862_v13 = vadd.f32 %v3861_v17, %v3860_v22 }
 0x586   : > { %v3864_v48 = vadd.f32 %v3863_v63, %v3862_v13 }
 0x588   : > { %v3866_v33 = vadd.f32 %v3865_v51, %v3864_v48 }
 0x58a   : > { %v3867_v0 = vrot.slane %v3866_v33, 4 }
 0x58c   : > { %v3868_v38 = vadd.f32 %v3867_v0, %v3866_v33 }
 0x58e   : > { %v3869_v55 = vrot.slane %v3868_v38, 2 }
 0x590   : > { %v3870_v54 = vadd.f32 %v3869_v55, %v3868_v38 }
 0x592   : > { %v3871_v59 = vrot.slane %v3870_v54, 1 }
 0x594   : > { %v3872_v20 = vadd.f32 %v3871_v59, %v3870_v54 }
 0x596   : > { %v8620_v44 = vmul.f32 0.00390625, %v3872_v20 }
 0x598   : > { %v8624_v1 = vsub.f32 %v8449_v56, %v8620_v44  ;;  %v8628_v21 = vsub.f32 %v8453_v5, %v8620_v44  ;;  %v8632_v40 = vsub.f32 %v8451_v2, %v8620_v44  ;;  %v8636_v52 = vsub.f32 %v8459_v46, %v8620_v44 }
 0x599   : > { %v8644_v26 = vsub.f32 %v8465_v32, %v8620_v44  ;;  %v8650_v47 = vsub.f32 %v8478_v16, %v8620_v44  ;;  %v8658_v28 = vsub.f32 %v8474_v43, %v8620_v44  ;;  %v8665_v22 = vsub.f32 %v8481_v37, %v8620_v44 }
 0x59a   : > { %v3906_v34 = vmul.f32 %v8624_v1, %v8624_v1  ;;  %v3907_v39 = vmul.f32 %v8628_v21, %v8628_v21  ;;  %v3908_v10 = vmul.f32 %v8632_v40, %v8632_v40  ;;  %v3909_v42 = vmul.f32 %v8636_v52, %v8636_v52 }
 0x59b   : > { %v3910_v4 = vmul.f32 %v8644_v26, %v8644_v26  ;;  %v3911_v17 = vmul.f32 %v8650_v47, %v8650_v47  ;;  %v8672_v48 = vsub.f32 %v8489_v12, %v8620_v44  ;;  %v3912_v51 = vmul.f32 %v8658_v28, %v8658_v28 }
 0x59c   : > { %v3938_v57 = vsel %vm967_vm4, %v3906_v34, 0.0  ;;  %v3939_v11 = vsel %vm967_vm4, %v3907_v39, 0.0  ;;  %v3941_v18 = vsel %vm967_vm4, %v3908_v10, 0.0  ;;  %v3943_v13 = vsel %vm967_vm4, %v3909_v42, 0.0 }
 0x59d   : > { %v3940_v6 = vadd.f32 %v3939_v11, %v3938_v57  ;;  %v3945_v33 = vsel %vm967_vm4, %v3910_v4, 0.0  ;;  %v8679_v38 = vsub.f32 %v8502_v23, %v8620_v44  ;;  %v3913_v55 = vmul.f32 %v8665_v22, %v8665_v22 }
 0x59e   : > { %v3947_v54 = vsel %vm967_vm4, %v3911_v17, 0.0  ;;  %v8686_v20 = vsub.f32 %v8498_v24, %v8620_v44  ;;  %v3914_v34 = vmul.f32 %v8672_v48, %v8672_v48  ;;  %v3949_v39 = vsel %vm967_vm4, %v3912_v51, 0.0 }
 0x59f   : > { %v3942_v3 = vadd.f32 %v3941_v18, %v3940_v6  ;;  %v8693_v42 = vsub.f32 %v8506_v9, %v8620_v44  ;;  %v3915_v57 = vmul.f32 %v8679_v38, %v8679_v38  ;;  %v3951_v11 = vsel %vm967_vm4, %v3913_v55, 0.0 }
 0x5a0   : > { %v8700_v4 = vsub.f32 %v8512_v45, %v8620_v44  ;;  %v3916_v18 = vmul.f32 %v8686_v20, %v8686_v20 }
 0x5a1   : > { %v3944_v63 = vadd.f32 %v3943_v13, %v3942_v3  ;;  %v3953_v3 = vsel %vm967_vm4, %v3914_v34, 0.0  ;;  %v8707_v13 = vsub.f32 %v8526_v27, %v8620_v44  ;;  %v3955_v51 = vsel %vm967_vm4, %v3915_v57, 0.0 }
 0x5a2   : > { %10519 = vst [vmem:[#allocation37_spill] sm:$0xff] %v8700_v4  ;;  %v3918_v55 = vmul.f32 %v8700_v4, %v8700_v4  ;;  %v8721_v34 = vsub.f32 %v8530_v29, %v8620_v44 }
 0x5a3   : > { %v3946_v0 = vadd.f32 %v3945_v33, %v3944_v63  ;;  %10520 = vst [vmem:[#allocation38_spill] sm:$0xff] %v8707_v13  ;;  %v3917_v63 = vmul.f32 %v8693_v42, %v8693_v42 }
 0x5a4   : > { %10522 = vst [vmem:[#allocation40_spill] sm:$0xff] %v8721_v34 }
 0x5a5   : > { %v3948_v59 = vadd.f32 %v3947_v54, %v3946_v0  ;;  %v8714_v0 = vsub.f32 %v8522_v60, %v8620_v44  ;;  %v3957_v54 = vsel %vm967_vm4, %v3916_v18, 0.0  ;;  %v3961_v18 = vsel %vm967_vm4, %v3918_v55, 0.0 }
 0x5a7   : > { %v3950_v10 = vadd.f32 %v3949_v39, %v3948_v59  ;;  %10521 = vst [vmem:[#allocation39_spill] sm:$0xff] %v8714_v0  ;;  %v3919_v39 = vmul.f32 %v8707_v13, %v8707_v13 }
 0x5a9   : > { %v3952_v6 = vadd.f32 %v3951_v11, %v3950_v10  ;;  %v3959_v10 = vsel %vm967_vm4, %v3917_v63, 0.0  ;;  %v8728_v11 = vsub.f32 %v8536_v15, %v8620_v44  ;;  %v3963_v63 = vsel %vm967_vm4, %v3919_v39, 0.0 }
 0x5ab   : > { %v3954_v17 = vadd.f32 %v3953_v3, %v3952_v6  ;;  %10523 = vst [vmem:[#allocation41_spill] sm:$0xff] %v8728_v11  ;;  %v3920_v6 = vmul.f32 %v8714_v0, %v8714_v0 }
 0x5ad   : > { %v3956_v33 = vadd.f32 %v3955_v51, %v3954_v17  ;;  %v8735_v17 = vsub.f32 %v8549_v31, %v8620_v44  ;;  %v3921_v51 = vmul.f32 %v8721_v34, %v8721_v34  ;;  %v3965_v55 = vsel %vm967_vm4, %v3920_v6, 0.0 }
 0x5af   : > { %v3958_v59 = vadd.f32 %v3957_v54, %v3956_v33  ;;  %10524 = vst [vmem:[#allocation42_spill] sm:$0xff] %v8735_v17  ;;  %v8742_v54 = vsub.f32 %v8545_v14, %v8620_v44  ;;  %v3967_v39 = vsel %vm967_vm4, %v3921_v51, 0.0 }
 0x5b1   : > { %v3960_v57 = vadd.f32 %v3959_v10, %v3958_v59  ;;  %10525 = vst [vmem:[#allocation43_spill] sm:$0xff] %v8742_v54  ;;  %v3922_v59 = vmul.f32 %v8728_v11, %v8728_v11  ;;  %v3924_v41 = vmul.f32 %v8742_v54, %v8742_v54 }
 0x5b3   : > { %v3962_v3 = vadd.f32 %v3961_v18, %v3960_v57  ;;  %v8749_v57 = vsub.f32 %v8552_v49, %v8620_v44  ;;  %v3923_v18 = vmul.f32 %v8735_v17, %v8735_v17  ;;  %v3969_v6 = vsel %vm967_vm4, %v3922_v59, 0.0 }
 0x5b4   : > { %v3973_v59 = vsel %vm967_vm4, %v3924_v41, 0.0 }
 0x5b5   : > { %v3964_v33 = vadd.f32 %v3963_v63, %v3962_v3  ;;  %10526 = vst [vmem:[#allocation44_spill] sm:$0xff] %v8749_v57  ;;  %v8756_v63 = vsub.f32 %v8558_v7, %v8620_v44  ;;  %v3925_v17 = vmul.f32 %v8749_v57, %v8749_v57  ;;  %v3971_v51 = vsel %vm967_vm4, %v3923_v18, 0.0 }
 0x5b7   : > { %v3966_v10 = vadd.f32 %v3965_v55, %v3964_v33  ;;  %10527 = vst [vmem:[#allocation45_spill] sm:$0xff] %v8756_v63  ;;  %v8763_v55 = vsub.f32 %v8570_v36, %v8620_v44  ;;  %v3926_v54 = vmul.f32 %v8756_v63, %v8756_v63  ;;  %v3975_v18 = vsel %vm967_vm4, %v3925_v17, 0.0 }
 0x5b9   : > { %v3968_v3 = vadd.f32 %v3967_v39, %v3966_v10  ;;  %10528 = vst [vmem:[#allocation46_spill] sm:$0xff] %v8763_v55  ;;  %v8770_v39 = vsub.f32 %v8566_v62, %v8620_v44  ;;  %v3927_v57 = vmul.f32 %v8763_v55, %v8763_v55  ;;  %v3977_v41 = vsel %vm967_vm4, %v3926_v54, 0.0 }
 0x5bb   : > { %v3970_v33 = vadd.f32 %v3969_v6, %v3968_v3  ;;  %10529 = vst [vmem:[#allocation47_spill] sm:$0xff] %v8770_v39  ;;  %v8777_v6 = vsub.f32 %v8573_v35, %v8620_v44  ;;  %v3928_v63 = vmul.f32 %v8770_v39, %v8770_v39  ;;  %v3979_v17 = vsel %vm967_vm4, %v3927_v57, 0.0 }
 0x5bd   : > { %v3972_v10 = vadd.f32 %v3971_v51, %v3970_v33  ;;  %10530 = vst [vmem:[#allocation48_spill] sm:$0xff] %v8777_v6  ;;  %v8784_v51 = vsub.f32 %v8579_v8, %v8620_v44  ;;  %v3929_v55 = vmul.f32 %v8777_v6, %v8777_v6  ;;  %v3981_v54 = vsel %vm967_vm4, %v3928_v63, 0.0 }
 0x5bf   : > { %v3974_v3 = vadd.f32 %v3973_v59, %v3972_v10  ;;  %10531 = vst [vmem:[#allocation49_spill] sm:$0xff] %v8784_v51  ;;  %v8791_v59 = vsub.f32 %v8590_v30, %v8620_v44  ;;  %v3930_v39 = vmul.f32 %v8784_v51, %v8784_v51  ;;  %v3983_v57 = vsel %vm967_vm4, %v3929_v55, 0.0 }
 0x5c0   : > { %v8815_v51 = vsub.f32 %v8599_v58, %v8620_v44  ;;  %v8823_v55 = vsub.f32 %v8610_v19, %v8620_v44  ;;  %v8838_v19 = vsub.f32 %v8612_v61, %v8620_v44 }
 0x5c1   : > { %v3976_v33 = vadd.f32 %v3975_v18, %v3974_v3  ;;  %10532 = vst [vmem:[#allocation50_spill] sm:$0xff] %v8791_v59  ;;  %v8798_v18 = vsub.f32 %v8586_v25, %v8620_v44  ;;  %v3931_v6 = vmul.f32 %v8791_v59, %v8791_v59 }
 0x5c2   : > { %10535 = vst [vmem:[#allocation53_spill] sm:$0xff] %v8815_v51 }
 0x5c3   : > { %v3978_v10 = vadd.f32 %v3977_v41, %v3976_v33  ;;  %10533 = vst [vmem:[#allocation51_spill] sm:$0xff] %v8798_v18  ;;  %v8805_v41 = vsub.f32 %v8593_v50, %v8620_v44  ;;  %v3932_v63 = vmul.f32 %v8798_v18, %v8798_v18  ;;  %v8831_v18 = vsub.f32 %v8606_v53, %v8620_v44 }
 0x5c5   : > { %v3980_v3 = vadd.f32 %v3979_v17, %v3978_v10  ;;  %10534 = vst [vmem:[#allocation52_spill] sm:$0xff] %v8805_v41  ;;  %v6523_v17 = vld [vmem:[%s10238_s16 + $0x8] sm:$0x3f]   ;;  %10536 = vst [vmem:[#allocation54_spill] sm:$0xff] %v8831_v18 }
 0x5c6   : > { %6443 = vmatprep.subr.msk.bf16.mxu0 %vm4793_vm14, %v6523_v17  ;;  %v4795_v11 = vsel %vm4793_vm14, %v6523_v17, 0 }
 0x5c7   : > { %v3982_v33 = vadd.f32 %v3981_v54, %v3980_v3  ;;  %v3985_v3 = vsel %vm967_vm4, %v3930_v39, 0.0  ;;  %v3934_v39 = vmul.f32 %v8815_v51, %v8815_v51  ;;  %6342 = vmatpush3.bf16.msra.mxu0 %v4795_v11  ;;  %v3937_v11 = vmul.f32 %v8838_v19, %v8838_v19 }
 0x5c9   : > { %v3984_v10 = vadd.f32 %v3983_v57, %v3982_v33  ;;  %v3933_v33 = vmul.f32 %v8805_v41, %v8805_v41  ;;  %v3987_v57 = vsel %vm967_vm4, %v3931_v6, 0.0  ;;  %v3935_v6 = vmul.f32 %v8823_v55, %v8823_v55 }
 0x5ca   : > { %v3993_v41 = vsel %vm967_vm4, %v3934_v39, 0.0  ;;  %v3999_v34 = vsel %vm967_vm4, %v3937_v11, 0.0 }
 0x5cb   : > { %v3986_v54 = vadd.f32 %v3985_v3, %v3984_v10  ;;  %v3989_v10 = vsel %vm967_vm4, %v3932_v63, 0.0  ;;  %v3991_v17 = vsel %vm967_vm4, %v3933_v33, 0.0 }
 0x5cd   : > { %v3988_v59 = vadd.f32 %v3987_v57, %v3986_v54  ;;  %v3936_v57 = vmul.f32 %v8831_v18, %v8831_v18 }
 0x5cf   : > { %v3990_v3 = vadd.f32 %v3989_v10, %v3988_v59  ;;  %v3995_v59 = vsel %vm967_vm4, %v3935_v6, 0.0  ;;  %v3997_v44 = vsel %vm967_vm4, %v3936_v57, 0.0  ;;  %v8859_v57 = vpop.permute.xlu1 %4167 }
 0x5d0   : > { %10538 = vst [vmem:[#allocation56_spill] sm:$0xff] %v8859_v57 }
 0x5d1   : > { %v3992_v54 = vadd.f32 %v3991_v17, %v3990_v3 }
 0x5d3   : > { %v3994_v51 = vadd.f32 %v3993_v41, %v3992_v54  ;;  %v8851_v41 = vpop.permute.xlu0 %4126 }
 0x5d4   : > { %10537 = vst [vmem:[#allocation55_spill] sm:$0xff] %v8851_v41  ;;  %v4132_v6 = vmul.f32 %v8851_v41, %v8459_v46  ;;  %v4134_v11 = vmul.f32 %v8851_v41, %v8478_v16  ;;  %v10549_v16 = vld [vmem:[#allocation37_spill] sm:$0xff]  ;;  %v10551_v46 = vld [vmem:[#allocation39_spill] sm:$0xff] }
 0x5d5   : > { %v3996_v63 = vadd.f32 %v3995_v59, %v3994_v51  ;;  %v4131_v51 = vmul.f32 %v8851_v41, %v8451_v2  ;;  %v4139_v59 = vmul.f32 %v8851_v41, %v8498_v24  ;;  %v10550_v2 = vld [vmem:[#allocation38_spill] sm:$0xff] }
 0x5d7   : > { %v3998_v10 = vadd.f32 %v3997_v44, %v3996_v63  ;;  %v4137_v63 = vmul.f32 %v8851_v41, %v8489_v12  ;;  %v4140_v44 = vmul.f32 %v8851_v41, %v8506_v9 }
 0x5d9   : > { %v4000_v0 = vadd.f32 %v3999_v34, %v3998_v10  ;;  %v4129_v34 = vmul.f32 %v8851_v41, %v8449_v56  ;;  %v4138_v10 = vmul.f32 %v8851_v41, %v8502_v23  ;;  %v10552_v56 = vld [vmem:[#allocation40_spill] sm:$0xff] }
 0x5db   : > { %v4001_v33 = vrot.slane %v4000_v0, 4 }
 0x5dd   : > { %v4002_v3 = vadd.f32 %v4001_v33, %v4000_v0  ;;  %v4130_v0 = vmul.f32 %v8851_v41, %v8453_v5  ;;  %v8880_v33 = vadd.f32 %v8859_v57, %v4132_v6  ;;  %v8901_v6 = vadd.f32 %v8859_v57, %v4134_v11  ;;  %v10553_v5 = vld [vmem:[#allocation41_spill] sm:$0xff] }
 0x5de   : > { %v4144_v11 = vmul.f32 %v8851_v41, %v8530_v29  ;;  %v4149_v29 = vmul.f32 %v8851_v41, %v8558_v7 }
 0x5df   : > { %v4003_v17 = vrot.slane %v4002_v3, 2 }
 0x5e0   : > { %v8950_v7 = vadd.f32 %v8859_v57, %v4144_v11 }
 0x5e1   : > { %v4004_v13 = vadd.f32 %v4003_v17, %v4002_v3  ;;  %v8883_v3 = vadd.f32 %v8859_v57, %v4131_v51  ;;  %v8886_v17 = vadd.f32 %v8859_v57, %v4129_v34  ;;  %v8904_v51 = vadd.f32 %v8859_v57, %v4139_v59 }
 0x5e2   : > { %v8907_v34 = vadd.f32 %v8859_v57, %v4137_v63  ;;  %v4142_v59 = vmul.f32 %v8851_v41, %v8526_v27  ;;  %v4147_v63 = vmul.f32 %v8851_v41, %v8545_v14  ;;  %v4152_v27 = vmul.f32 %v8851_v41, %v8573_v35 }
 0x5e3   : > { %v4005_v18 = vrot.slane %v4004_v13, 1  ;;  %v4156_v35 = vmul.f32 %v8851_v41, %v8593_v50  ;;  %v8971_v50 = vld [vmem:[%s10232_s10] ss:$0 sm:$0xff] }
 0x5e5   : > { %v4006_v4 = vadd.f32 %v4005_v18, %v4004_v13  ;;  %v4133_v13 = vmul.f32 %v8851_v41, %v8465_v32  ;;  %v4136_v18 = vmul.f32 %v8851_v41, %v8481_v37 }
 0x5e7   : > { %v4007_v39 = vmul.f32 0.00390625, %v4006_v4  ;;  %v4135_v4 = vmul.f32 %v8851_v41, %v8474_v43  ;;  %v8895_v24 = vadd.f32 %v8859_v57, %v4133_v13  ;;  %v8898_v9 = vadd.f32 %v8859_v57, %v4136_v18 }
 0x5e8   : > { %v8915_v13 = vadd.f32 %v8859_v57, %v4138_v10  ;;  %v4141_v18 = vmul.f32 %v8851_v41, %v8512_v45  ;;  %v4146_v10 = vmul.f32 %v8851_v41, %v8549_v31  ;;  %v4151_v45 = vmul.f32 %v8851_v41, %v8566_v62 }
 0x5e9   : > { %v4008_v54 = vadd.f32 1e-05, %v4007_v39  ;;  %v8889_v39 = vadd.f32 %v8859_v57, %v4130_v0  ;;  %v4143_v0 = vmul.f32 %v8851_v41, %v8522_v60  ;;  %v4145_v60 = vmul.f32 %v8851_v41, %v8536_v15 }
 0x5ea   : > { %v4150_v15 = vmul.f32 %v8851_v41, %v8570_v36  ;;  %v4153_v31 = vmul.f32 %v8851_v41, %v8579_v8  ;;  %v8947_v62 = vadd.f32 %v8859_v57, %v4141_v18  ;;  %v8957_v36 = vadd.f32 %v8859_v57, %v4142_v59 }
 0x5eb   : > { %6690 = vrsqrt.f32 %v4008_v54  ;;  %v8892_v54 = vadd.f32 %v8859_v57, %v4135_v4  ;;  %v8912_v4 = vadd.f32 %v8859_v57, %v4140_v44  ;;  %v4148_v44 = vmul.f32 %v8851_v41, %v8552_v49 }
 0x5ec   : > { %v8938_v14 = vadd.f32 %v8859_v57, %v4143_v0  ;;  %v4155_v49 = vmul.f32 %v8851_v41, %v8586_v25  ;;  %v4154_v0 = vmul.f32 %v8851_v41, %v8590_v30  ;;  %v8960_v25 = vadd.f32 %v8859_v57, %v4147_v63 }
 0x5ed   : > { %v8963_v8 = vadd.f32 %v8859_v57, %v4145_v60  ;;  %v8966_v18 = vadd.f32 %v8859_v57, %v4148_v44  ;;  %v8974_v30 = vadd.f32 %v8859_v57, %v4146_v10  ;;  %v8977_v59 = vadd.f32 %v8859_v57, %v4151_v45 }
 0x5ee   : > { %v8980_v63 = vadd.f32 %v8859_v57, %v4149_v29  ;;  %v8983_v60 = vadd.f32 %v8859_v57, %v4152_v27  ;;  %v8986_v44 = vadd.f32 %v8859_v57, %v4150_v15  ;;  %v8989_v12 = vadd.f32 %v8859_v57, %v4155_v49 }
 0x5ef   : > { %v8992_v23 = vadd.f32 %v8859_v57, %v4153_v31  ;;  %v8996_v45 = vadd.f32 %v8859_v57, %v4156_v35  ;;  %v8999_v29 = vadd.f32 %v8859_v57, %v4154_v0  ;;  %v9003_v27 = vmul.f32 %v8851_v41, %v8606_v53 }
 0x5f0   : > { %10539 = vst [vmem:[#allocation57_spill] sm:$0xff] %v8980_v63  ;;  %10540 = vst [vmem:[#allocation58_spill] sm:$0xff] %v8986_v44  ;;  %v9007_v15 = vmul.f32 %v8851_v41, %v8599_v58  ;;  %v9011_v31 = vmul.f32 %v8851_v41, %v8612_v61 }
 0x5f1   : > { %10541 = vst [vmem:[#allocation59_spill] sm:$0xff] %v8989_v12  ;;  %10542 = vst [vmem:[#allocation60_spill] sm:$0xff] %v8992_v23  ;;  %v10556_v23 = vld [vmem:[#allocation44_spill] sm:$0xff] }
 0x5f2   : > { %10543 = vst [vmem:[#allocation61_spill] sm:$0xff] %v8996_v45  ;;  %10544 = vst [vmem:[#allocation62_spill] sm:$0xff] %v8999_v29  ;;  %v10555_v29 = vld [vmem:[#allocation43_spill] sm:$0xff]  ;;  %v10565_v12 = vld [vmem:[#allocation52_spill] sm:$0xff] }
 0x5f3   : > { %10545 = vst [vmem:[#allocation63_spill] sm:$0xff] %v9003_v27  ;;  %10546 = vst [vmem:[#allocation64_spill] sm:$0xff] %v9007_v15  ;;  %v10558_v15 = vld [vmem:[#allocation46_spill] sm:$0xff]  ;;  %v10564_v27 = vld [vmem:[#allocation51_spill] sm:$0xff] }
 0x5f4   : > { %10547 = vst [vmem:[#allocation65_spill] sm:$0xff] %v9011_v31  ;;  %v10557_v31 = vld [vmem:[#allocation45_spill] sm:$0xff] }
 0x5f8   : > { %v6691_v11 = vpop.eup %6690 }
 0x5f9   : > { %v4039_v10 = vmul.f32 %v6691_v11, %v8823_v55  ;;  %v4010_v35 = vmul.f32 %v6691_v11, %v8624_v1  ;;  %v4011_v55 = vmul.f32 %v6691_v11, %v8628_v21  ;;  %v4012_v0 = vmul.f32 %v6691_v11, %v8632_v40 }
 0x5fa   : > { %v4013_v53 = vmul.f32 %v6691_v11, %v8636_v52  ;;  %v4014_v43 = vmul.f32 %v6691_v11, %v8644_v26  ;;  %v4015_v58 = vmul.f32 %v6691_v11, %v8650_v47  ;;  %v4016_v37 = vmul.f32 %v6691_v11, %v8658_v28 }
 0x5fb   : > { %v9014_v49 = vmul.f32 %v8971_v50, %v4039_v10  ;;  %v4017_v61 = vmul.f32 %v6691_v11, %v8665_v22  ;;  %v4018_v32 = vmul.f32 %v6691_v11, %v8672_v48  ;;  %v4019_v10 = vmul.f32 %v6691_v11, %v8679_v38 }
 0x5fc   : > { %v4020_v1 = vmul.f32 %v6691_v11, %v8686_v20  ;;  %v4021_v21 = vmul.f32 %v6691_v11, %v8693_v42  ;;  %v4022_v40 = vmul.f32 %v6691_v11, %v10549_v16  ;;  %v4023_v52 = vmul.f32 %v6691_v11, %v10550_v2  ;;  %v9041_v2 = vld [vmem:[%s10233_s11] ss:$0 sm:$0xff] }
 0x5fd   : > { %10548 = vst [vmem:[#allocation66_spill] sm:$0xff] %v9014_v49  ;;  %v4024_v26 = vmul.f32 %v6691_v11, %v10551_v46  ;;  %v4025_v47 = vmul.f32 %v6691_v11, %v10552_v56  ;;  %v4026_v28 = vmul.f32 %v6691_v11, %v10553_v5  ;;  %v10554_v49 = vld [vmem:[#allocation42_spill] sm:$0xff]  ;;  %v4028_v48 = vmul.f32 %v6691_v11, %v10555_v29  ;;  %v10559_v46 = vld [vmem:[#allocation47_spill] sm:$0xff]  ;;  %v10560_v56 = vld [vmem:[#allocation48_spill] sm:$0xff] }
 0x5fe   : > { %v4027_v22 = vmul.f32 %v6691_v11, %v10554_v49  ;;  %v4029_v38 = vmul.f32 %v6691_v11, %v10556_v23  ;;  %v4030_v20 = vmul.f32 %v6691_v11, %v10557_v31  ;;  %v4031_v42 = vmul.f32 %v6691_v11, %v10558_v15  ;;  %v10561_v23 = vld [vmem:[#allocation49_spill] sm:$0xff]  ;;  %v10562_v31 = vld [vmem:[#allocation50_spill] sm:$0xff] }
 0x5ff   : > { %v9044_v16 = vmul.f32 %v6691_v11, %v10559_v46  ;;  %v9047_v5 = vmul.f32 %v6691_v11, %v10560_v56  ;;  %v4051_v49 = vmul.f32 %v8971_v50, %v4012_v0  ;;  %v4052_v29 = vmul.f32 %v8971_v50, %v4013_v53  ;;  %v10566_v46 = vld [vmem:[#allocation53_spill] sm:$0xff]  ;;  %v10567_v56 = vld [vmem:[#allocation54_spill] sm:$0xff] }
 0x600   : > { %v9052_v57 = vmul.f32 %v6691_v11, %v10561_v23  ;;  %v9055_v15 = vmul.f32 %v6691_v11, %v10562_v31  ;;  %v9058_v45 = vmul.f32 %v6691_v11, %v10564_v27  ;;  %v9061_v41 = vmul.f32 %v6691_v11, %v10565_v12 }
 0x601   : > { %v4038_v44 = vmul.f32 %v6691_v11, %v10566_v46  ;;  %v9065_v63 = vmul.f32 %v6691_v11, %v10567_v56  ;;  %v4090_v0 = vadd.f32 %v9041_v2, %v4051_v49  ;;  %v4091_v53 = vadd.f32 %v9041_v2, %v4052_v29 }
 0x602   : > { %10563 = vst [vmem:[#allocation37_spill] sm:$0xff] %v9055_v15  ;;  %v9070_v23 = vmul.f32 %v6691_v11, %v8838_v19  ;;  %v4049_v31 = vmul.f32 %v8971_v50, %v4010_v35  ;;  %v4050_v27 = vmul.f32 %v8971_v50, %v4011_v55  ;;  %v4053_v15 = vmul.f32 %v8971_v50, %v4014_v43  ;;  %v9084_v19 = vld [vmem:[%s10238_s16] sm:$0x3f]  }
 0x603   : > { %v4204_v12 = vsel %vm967_vm4, %v4090_v0, %v8883_v3  ;;  %v4205_v46 = vsel %vm967_vm4, %v4091_v53, %v8880_v33  ;;  %v4054_v56 = vmul.f32 %v8971_v50, %v4015_v58  ;;  %v4055_v49 = vmul.f32 %v8971_v50, %v4016_v37  ;;  %6444 = vmatprep.subr.msk.bf16.mxu1 %vm4793_vm14, %v9084_v19 }
 0x604   : > { %v4236_v11 = vmax.f32 %v4204_v12, 0.0  ;;  %v4237_v35 = vmax.f32 %v4205_v46, 0.0  ;;  %v4056_v55 = vmul.f32 %v8971_v50, %v4017_v61  ;;  %v4057_v43 = vmul.f32 %v8971_v50, %v4018_v32 }
 0x605   : > { %v4058_v3 = vmul.f32 %v8971_v50, %v4019_v10  ;;  %v4059_v29 = vmul.f32 %v8971_v50, %v4020_v1  ;;  %v4060_v33 = vmul.f32 %v8971_v50, %v4021_v21  ;;  %v9092_v58 = vmul.f32 %v8971_v50, %v4022_v40 }
 0x606   : > { %v9096_v37 = vpack.c.bf16 %v4237_v35, %v4236_v11  ;;  %v9099_v0 = vmul.f32 %v8971_v50, %v4023_v52  ;;  %v4063_v61 = vmul.f32 %v8971_v50, %v4024_v26  ;;  %v9103_v32 = vmul.f32 %v8971_v50, %v4025_v47 }
 0x607   : > { %v9106_v10 = vmul.f32 %v8971_v50, %v4026_v28  ;;  %v9109_v1 = vmul.f32 %v8971_v50, %v4027_v22  ;;  %v9112_v21 = vmul.f32 %v8971_v50, %v4028_v48  ;;  %v9115_v40 = vmul.f32 %v8971_v50, %v4029_v38 }
 0x608   : > { %4590 = vrot.lane.b32.xlu1 %v9096_v37, %s6710_s2  ;;  %v9120_v52 = vmul.f32 %v8971_v50, %v4030_v20  ;;  %v9123_v26 = vmul.f32 %v8971_v50, %v4031_v42  ;;  %v9126_v47 = vmul.f32 %v8971_v50, %v4038_v44  ;;  %v4088_v28 = vadd.f32 %v9041_v2, %v4049_v31 }
 0x609   : > { %v4089_v22 = vadd.f32 %v9041_v2, %v4050_v27  ;;  %v4372_v48 = vshrl.u32 %v9096_v37, 16  ;;  %v4375_v38 = vshll.u32 %v9096_v37, 16  ;;  %v4094_v53 = vadd.f32 %v9041_v2, %v4055_v49 }
 0x60a   : > { %v4202_v20 = vsel %vm967_vm4, %v4088_v28, %v8886_v17  ;;  %v4095_v12 = vadd.f32 %v9041_v2, %v4056_v55  ;;  %v4092_v42 = vadd.f32 %v9041_v2, %v4053_v15  ;;  %v4093_v44 = vadd.f32 %v9041_v2, %v4054_v56  ;;  %v9147_v17 = vld [vmem:[%s10238_s16 + $0x10] sm:$0x3f]  }
 0x60b   : > { %v4203_v31 = vsel %vm967_vm4, %v4089_v22, %v8889_v39  ;;  %v4234_v46 = vmax.f32 %v4202_v20, 0.0  ;;  %v4510_v27 = vrot.slane %v4375_v38, 1  ;;  %v4208_v11 = vsel %vm967_vm4, %v4094_v53, %v8892_v54  ;;  %6445 = vmatprep.subr.msk.bf16.mxu0 %vm4793_vm14, %v9147_v17 }
 0x60c   : > { %v4235_v49 = vmax.f32 %v4203_v31, 0.0  ;;  %v4209_v15 = vsel %vm967_vm4, %v4095_v12, %v8898_v9  ;;  %v4240_v56 = vmax.f32 %v4208_v11, 0.0  ;;  %v4206_v39 = vsel %vm967_vm4, %v4092_v42, %v8895_v24 }
 0x60d   : > { %v4511_v35 = vor.u32 %v4510_v27, %v4372_v48  ;;  %v4241_v55 = vmax.f32 %v4209_v15, 0.0  ;;  %v4207_v54 = vsel %vm967_vm4, %v4093_v44, %v8901_v6  ;;  %v4238_v28 = vmax.f32 %v4206_v39, 0.0 }
 0x60e   : > { %v9159_v22 = vpack.c.bf16 %v4235_v49, %v4234_v46  ;;  %v4239_v53 = vmax.f32 %v4207_v54, 0.0  ;;  %v4098_v9 = vadd.f32 %v9041_v2, %v4059_v29  ;;  %v4099_v20 = vadd.f32 %v9041_v2, %v4060_v33 }
 0x60f   : > { %v4557_v24 = vsel %vm7423_vm7, %v4511_v35, 0  ;;  %v9165_v42 = vpack.c.bf16 %v4241_v55, %v4240_v56  ;;  %v4096_v31 = vadd.f32 %v9041_v2, %v4057_v43  ;;  %v4097_v6 = vadd.f32 %v9041_v2, %v4058_v3 }
 0x610   : > { %v9171_v44 = vmul.f32 %v8971_v50, %v9044_v16  ;;  %4588 = vrot.lane.b32.xlu0 %v9159_v22, %s6710_s2  ;;  %4638 = vrot.lane.b32.xlu1 %v4557_v24, %s6711_s8  ;;  %v4368_v29 = vshll.u32 %v9159_v22, 16  ;;  %v9177_v33 = vpack.c.bf16 %v4239_v53, %v4238_v28  ;;  %v4212_v46 = vsel %vm967_vm4, %v4098_v9, %v8904_v51 }
 0x611   : > { %v4365_v43 = vshrl.u32 %v9159_v22, 16  ;;  %v4389_v3 = vshll.u32 %v9165_v42, 16  ;;  %v4213_v16 = vsel %vm967_vm4, %v4099_v20, %v8912_v4  ;;  %v4244_v27 = vmax.f32 %v4212_v46, 0.0 }
 0x612   : > { %v4508_v11 = vrot.slane %v4368_v29, 1  ;;  %v4386_v49 = vshrl.u32 %v9165_v42, 16  ;;  %v4382_v15 = vshll.u32 %v9177_v33, 16  ;;  %v4245_v56 = vmax.f32 %v4213_v16, 0.0 }
 0x613   : > { %v4514_v39 = vrot.slane %v4389_v3, 1  ;;  %v4210_v51 = vsel %vm967_vm4, %v4096_v31, %v8907_v34  ;;  %v4211_v35 = vsel %vm967_vm4, %v4097_v6, %v8915_v13  ;;  %v4102_v4 = vadd.f32 %v9041_v2, %v4063_v61 }
 0x614   : > { %v4509_v55 = vor.u32 %v4508_v11, %v4365_v43  ;;  %4594 = vrot.lane.b32.xlu1 %v9165_v42, %s6710_s2  ;;  %v4512_v54 = vrot.slane %v4382_v15, 1  ;;  %v9202_v28 = vpack.c.bf16 %v4245_v56, %v4244_v27  ;;  %v4242_v53 = vmax.f32 %v4210_v51, 0.0 }
 0x615   : > { %v4515_v34 = vor.u32 %v4514_v39, %v4386_v49  ;;  %v4243_v9 = vmax.f32 %v4211_v35, 0.0  ;;  %v4103_v13 = vadd.f32 %v9041_v2, %v9103_v32  ;;  %v4216_v61 = vsel %vm967_vm4, %v4102_v4, %v8938_v14 }
 0x616   : > { %v4072_v20 = vmul.f32 %v8971_v50, %v9047_v5  ;;  %v4556_v24 = vsel %vm7423_vm7, %v4509_v55, 0  ;;  %v4379_v31 = vshrl.u32 %v9177_v33, 16  ;;  %v4403_v6 = vshll.u32 %v9202_v28, 16 }
 0x617   : > { %4636 = vrot.lane.b32.xlu0 %v4556_v24, %s6711_s8  ;;  %v4559_v46 = vsel %vm7423_vm7, %v4515_v34, 0  ;;  %v9219_v16 = vpack.c.bf16 %v4243_v9, %v4242_v53  ;;  %v4217_v14 = vsel %vm967_vm4, %v4103_v13, %v8950_v7  ;;  %v4248_v32 = vmax.f32 %v4216_v61, 0.0 }
 0x618   : > { %4642 = vrot.lane.b32.xlu1 %v4559_v46, %s6711_s8  ;;  %v4513_v5 = vor.u32 %v4512_v54, %v4379_v31  ;;  %v4518_v27 = vrot.slane %v4403_v6, 1  ;;  %v4249_v11 = vmax.f32 %v4217_v14, 0.0  ;;  %v4100_v56 = vadd.f32 %v9041_v2, %v9092_v58 }
 0x619   : > { %v4400_v39 = vshrl.u32 %v9202_v28, 16  ;;  %v4396_v51 = vshll.u32 %v9219_v16, 16  ;;  %v4101_v7 = vadd.f32 %v9041_v2, %v9099_v0  ;;  %v4106_v35 = vadd.f32 %v9041_v2, %v9112_v21 }
 0x61a   : > { %v4075_v4 = vmul.f32 %v8971_v50, %v9058_v45  ;;  %v9238_v55 = vpack.c.bf16 %v4249_v11, %v4248_v32  ;;  %v4214_v54 = vsel %vm967_vm4, %v4100_v56, %v8947_v62  ;;  %v4107_v58 = vadd.f32 %v9041_v2, %v9115_v40 }
 0x61b   : > { %4592 = vrot.lane.b32.xlu0 %v9177_v33, %s6710_s2  ;;  %v4519_v0 = vor.u32 %v4518_v27, %v4400_v39  ;;  %v4215_v21 = vsel %vm967_vm4, %v4101_v7, %v8957_v36  ;;  %v4246_v53 = vmax.f32 %v4214_v54, 0.0  ;;  %v4220_v45 = vsel %vm967_vm4, %v4106_v35, %v8960_v25 }
 0x61c   : > { %v4558_v34 = vsel %vm7423_vm7, %v4513_v5, 0  ;;  %4598 = vrot.lane.b32.xlu1 %v9202_v28, %s6710_s2  ;;  %v4516_v62 = vrot.slane %v4396_v51, 1  ;;  %v4247_v40 = vmax.f32 %v4215_v21, 0.0  ;;  %v4417_v9 = vshll.u32 %v9238_v55, 16 }
 0x61d   : > { %v4393_v13 = vshrl.u32 %v9219_v16, 16  ;;  %v4221_v36 = vsel %vm967_vm4, %v4107_v58, %v8966_v18  ;;  %v4252_v61 = vmax.f32 %v4220_v45, 0.0  ;;  %v4104_v25 = vadd.f32 %v9041_v2, %v9106_v10  ;;  %v10569_v45 = vld [vmem:[#allocation37_spill] sm:$0xff] }
 0x61e   : > { %v9264_v24 = vpack.c.bf16 %v4247_v40, %v4246_v53  ;;  %v4522_v46 = vrot.slane %v4417_v9, 1  ;;  %v4253_v14 = vmax.f32 %v4221_v36, 0.0  ;;  %v4105_v32 = vadd.f32 %v9041_v2, %v9109_v1  ;;  %v10570_v36 = vld [vmem:[#allocation57_spill] sm:$0xff] }
 0x61f   : > { %4640 = vrot.lane.b32.xlu0 %v4558_v34, %s6711_s8  ;;  %v4561_v5 = vsel %vm7423_vm7, %v4519_v0, 0  ;;  %v4218_v18 = vsel %vm967_vm4, %v4104_v25, %v8963_v8  ;;  %v4110_v10 = vadd.f32 %v9041_v2, %v9171_v44  ;;  %v4111_v27 = vadd.f32 %v9041_v2, %v4072_v20 }
 0x620   : > { %v4076_v11 = vmul.f32 %v8971_v50, %v9061_v41  ;;  %4646 = vrot.lane.b32.xlu1 %v4561_v5, %s6711_s8  ;;  %v4517_v1 = vor.u32 %v4516_v62, %v4393_v13  ;;  %v4414_v56 = vshrl.u32 %v9238_v55, 16  ;;  %v9284_v7 = vpack.c.bf16 %v4253_v14, %v4252_v61  ;;  %v10571_v14 = vld [vmem:[#allocation58_spill] sm:$0xff] }
 0x621   : > { %v4410_v35 = vshll.u32 %v9264_v24, 16  ;;  %v4219_v8 = vsel %vm967_vm4, %v4105_v32, %v8974_v30  ;;  %v4224_v44 = vsel %vm967_vm4, %v4110_v10, %v8977_v59  ;;  %v4225_v41 = vsel %vm967_vm4, %v4111_v27, %v8983_v60  ;;  %v10572_v27 = vld [vmem:[#allocation35_spill] sm:$0xff] }
 0x622   : > { %v4073_v20 = vmul.f32 %v8971_v50, %v9052_v57  ;;  %v4523_v54 = vor.u32 %v4522_v46, %v4414_v56  ;;  %v4250_v58 = vmax.f32 %v4218_v18, 0.0  ;;  %v4251_v0 = vmax.f32 %v4219_v8, 0.0 }
 0x623   : > { %4596 = vrot.lane.b32.xlu0 %v9219_v16, %s6710_s2  ;;  %v4431_v21 = vshll.u32 %v9284_v7, 16  ;;  %v4256_v30 = vmax.f32 %v4224_v44, 0.0  ;;  %v4257_v53 = vmax.f32 %v4225_v41, 0.0  ;;  %v4108_v59 = vadd.f32 %v9041_v2, %v9120_v52  ;;  %v10574_v44 = vld [vmem:[#allocation59_spill] sm:$0xff] }
 0x624   : > { %v4074_v60 = vmul.f32 %v8971_v50, %v10569_v45  ;;  %v4079_v57 = vmul.f32 %v8971_v50, %v9065_v63  ;;  %4602 = vrot.lane.b32.xlu1 %v9238_v55, %s6710_s2  ;;  %v4109_v34 = vadd.f32 %v9041_v2, %v9123_v26  ;;  %v4114_v62 = vadd.f32 %v9041_v2, %v4075_v4 }
 0x625   : > { %v4560_v40 = vsel %vm7423_vm7, %v4517_v1, 0  ;;  %v4520_v52 = vrot.slane %v4410_v35, 1  ;;  %v4222_v61 = vsel %vm967_vm4, %v4108_v59, %v10570_v36  ;;  %v4115_v25 = vadd.f32 %v9041_v2, %v4076_v11  ;;  %v10573_v11 = vld [vmem:[#allocation55_spill] sm:$0xff] }
 0x626   : > { %v4407_v63 = vshrl.u32 %v9264_v24, 16  ;;  %v9319_v46 = vpack.c.bf16 %v4251_v0, %v4250_v58  ;;  %v4526_v26 = vrot.slane %v4431_v21, 1  ;;  %v4223_v4 = vsel %vm967_vm4, %v4109_v34, %v10571_v14  ;;  %v10575_v58 = vld [vmem:[#allocation61_spill] sm:$0xff]  ;;  %v10576_v36 = vld [vmem:[#allocation63_spill] sm:$0xff]  ;;  %v10578_v14 = vld [vmem:[#allocation64_spill] sm:$0xff] }
 0x627   : > { %4644 = vrot.lane.b32.xlu0 %v4560_v40, %s6711_s8  ;;  %v4563_v32 = vsel %vm7423_vm7, %v4523_v54, 0  ;;  %v9328_v5 = vpack.c.bf16 %v4257_v53, %v4256_v30  ;;  %v4254_v18 = vmax.f32 %v4222_v61, 0.0  ;;  %v4255_v10 = vmax.f32 %v4223_v4, 0.0  ;;  %v10577_v61 = vld [vmem:[#allocation56_spill] sm:$0xff]  ;;  %v10579_v4 = vld [vmem:[#allocation65_spill] sm:$0xff] }
 0x628   : > { %v4158_v1 = vmul.f32 %v10573_v11, %v10572_v27  ;;  %4650 = vrot.lane.b32.xlu1 %v4563_v32, %s6711_s8  ;;  %v4428_v8 = vshrl.u32 %v9284_v7, 16  ;;  %v4228_v41 = vsel %vm967_vm4, %v4114_v62, %v10574_v44  ;;  %v4229_v0 = vsel %vm967_vm4, %v4115_v25, %v10575_v58  ;;  %v10580_v32 = vld [vmem:[#allocation60_spill] sm:$0xff]  ;;  %v10581_v44 = vld [vmem:[#allocation62_spill] sm:$0xff] }
 0x629   : > { %v4080_v54 = vmul.f32 %v8971_v50, %v9070_v23  ;;  %v4521_v30 = vor.u32 %v4520_v52, %v4407_v63  ;;  %v4260_v53 = vmax.f32 %v4228_v41, 0.0  ;;  %v4261_v59 = vmax.f32 %v4229_v0, 0.0 }
 0x62a   : > { %v4527_v45 = vor.u32 %v4526_v26, %v4428_v8  ;;  %v4424_v34 = vshll.u32 %v9319_v46, 16  ;;  %v4112_v40 = vadd.f32 %v9041_v2, %v4073_v20  ;;  %v4113_v62 = vadd.f32 %v9041_v2, %v4074_v60 }
 0x62b   : > { %v4200_v25 = vadd.f32 %v10577_v61, %v10576_v36  ;;  %4600 = vrot.lane.b32.xlu0 %v9264_v24, %s6710_s2  ;;  %v9351_v50 = vpack.c.bf16 %v4255_v10, %v4254_v18  ;;  %v4445_v23 = vshll.u32 %v9328_v5, 16  ;;  %v4118_v52 = vadd.f32 %v9041_v2, %v4079_v57 }
 0x62c   : > { %v4198_v26 = vadd.f32 %v10577_v61, %v10578_v14  ;;  %v4201_v20 = vadd.f32 %v10577_v61, %v10579_v4  ;;  %v4199_v60 = vadd.f32 %v10577_v61, %v4158_v1  ;;  %4606 = vrot.lane.b32.xlu1 %v9284_v7, %s6710_s2  ;;  %v4226_v11 = vsel %vm967_vm4, %v4112_v40, %v10580_v32  ;;  %v10582_v61 = vld [vmem:[#allocation66_spill] sm:$0xff] }
 0x62d   : > { %v4562_v18 = vsel %vm7423_vm7, %v4521_v30, 0  ;;  %v4421_v10 = vshrl.u32 %v9319_v46, 16  ;;  %v9367_v57 = vpack.c.bf16 %v4261_v59, %v4260_v53  ;;  %v4227_v41 = vsel %vm967_vm4, %v4113_v62, %v10581_v44 }
 0x62e   : > { %v4565_v58 = vsel %vm7423_vm7, %v4527_v45, 0  ;;  %v4524_v1 = vrot.slane %v4424_v34, 1  ;;  %v4119_v0 = vadd.f32 %v9041_v2, %v4080_v54  ;;  %v4232_v40 = vsel %vm967_vm4, %v4118_v52, %v4200_v25 }
 0x62f   : > { %4648 = vrot.lane.b32.xlu0 %v4562_v18, %s6711_s8  ;;  %v4530_v30 = vrot.slane %v4445_v23, 1  ;;  %v4438_v53 = vshll.u32 %v9351_v50, 16  ;;  %v4258_v59 = vmax.f32 %v4226_v11, 0.0  ;;  %v4116_v62 = vadd.f32 %v9041_v2, %v9126_v47 }
 0x630   : > { %4654 = vrot.lane.b32.xlu1 %v4565_v58, %s6711_s8  ;;  %v4259_v45 = vmax.f32 %v4227_v41, 0.0  ;;  %v4233_v36 = vsel %vm967_vm4, %v4119_v0, %v4201_v20  ;;  %v4117_v54 = vadd.f32 %v9041_v2, %v10582_v61  ;;  %v4374_v25 = vrot.slane %v4372_v48, 7 }
 0x631   : > { %v4442_v52 = vshrl.u32 %v9328_v5, 16  ;;  %v4459_v14 = vshll.u32 %v9367_v57, 16  ;;  %v4264_v4 = vmax.f32 %v4232_v40, 0.0  ;;  %v4265_v32 = vmax.f32 %v4233_v36, 0.0 }
 0x632   : > { %v4525_v47 = vor.u32 %v4524_v1, %v4421_v10  ;;  %v4230_v11 = vsel %vm967_vm4, %v4116_v62, %v4198_v26  ;;  %v4231_v18 = vsel %vm967_vm4, %v4117_v54, %v4199_v60  ;;  %v9397_v20 = vor.u32 %v4375_v38, %v4374_v25 }
 0x633   : > { %4604 = vrot.lane.b32.xlu0 %v9319_v46, %s6710_s2  ;;  %v4531_v2 = vor.u32 %v4530_v30, %v4442_v52  ;;  %v4528_v48 = vrot.slane %v4438_v53, 1  ;;  %v4262_v44 = vmax.f32 %v4230_v11, 0.0  ;;  %v4263_v41 = vmax.f32 %v4231_v18, 0.0 }
 0x634   : > { %4610 = vrot.lane.b32.xlu1 %v9328_v5, %s6710_s2  ;;  %v4278_v58 = vpack.c.bf16 %v4259_v45, %v4258_v59  ;;  %v4367_v26 = vrot.slane %v4365_v43, 7  ;;  %v4966_v37 = vsel %vm4793_vm14, %v9084_v19, 0  ;;  %v4435_v38 = vshrl.u32 %v9351_v50, 16 }
 0x635   : > { %v4534_v60 = vrot.slane %v4459_v14, 1  ;;  %v4281_v1 = vpack.c.bf16 %v4265_v32, %v4264_v4  ;;  %v9412_v0 = vpack.c.bf16 %v4263_v41, %v4262_v44  ;;  %6376 = vmatpush3.bf16.msra.mxu1 %v4966_v37  ;;  %v4564_v40 = vsel %vm7423_vm7, %v4525_v47, 0  ;;  %v5909_v41 = vld [vmem:[%s10236_s14] ss:$0 sm:$0xff] }
 0x636   : > { %v9418_v30 = vor.u32 %v4368_v29, %v4367_v26  ;;  %v4567_v19 = vsel %vm7423_vm7, %v4531_v2, 0  ;;  %v4529_v43 = vor.u32 %v4528_v48, %v4435_v38  ;;  %v4456_v59 = vshrl.u32 %v9367_v57, 16 }
 0x637   : > { %4652 = vrot.lane.b32.xlu0 %v4564_v40, %s6711_s8  ;;  %v4452_v62 = vshll.u32 %v4278_v58, 16  ;;  %v4388_v45 = vrot.slane %v4386_v49, 7  ;;  %v4381_v36 = vrot.slane %v4379_v31, 7  ;;  %v4402_v22 = vrot.slane %v4400_v39, 7 }
 0x638   : > { %4658 = vrot.lane.b32.xlu1 %v4567_v19, %s6711_s8  ;;  %v4535_v29 = vor.u32 %v4534_v60, %v4456_v59  ;;  %v4473_v61 = vshll.u32 %v4281_v1, 16  ;;  %v4395_v54 = vrot.slane %v4393_v13, 7  ;;  %v4416_v25 = vrot.slane %v4414_v56, 7  ;;  %v10584_v60 = vld [vmem:[#allocation6_spill] sm:$0xff] }
 0x639   : > { %v9437_v4 = vor.u32 %v4389_v3, %v4388_v45  ;;  %v9441_v49 = vor.u32 %v4382_v15, %v4381_v36  ;;  %v9445_v31 = vor.u32 %v4403_v6, %v4402_v22  ;;  %v4409_v39 = vrot.slane %v4407_v63, 7 }
 0x63a   : > { %v4449_v13 = vshrl.u32 %v4278_v58, 16  ;;  %v4470_v56 = vshrl.u32 %v4281_v1, 16  ;;  %v9453_v42 = vor.u32 %v4396_v51, %v4395_v54  ;;  %v9457_v33 = vor.u32 %v4417_v9, %v4416_v25 }
 0x63b   : > { %4608 = vrot.lane.b32.xlu0 %v9351_v50, %s6710_s2  ;;  %v4566_v3 = vsel %vm7423_vm7, %v4529_v43, 0  ;;  %v4463_v15 = vshrl.u32 %v9412_v0, 16  ;;  %v9466_v28 = vor.u32 %v4410_v35, %v4409_v39  ;;  %v4569_v6 = vsel %vm7423_vm7, %v4535_v29, 0 }
 0x63c   : > { %4614 = vrot.lane.b32.xlu1 %v9367_v57, %s6710_s2  ;;  %v4532_v16 = vrot.slane %v4452_v62, 1  ;;  %v4538_v51 = vrot.slane %v4473_v61, 1  ;;  %v4430_v55 = vrot.slane %v4428_v8, 7  ;;  %v4466_v9 = vshll.u32 %v9412_v0, 16 }
 0x63d   : > { %v4423_v63 = vrot.slane %v4421_v10, 7  ;;  %v4444_v32 = vrot.slane %v4442_v52, 7  ;;  %v4437_v47 = vrot.slane %v4435_v38, 7  ;;  %v4458_v35 = vrot.slane %v4456_v59, 7 }
 0x63e   : > { %v9478_v24 = vor.u32 %v4431_v21, %v4430_v55  ;;  %v4451_v11 = vrot.slane %v4449_v13, 7  ;;  %v4472_v18 = vrot.slane %v4470_v56, 7  ;;  %v4465_v7 = vrot.slane %v4463_v15, 7 }
 0x63f   : > { %4656 = vrot.lane.b32.xlu0 %v4566_v3, %s6711_s8  ;;  %v9483_v8 = vor.u32 %v4424_v34, %v4423_v63  ;;  %v9487_v10 = vor.u32 %v4445_v23, %v4444_v32  ;;  %v9491_v52 = vor.u32 %v4438_v53, %v4437_v47  ;;  %v9495_v21 = vor.u32 %v4459_v14, %v4458_v35  ;;  %v5910_v53 = vld [vmem:[%s10237_s15] ss:$0 sm:$0xff] }
 0x640   : > { %4662 = vrot.lane.b32.xlu1 %v4569_v6, %s6711_s8  ;;  %v9497_v2 = vor.u32 %v4452_v62, %v4451_v11  ;;  %v9499_v48 = vor.u32 %v4473_v61, %v4472_v18  ;;  %v4533_v46 = vor.u32 %v4532_v16, %v4449_v13  ;;  %v9501_v34 = vor.u32 %v4466_v9, %v4465_v7 }
 0x641   : > { %v4539_v5 = vor.u32 %v4538_v51, %v4470_v56  ;;  %v4536_v23 = vrot.slane %v4466_v9, 1  ;;  %v5138_v62 = vsel %vm4793_vm14, %v9147_v17, 0  ;;  %v4495_v36 = vsel %vm7873_vm9, 0, %v9437_v4 }
 0x642   : > { %v4568_v50 = vsel %vm7423_vm7, %v4533_v46, 0  ;;  %v4494_v22 = vsel %vm7873_vm9, 0, %v9441_v49  ;;  %v4497_v13 = vsel %vm7873_vm9, 0, %v9445_v31  ;;  %v4496_v3 = vsel %vm7873_vm9, 0, %v9453_v42 }
 0x643   : > { %4612 = vrot.lane.b32.xlu0 %v4278_v58, %s6710_s2  ;;  %v4571_v57 = vsel %vm7423_vm7, %v4539_v5, 0  ;;  %v4537_v14 = vor.u32 %v4536_v23, %v4463_v15  ;;  %v4499_v9 = vsel %vm7873_vm9, 0, %v9457_v33  ;;  %v4498_v32 = vsel %vm7873_vm9, 0, %v9466_v28 }
 0x644   : > { %4618 = vrot.lane.b32.xlu1 %v4281_v1, %s6710_s2  ;;  %v4493_v1 = vsel %vm7873_vm9, 0, %v9397_v20  ;;  %v4501_v46 = vsel %vm7873_vm9, 0, %v9478_v24 }
 0x645   : > { %v4570_v44 = vsel %vm7423_vm7, %v4537_v14, 0 }
 0x647   : > { %4660 = vrot.lane.b32.xlu0 %v4568_v50, %s6711_s8  ;;  %v4500_v50 = vsel %vm7873_vm9, 0, %v9483_v8 }
 0x648   : > { %4666 = vrot.lane.b32.xlu1 %v4571_v57, %s6711_s8 }
 0x64b   : > { %4616 = vrot.lane.b32.xlu0 %v9412_v0, %s6710_s2  ;;  %v4492_v0 = vsel %vm7873_vm9, 0, %v9418_v30 }
 0x64c   : > { %4329 = vrot.lane.b32.xlu1 %v5910_v53, %s6710_s2 }
 0x64f   : > { %4664 = vrot.lane.b32.xlu0 %v4570_v44, %s6711_s8 }
 0x653   : > { %4288 = vrot.lane.b32.xlu0 %v5909_v41, %s6710_s2  ;;  %v4503_v41 = vsel %vm7873_vm9, 0, %v9487_v10  ;;  %s5970_s2 = sshll.u32 %s10637_s21, 8 }
 0x654   : > { %s10002_s28 = scalar_lea.vmem %s10241_s19, %s5970_s2 }
 0x67a   : > { %v4591_v58 = vpop.permute.xlu1 %4590 }
 0x67b   : > { %v4674_v12 = vsel %vm4668_vm15, %v4493_v1, %v4591_v58 }
 0x682   : > { %v4639_v26 = vpop.permute.xlu1 %4638  ;;  %v4589_v37 = vpop.permute.xlu0 %4588 }
 0x683   : > { %v4671_v40 = vsel %vm4668_vm15, %v4492_v0, %v4589_v37  ;;  %v9533_v19 = vsel %vm4717_vm0, %v4674_v12, %v4639_v26  ;;  %v4502_v26 = vsel %vm7873_vm9, 0, %v9491_v52  ;;  %v4505_v52 = vsel %vm7873_vm9, 0, %v9495_v21 }
 0x686   : > { %v4595_v38 = vpop.permute.xlu1 %4594 }
 0x687   : > { %v4680_v17 = vsel %vm4668_vm15, %v4495_v36, %v4595_v38  ;;  %v4507_v36 = vsel %vm7873_vm9, 0, %v9499_v48 }
 0x689   : > { %v4637_v43 = vpop.permute.xlu0 %4636 }
 0x68a   : > { %v4719_v59 = vsel %vm4717_vm0, %v4671_v40, %v4637_v43  ;;  %v4643_v45 = vpop.permute.xlu1 %4642  ;;  %v4504_v43 = vsel %vm7873_vm9, 0, %v9497_v2 }
 0x68b   : > { %6343 = vmatprep.mubr.msk.bf16.mxu0 %vm4760_vm1, %v4719_v59  ;;  %6378 = vmatmul.mubr.msk.bf16.vlgmr.msra.gmra.mxu1 %vm4760_vm1, %v4719_v59  ;;  %v9553_v61 = vsel %vm4717_vm0, %v4680_v17, %v4643_v45 }
 0x68c   : > { %6344 = vmatmul.mubr.msk.bf16.vlgmr.msra.gmra.mxu0 %vm4760_vm1, %v9533_v19  ;;  %6381 = vmatprep.mubr.msk.bf16.mxu1 %vm4760_vm1, %v9533_v19 }
 0x68d   : > { %6410 = vmatpush3.bf16.msra.mxu0 %v5138_v62  ;;  %v4593_v20 = vpop.permute.xlu0 %4592 }
 0x68e   : > { %v4599_v30 = vpop.permute.xlu1 %4598  ;;  %v4677_v29 = vsel %vm4668_vm15, %v4494_v22, %v4593_v20  ;;  %v4506_v22 = vsel %vm7873_vm9, 0, %v9501_v34 }
 0x68f   : > { %v4686_v56 = vsel %vm4668_vm15, %v4497_v13, %v4599_v30  ;;  %v10585_v13 = vld [vmem:[#allocation4_spill] sm:$0xff] }
 0x691   : > { %v4641_v54 = vpop.permute.xlu0 %4640 }
 0x692   : > { %v9556_v25 = vsel %vm4717_vm0, %v4677_v29, %v4641_v54  ;;  %v4647_v39 = vpop.permute.xlu1 %4646 }
 0x693   : > { %6347 = vmatprep.mubr.msk.bf16.mxu0 %vm4760_vm1, %v9556_v25  ;;  %6382 = vmatmul.mubr.msk.bf16.gmra.mxu1 %vm4760_vm1, %v9556_v25  ;;  %v9575_v6 = vsel %vm4717_vm0, %v4686_v56, %v4647_v39 }
 0x694   : > { %6348 = vmatmul.mubr.msk.bf16.gmra.mxu0 %vm4760_vm1, %v9553_v61  ;;  %6385 = vmatprep.mubr.msk.bf16.mxu1 %vm4760_vm1, %v9553_v61 }
 0x695   : > { %v4597_v4 = vpop.permute.xlu0 %4596 }
 0x696   : > { %v4603_v49 = vpop.permute.xlu1 %4602  ;;  %v4683_v15 = vsel %vm4668_vm15, %v4496_v3, %v4597_v4 }
 0x697   : > { %v4692_v63 = vsel %vm4668_vm15, %v4499_v9, %v4603_v49 }
 0x699   : > { %v4645_v16 = vpop.permute.xlu0 %4644 }
 0x69a   : > { %v9578_v51 = vsel %vm4717_vm0, %v4683_v15, %v4645_v16  ;;  %v4651_v55 = vpop.permute.xlu1 %4650  ;;  %v10586_v16 = vld [vmem:[#allocation7_spill] sm:$0xff] }
 0x69b   : > { %6351 = vmatprep.mubr.msk.bf16.mxu0 %vm4760_vm1, %v9578_v51  ;;  %6386 = vmatmul.mubr.msk.bf16.gmra.mxu1 %vm4760_vm1, %v9578_v51  ;;  %v9597_v35 = vsel %vm4717_vm0, %v4692_v63, %v4651_v55  ;;  %v10588_v63 = vld [vmem:[#allocation11_spill] sm:$0xff] }
 0x69c   : > { %6352 = vmatmul.mubr.msk.bf16.gmra.mxu0 %vm4760_vm1, %v9575_v6  ;;  %6389 = vmatprep.mubr.msk.bf16.mxu1 %vm4760_vm1, %v9575_v6 }
 0x69d   : > { %v4601_v31 = vpop.permute.xlu0 %4600 }
 0x69e   : > { %v4607_v42 = vpop.permute.xlu1 %4606  ;;  %v4689_v47 = vsel %vm4668_vm15, %v4498_v32, %v4601_v31  ;;  %v10587_v31 = vld [vmem:[#allocation3_spill] sm:$0xff] }
 0x69f   : > { %v4698_v5 = vsel %vm4668_vm15, %v4501_v46, %v4607_v42  ;;  %v10591_v46 = vld [vmem:[#allocation10_spill] sm:$0xff] }
 0x6a1   : > { %v4649_v11 = vpop.permute.xlu0 %4648 }
 0x6a2   : > { %v9600_v18 = vsel %vm4717_vm0, %v4689_v47, %v4649_v11  ;;  %v4655_v7 = vpop.permute.xlu1 %4654  ;;  %v10589_v47 = vld [vmem:[#allocation9_spill] sm:$0xff] }
 0x6a3   : > { %6355 = vmatprep.mubr.msk.bf16.mxu0 %vm4760_vm1, %v9600_v18  ;;  %6390 = vmatmul.mubr.msk.bf16.gmra.mxu1 %vm4760_vm1, %v9600_v18  ;;  %v9619_v57 = vsel %vm4717_vm0, %v4698_v5, %v4655_v7 }
 0x6a4   : > { %6356 = vmatmul.mubr.msk.bf16.gmra.mxu0 %vm4760_vm1, %v9597_v35  ;;  %6393 = vmatprep.mubr.msk.bf16.mxu1 %vm4760_vm1, %v9597_v35 }
 0x6a5   : > { %v4605_v33 = vpop.permute.xlu0 %4604 }
 0x6a6   : > { %v4611_v28 = vpop.permute.xlu1 %4610  ;;  %v4695_v23 = vsel %vm4668_vm15, %v4500_v50, %v4605_v33  ;;  %v10590_v33 = vld [vmem:[#allocation12_spill] sm:$0xff] }
 0x6a7   : > { %v4704_v58 = vsel %vm4668_vm15, %v4503_v41, %v4611_v28  ;;  %v10594_v41 = vld [vmem:[#allocation16_spill] sm:$0xff] }
 0x6a9   : > { %v4653_v53 = vpop.permute.xlu0 %4652 }
 0x6aa   : > { %v9622_v14 = vsel %vm4717_vm0, %v4695_v23, %v4653_v53  ;;  %v4659_v44 = vpop.permute.xlu1 %4658  ;;  %v10592_v23 = vld [vmem:[#allocation15_spill] sm:$0xff] }
 0x6ab   : > { %6359 = vmatprep.mubr.msk.bf16.mxu0 %vm4760_vm1, %v9622_v14  ;;  %6394 = vmatmul.mubr.msk.bf16.gmra.mxu1 %vm4760_vm1, %v9622_v14  ;;  %v9641_v38 = vsel %vm4717_vm0, %v4704_v58, %v4659_v44  ;;  %v10593_v44 = vld [vmem:[#allocation13_spill] sm:$0xff] }
 0x6ac   : > { %6360 = vmatmul.mubr.msk.bf16.gmra.mxu0 %vm4760_vm1, %v9619_v57  ;;  %6397 = vmatprep.mubr.msk.bf16.mxu1 %vm4760_vm1, %v9619_v57 }
 0x6ad   : > { %v4609_v24 = vpop.permute.xlu0 %4608 }
 0x6ae   : > { %v4615_v8 = vpop.permute.xlu1 %4614  ;;  %v4701_v37 = vsel %vm4668_vm15, %v4502_v26, %v4609_v24  ;;  %v10595_v26 = vld [vmem:[#allocation14_spill] sm:$0xff] }
 0x6af   : > { %v4710_v40 = vsel %vm4668_vm15, %v4505_v52, %v4615_v8  ;;  %v10597_v52 = vld [vmem:[#allocation17_spill] sm:$0xff] }
 0x6b1   : > { %v4657_v1 = vpop.permute.xlu0 %4656 }
 0x6b2   : > { %v9644_v12 = vsel %vm4717_vm0, %v4701_v37, %v4657_v1  ;;  %v4663_v0 = vpop.permute.xlu1 %4662 }
 0x6b3   : > { %6363 = vmatprep.mubr.msk.bf16.mxu0 %vm4760_vm1, %v9644_v12  ;;  %6398 = vmatmul.mubr.msk.bf16.gmra.mxu1 %vm4760_vm1, %v9644_v12  ;;  %v9663_v45 = vsel %vm4717_vm0, %v4710_v40, %v4663_v0  ;;  %v10596_v0 = vld [vmem:[#allocation19_spill] sm:$0xff] }
 0x6b4   : > { %6364 = vmatmul.mubr.msk.bf16.gmra.mxu0 %vm4760_vm1, %v9641_v38  ;;  %6401 = vmatprep.mubr.msk.bf16.mxu1 %vm4760_vm1, %v9641_v38 }
 0x6b5   : > { %v4613_v10 = vpop.permute.xlu0 %4612 }
 0x6b6   : > { %v4619_v59 = vpop.permute.xlu1 %4618  ;;  %v4707_v62 = vsel %vm4668_vm15, %v4504_v43, %v4613_v10 }
 0x6b7   : > { %v4716_v17 = vsel %vm4668_vm15, %v4507_v36, %v4619_v59  ;;  %v10598_v59 = vld [vmem:[#allocation20_spill] sm:$0xff]  ;;  %v10600_v36 = vld [vmem:[#allocation23_spill] sm:$0xff] }
 0x6b9   : > { %v4661_v20 = vpop.permute.xlu0 %4660 }
 0x6ba   : > { %v9666_v30 = vsel %vm4717_vm0, %v4707_v62, %v4661_v20  ;;  %v4667_v2 = vpop.permute.xlu1 %4666  ;;  %v10599_v20 = vld [vmem:[#allocation18_spill] sm:$0xff] }
 0x6bb   : > { %6367 = vmatprep.mubr.msk.bf16.mxu0 %vm4760_vm1, %v9666_v30  ;;  %6402 = vmatmul.mubr.msk.bf16.gmra.mxu1 %vm4760_vm1, %v9666_v30  ;;  %v9685_v54 = vsel %vm4717_vm0, %v4716_v17, %v4667_v2 }
 0x6bc   : > { %6368 = vmatmul.mubr.msk.bf16.gmra.mxu0 %vm4760_vm1, %v9663_v45  ;;  %6405 = vmatprep.mubr.msk.bf16.mxu1 %vm4760_vm1, %v9663_v45 }
 0x6bd   : > { %v4617_v21 = vpop.permute.xlu0 %4616 }
 0x6be   : > { %v4713_v29 = vsel %vm4668_vm15, %v4506_v22, %v4617_v21  ;;  %v9700_v34 = vpop.permute.xlu1 %4329  ;;  %v10601_v22 = vld [vmem:[#allocation21_spill] sm:$0xff] }
 0x6c1   : > { %v4665_v39 = vpop.permute.xlu0 %4664 }
 0x6c2   : > { %v9688_v4 = vsel %vm4717_vm0, %v4713_v29, %v4665_v39 }
 0x6c3   : > { %6371 = vmatprep.mubr.msk.bf16.mxu0 %vm4760_vm1, %v9688_v4  ;;  %6406 = vmatmul.mubr.msk.bf16.gmra.mxu1 %vm4760_vm1, %v9688_v4 }
 0x6c4   : > { %6372 = vmatmul.mubr.msk.bf16.gmra.mxu0 %vm4760_vm1, %v9685_v54 }
 0x6c5   : > { %v9696_v48 = vpop.permute.xlu0 %4288  ;;  %6411 = vmatprep.mubr.msk.bf16.mxu0 %vm4760_vm1, %v9533_v19 }
 0x6c6   : > { %v4292_v49 = vmul.f32 %v9696_v48, %v10584_v60  ;;  %v4291_v56 = vmul.f32 %v9696_v48, %v10585_v13  ;;  %v4294_v55 = vmul.f32 %v9696_v48, %v10586_v16  ;;  %v4293_v42 = vmul.f32 %v9696_v48, %v10587_v31  ;;  %v10602_v60 = vld [vmem:[#allocation24_spill] sm:$0xff]  ;;  %v10603_v13 = vld [vmem:[#allocation22_spill] sm:$0xff] }
 0x6c7   : > { %v4296_v32 = vmul.f32 %v9696_v48, %v10588_v63  ;;  %v4295_v11 = vmul.f32 %v9696_v48, %v10589_v47  ;;  %v4298_v28 = vmul.f32 %v9696_v48, %v10590_v33  ;;  %v4297_v5 = vmul.f32 %v9696_v48, %v10591_v46  ;;  %v10607_v63 = vld [vmem:[#allocation26_spill] sm:$0xff]  ;;  %v10610_v46 = vld [vmem:[#allocation32_spill] sm:$0xff] }
 0x6c8   : > { %v4333_v3 = vadd.f32 %v9700_v34, %v4292_v49  ;;  %v4332_v15 = vadd.f32 %v9700_v34, %v4291_v56  ;;  %v4335_v19 = vadd.f32 %v9700_v34, %v4294_v55  ;;  %v4334_v9 = vadd.f32 %v9700_v34, %v4293_v42  ;;  %v10605_v55 = vld [vmem:[#allocation25_spill] sm:$0xff] }
 0x6c9   : > { %v4337_v7 = vadd.f32 %v9700_v34, %v4296_v32  ;;  %v4338_v50 = vadd.f32 %v9700_v34, %v4297_v5  ;;  %v4300_v53 = vmul.f32 %v9696_v48, %v10592_v23  ;;  %v4299_v24 = vmul.f32 %v9696_v48, %v10593_v44  ;;  %v10612_v44 = vld [vmem:[#allocation33_spill] sm:$0xff] }
 0x6ca   : > { %5445 = vrot.lane.b32.xlu1 %v4333_v3, %s6712_s24  ;;  %5443 = vrot.lane.b32.xlu0 %v4332_v15, %s6712_s24  ;;  %v4302_v58 = vmul.f32 %v9696_v48, %v10594_v41  ;;  %v4301_v37 = vmul.f32 %v9696_v48, %v10595_v26  ;;  %v4304_v10 = vmul.f32 %v9696_v48, %v10596_v0  ;;  %v10604_v15 = vld [vmem:[#allocation27_spill] sm:$0xff]  ;;  %v10615_v26 = vmov 0  }
 0x6cb   : > { %v4341_v8 = vadd.f32 %v9700_v34, %v4300_v53  ;;  %v4303_v40 = vmul.f32 %v9696_v48, %v10597_v52  ;;  %v4306_v62 = vmul.f32 %v9696_v48, %v10598_v59  ;;  %v4305_v21 = vmul.f32 %v9696_v48, %v10599_v20 }
 0x6cc   : > { %6412 = vmatmul.mubr.msk.bf16.vlgmr.msra.gmra.mxu0 %vm4760_vm1, %v9556_v25  ;;  %v4336_v25 = vadd.f32 %v9700_v34, %v4295_v11  ;;  %v4342_v1 = vadd.f32 %v9700_v34, %v4301_v37  ;;  %v4345_v43 = vadd.f32 %v9700_v34, %v4304_v10  ;;  %v4308_v17 = vmul.f32 %v9696_v48, %v10600_v36  ;;  %v10608_v11 = vld [vmem:[#allocation31_spill] sm:$0xff] }
 0x6cd   : > { %6415 = vmatprep.mubr.msk.bf16.mxu0 %vm4760_vm1, %v9553_v61  ;;  %v4339_v61 = vadd.f32 %v9700_v34, %v4298_v28  ;;  %v4346_v2 = vadd.f32 %v9700_v34, %v4305_v21  ;;  %v4307_v29 = vmul.f32 %v9696_v48, %v10601_v22  ;;  %v4310_v49 = vmul.f32 %v9696_v48, %v10602_v60 }
 0x6ce   : > { %5449 = vrot.lane.b32.xlu1 %v4335_v19, %s6712_s24  ;;  %5447 = vrot.lane.b32.xlu0 %v4334_v9, %s6712_s24  ;;  %v4349_v39 = vadd.f32 %v9700_v34, %v4308_v17  ;;  %v4309_v56 = vmul.f32 %v9696_v48, %v10603_v13  ;;  %v4312_v16 = vmul.f32 %v9696_v48, %v10604_v15  ;;  %v10606_v19 = vld [vmem:[#allocation28_spill] sm:$0xff] }
 0x6cf   : > { %v4311_v31 = vmul.f32 %v9696_v48, %v10605_v55  ;;  %v4314_v9 = vmul.f32 %v9696_v48, %v10606_v19  ;;  %v4313_v32 = vmul.f32 %v9696_v48, %v10607_v63  ;;  %v4318_v5 = vmul.f32 %v9696_v48, %v10610_v46 }
 0x6d0   : > { %v4350_v3 = vadd.f32 %v9700_v34, %v4309_v56  ;;  %v4353_v42 = vadd.f32 %v9700_v34, %v4312_v16  ;;  %v4320_v53 = vmul.f32 %v9696_v48, %v10572_v27 }
 0x6d1   : > { %v4354_v47 = vadd.f32 %v9700_v34, %v4313_v32 }
 0x6d2   : > { %5453 = vrot.lane.b32.xlu1 %v4337_v7, %s6712_s24  ;;  %5451 = vrot.lane.b32.xlu0 %v4336_v25, %s6712_s24  ;;  %v4316_v7 = vmul.f32 %v9696_v48, %v10608_v11  ;;  %v10609_v25 = vld [vmem:[#allocation29_spill] sm:$0xff] }
 0x6d3   : > { %v4315_v33 = vmul.f32 %v9696_v48, %v10609_v25 }
 0x6d4   : > { %6416 = vmatmul.mubr.msk.bf16.gmra.mxu0 %vm4760_vm1, %v9578_v51  ;;  %v4340_v51 = vadd.f32 %v9700_v34, %v4299_v24  ;;  %v4357_v28 = vadd.f32 %v9700_v34, %v4316_v7  ;;  %v4319_v24 = vmul.f32 %v9696_v48, %v10612_v44 }
 0x6d5   : > { %6419 = vmatprep.mubr.msk.bf16.mxu0 %vm4760_vm1, %v9575_v6  ;;  %v4343_v6 = vadd.f32 %v9700_v34, %v4302_v58  ;;  %v10614_v58 = vld [vmem:[#allocation34_spill] sm:$0xff] }
 0x6d6   : > { %5457 = vrot.lane.b32.xlu1 %v4339_v61, %s6712_s24  ;;  %5455 = vrot.lane.b32.xlu0 %v4338_v50, %s6712_s24  ;;  %v10611_v61 = vld [vmem:[#allocation30_spill] sm:$0xff]  ;;  %v4321_v27 = vmul.f32 %v9696_v48, %v10614_v58 }
 0x6d7   : > { %v4317_v50 = vmul.f32 %v9696_v48, %v10611_v61 }
 0x6d8   : > { %v4362_v37 = vadd.f32 %v9700_v34, %v4321_v27 }
 0x6d9   : > { %v4358_v23 = vadd.f32 %v9700_v34, %v4317_v50 }
 0x6da   : > { %5461 = vrot.lane.b32.xlu1 %v4341_v8, %s6712_s24  ;;  %5459 = vrot.lane.b32.xlu0 %v4340_v51, %s6712_s24  ;;  %v4361_v8 = vadd.f32 %v9700_v34, %v4320_v53  ;;  %v10613_v51 = vld [vmem:[#allocation36_spill] sm:$0xff] }
 0x6db   : > { %v4322_v41 = vmul.f32 %v9696_v48, %v10613_v51 }
 0x6dc   : > { %6420 = vmatmul.mubr.msk.bf16.gmra.mxu0 %vm4760_vm1, %v9600_v18  ;;  %v4344_v18 = vadd.f32 %v9700_v34, %v4303_v40 }
 0x6dd   : > { %6423 = vmatprep.mubr.msk.bf16.mxu0 %vm4760_vm1, %v9597_v35  ;;  %v4347_v35 = vadd.f32 %v9700_v34, %v4306_v62 }
 0x6de   : > { %5465 = vrot.lane.b32.xlu1 %v4343_v6, %s6712_s24  ;;  %5463 = vrot.lane.b32.xlu0 %v4342_v1, %s6712_s24 }
 0x6e2   : > { %5469 = vrot.lane.b32.xlu1 %v4345_v43, %s6712_s24  ;;  %5467 = vrot.lane.b32.xlu0 %v4344_v18, %s6712_s24 }
 0x6e4   : > { %6424 = vmatmul.mubr.msk.bf16.gmra.mxu0 %vm4760_vm1, %v9622_v14  ;;  %v4348_v14 = vadd.f32 %v9700_v34, %v4307_v29 }
 0x6e5   : > { %6427 = vmatprep.mubr.msk.bf16.mxu0 %vm4760_vm1, %v9619_v57  ;;  %v4351_v57 = vadd.f32 %v9700_v34, %v4310_v49 }
 0x6e6   : > { %5473 = vrot.lane.b32.xlu1 %v4347_v35, %s6712_s24  ;;  %5471 = vrot.lane.b32.xlu0 %v4346_v2, %s6712_s24 }
 0x6ea   : > { %5477 = vrot.lane.b32.xlu1 %v4349_v39, %s6712_s24  ;;  %5475 = vrot.lane.b32.xlu0 %v4348_v14, %s6712_s24 }
 0x6ec   : > { %6428 = vmatmul.mubr.msk.bf16.gmra.mxu0 %vm4760_vm1, %v9644_v12  ;;  %v4352_v12 = vadd.f32 %v9700_v34, %v4311_v31 }
 0x6ed   : > { %6431 = vmatprep.mubr.msk.bf16.mxu0 %vm4760_vm1, %v9641_v38  ;;  %v4355_v38 = vadd.f32 %v9700_v34, %v4314_v9 }
 0x6ee   : > { %5481 = vrot.lane.b32.xlu1 %v4351_v57, %s6712_s24  ;;  %5479 = vrot.lane.b32.xlu0 %v4350_v3, %s6712_s24 }
 0x6f2   : > { %5485 = vrot.lane.b32.xlu1 %v4353_v42, %s6712_s24  ;;  %5483 = vrot.lane.b32.xlu0 %v4352_v12, %s6712_s24 }
 0x6f4   : > { %6432 = vmatmul.mubr.msk.bf16.gmra.mxu0 %vm4760_vm1, %v9666_v30  ;;  %v4356_v30 = vadd.f32 %v9700_v34, %v4315_v33 }
 0x6f5   : > { %6435 = vmatprep.mubr.msk.bf16.mxu0 %vm4760_vm1, %v9663_v45  ;;  %v4359_v45 = vadd.f32 %v9700_v34, %v4318_v5 }
 0x6f6   : > { %5489 = vrot.lane.b32.xlu1 %v4355_v38, %s6712_s24  ;;  %5487 = vrot.lane.b32.xlu0 %v4354_v47, %s6712_s24 }
 0x6fa   : > { %5493 = vrot.lane.b32.xlu1 %v4357_v28, %s6712_s24  ;;  %5491 = vrot.lane.b32.xlu0 %v4356_v30, %s6712_s24 }
 0x6fc   : > { %6436 = vmatmul.mubr.msk.bf16.gmra.mxu0 %vm4760_vm1, %v9688_v4  ;;  %v4360_v4 = vadd.f32 %v9700_v34, %v4319_v24 }
 0x6fd   : > { %6439 = vmatprep.mubr.msk.bf16.mxu0 %vm4760_vm1, %v9685_v54  ;;  %v4363_v54 = vadd.f32 %v9700_v34, %v4322_v41 }
 0x6fe   : > { %5497 = vrot.lane.b32.xlu1 %v4359_v45, %s6712_s24  ;;  %5495 = vrot.lane.b32.xlu0 %v4358_v23, %s6712_s24 }
 0x702   : > { %5501 = vrot.lane.b32.xlu1 %v4361_v8, %s6712_s24  ;;  %5499 = vrot.lane.b32.xlu0 %v4360_v4, %s6712_s24 }
 0x704   : > { %6440 = vmatmul.mubr.bf16.gmra.mxu0 %v10615_v26  ;;  %v9968_v26 = vld [vmem:[%s10239_s17] ss:$0 sm:$0xff] }
 0x706   : > { %5505 = vrot.lane.b32.xlu1 %v4363_v54, %s6712_s24  ;;  %5503 = vrot.lane.b32.xlu0 %v4362_v37, %s6712_s24 }
 0x73c   : > { %v9907_v15 = vpop.permute.xlu0 %5443  ;;  %v9915_v42 = vpop.permute.xlu1 %5445 }
 0x740   : > { %v5448_v9 = vpop.permute.xlu0 %5447  ;;  %v5450_v47 = vpop.permute.xlu1 %5449 }
 0x744   : > { %v9929_v7 = vpop.permute.xlu0 %5451  ;;  %v9937_v30 = vpop.permute.xlu1 %5453 }
 0x748   : > { %v9943_v61 = vpop.permute.xlu0 %5455  ;;  %v9951_v53 = vpop.permute.xlu1 %5457 }
 0x74b   : > { %v6379_v6 = vpop.f32.mrf.mxu1 }
 0x74c   : > { %v6345_v1 = vpop.f32.mrf.mxu0  ;;  %v9955_v24 = vpop.permute.xlu0 %5459 }
 0x74d   : > { %v5002_v0 = vpop.f32.mrf.mxu1  ;;  %v5011_v41 = vadd.f32 %v6379_v6, %v6345_v1  ;;  %v9963_v58 = vpop.permute.xlu1 %5461 }
 0x74e   : > { %v4831_v10 = vpop.f32.mrf.mxu0 }
 0x74f   : > { %v9861_v48 = vpop.f32.mrf.mxu1  ;;  %v5003_v54 = vadd.f32 %v5002_v0, %v4831_v10 }
 0x750   : > { %v9859_v52 = vpop.f32.mrf.mxu0 }
 0x751   : > { %v9867_v18 = vpop.f32.mrf.mxu1  ;;  %v5014_v1 = vadd.f32 %v9861_v48, %v9859_v52 }
 0x752   : > { %v9863_v40 = vpop.f32.mrf.mxu0 }
 0x753   : > { %v9873_v62 = vpop.f32.mrf.mxu1  ;;  %v5006_v0 = vadd.f32 %v9867_v18, %v9863_v40 }
 0x754   : > { %v9865_v43 = vpop.f32.mrf.mxu0 }
 0x755   : > { %v9879_v35 = vpop.f32.mrf.mxu1  ;;  %v5027_v40 = vadd.f32 %v9873_v62, %v9865_v43 }
 0x756   : > { %v9869_v59 = vpop.f32.mrf.mxu0 }
 0x757   : > { %v9885_v17 = vpop.f32.mrf.mxu1  ;;  %v5019_v18 = vadd.f32 %v9879_v35, %v9869_v59 }
 0x758   : > { %v9871_v34 = vpop.f32.mrf.mxu0 }
 0x759   : > { %v9891_v39 = vpop.f32.mrf.mxu1  ;;  %v5030_v59 = vadd.f32 %v9885_v17, %v9871_v34 }
 0x75a   : > { %v9875_v20 = vpop.f32.mrf.mxu0 }
 0x75b   : > { %v9897_v49 = vpop.f32.mrf.mxu1 }
 0x75c   : > { %v9877_v21 = vpop.f32.mrf.mxu0 }
 0x75d   : > { %v9903_v57 = vpop.f32.mrf.mxu1 }
 0x75e   : > { %v9881_v2 = vpop.f32.mrf.mxu0 }
 0x75f   : > { %v9911_v55 = vpop.f32.mrf.mxu1 }
 0x760   : > { %v9883_v36 = vpop.f32.mrf.mxu0 }
 0x761   : > { %v9919_v19 = vpop.f32.mrf.mxu1 }
 0x762   : > { %v9887_v22 = vpop.f32.mrf.mxu0 }
 0x763   : > { %v9925_v38 = vpop.f32.mrf.mxu1 }
 0x764   : > { %v9889_v29 = vpop.f32.mrf.mxu0 }
 0x765   : > { %v9933_v33 = vpop.f32.mrf.mxu1 }
 0x766   : > { %v9893_v14 = vpop.f32.mrf.mxu0 }
 0x767   : > { %v9941_v5 = vpop.f32.mrf.mxu1 }
 0x768   : > { %v9895_v60 = vpop.f32.mrf.mxu0 }
 0x769   : > { %v9949_v23 = vpop.f32.mrf.mxu1 }
 0x76a   : > { %v9899_v13 = vpop.f32.mrf.mxu0 }
 0x76b   : > { %v9959_v4 = vpop.f32.mrf.mxu1 }
 0x76c   : > { %v9901_v56 = vpop.f32.mrf.mxu0 }
 0x76d   : > { %v9970_v37 = vpop.f32.mrf.mxu1 }
 0x76e   : > { %v9905_v3 = vpop.f32.mrf.mxu0 }
 0x76f   : > { %v9984_v10 = vpop.f32.mrf.mxu1 }
 0x770   : > { %v9909_v16 = vpop.f32.mrf.mxu0 }
 0x772   : > { %v9913_v31 = vpop.f32.mrf.mxu0 }
 0x774   : > { %v9917_v12 = vpop.f32.mrf.mxu0 }
 0x776   : > { %v9921_v63 = vpop.f32.mrf.mxu0 }
 0x778   : > { %v9923_v32 = vpop.f32.mrf.mxu0 }
 0x779   : > { %10616 = vst [vmem:[#allocation38_spill] sm:$0xff] %v9923_v32 }
 0x77a   : > { %v9927_v11 = vpop.f32.mrf.mxu0 }
 0x77b   : > { %10617 = vst [vmem:[#allocation39_spill] sm:$0xff] %v9927_v11 }
 0x77c   : > { %v9931_v25 = vpop.f32.mrf.mxu0 }
 0x77d   : > { %10618 = vst [vmem:[#allocation40_spill] sm:$0xff] %v9931_v25  ;;  %v9989_v25 = vpop.permute.xlu1 %5465 }
 0x77e   : > { %v9935_v28 = vpop.f32.mrf.mxu0 }
 0x77f   : > { %10619 = vst [vmem:[#allocation41_spill] sm:$0xff] %v9935_v28 }
 0x780   : > { %v9939_v46 = vpop.f32.mrf.mxu0 }
 0x781   : > { %10620 = vst [vmem:[#allocation42_spill] sm:$0xff] %v9939_v46 }
 0x782   : > { %v9945_v50 = vpop.f32.mrf.mxu0 }
 0x783   : > { %10621 = vst [vmem:[#allocation43_spill] sm:$0xff] %v9945_v50 }
 0x784   : > { %v9947_v45 = vpop.f32.mrf.mxu0 }
 0x785   : > { %10622 = vst [vmem:[#allocation44_spill] sm:$0xff] %v9947_v45  ;;  %v9972_v45 = vpop.permute.xlu0 %5463 }
 0x786   : > { %v9953_v44 = vpop.f32.mrf.mxu0 }
 0x787   : > { %10623 = vst [vmem:[#allocation45_spill] sm:$0xff] %v9953_v44 }
 0x788   : > { %v9957_v8 = vpop.f32.mrf.mxu0 }
 0x789   : > { %10624 = vst [vmem:[#allocation46_spill] sm:$0xff] %v9957_v8 }
 0x78a   : > { %v9961_v51 = vpop.f32.mrf.mxu0 }
 0x78b   : > { %10625 = vst [vmem:[#allocation47_spill] sm:$0xff] %v9961_v51  ;;  %v9977_v51 = vld [vmem:[%s10240_s18] ss:$0 sm:$0xff] }
 0x78c   : > { %v6413_v27 = vpop.f32.mrf.mxu0 }
 0x78d   : > { %v5303_v44 = vadd.f32 %v6413_v27, %v5011_v41 }
 0x78e   : > { %v5174_v6 = vpop.f32.mrf.mxu0 }
 0x78f   : > { %v5342_v8 = vmul.f32 %v9968_v26, %v5303_v44  ;;  %v5301_v50 = vadd.f32 %v5174_v6, %v5003_v54  ;;  %v9993_v54 = vpop.permute.xlu0 %5467 }
 0x790   : > { %v6414_v46 = vpop.f32.mrf.mxu0 }
 0x791   : > { %v5381_v41 = vadd.f32 %v9977_v51, %v5342_v8  ;;  %v5340_v27 = vmul.f32 %v9968_v26, %v5301_v50  ;;  %v5304_v28 = vadd.f32 %v6414_v46, %v5014_v1  ;;  %v10004_v46 = vpop.f32.mrf.mxu1 }
 0x792   : > { %v5177_v11 = vpop.f32.mrf.mxu0 }
 0x793   : > { %v5541_v32 = vadd.f32 %v5448_v9, %v5381_v41  ;;  %v5379_v52 = vadd.f32 %v9977_v51, %v5340_v27  ;;  %v5343_v48 = vmul.f32 %v9968_v26, %v5304_v28  ;;  %v5302_v44 = vadd.f32 %v5177_v11, %v5006_v0  ;;  %v10014_v0 = vpop.permute.xlu1 %5469 }
 0x794   : > { %v6417_v9 = vpop.f32.mrf.mxu0 }
 0x795   : > { %v5573_v50 = vmax.f32 %v5541_v32, 0.0  ;;  %v5539_v11 = vadd.f32 %v9907_v15, %v5379_v52  ;;  %v5382_v28 = vadd.f32 %v9977_v51, %v5343_v48  ;;  %v5341_v43 = vmul.f32 %v9968_v26, %v5302_v44  ;;  %v10019_v52 = vpop.f32.mrf.mxu1  ;;  %v10025_v44 = vpop.permute.xlu0 %5471 }
 0x796   : > { %v5307_v62 = vadd.f32 %v6417_v9, %v5027_v40  ;;  %v5190_v35 = vpop.f32.mrf.mxu0  ;;  %v5022_v15 = vadd.f32 %v9891_v39, %v9875_v20  ;;  %v5043_v40 = vadd.f32 %v9897_v49, %v9877_v21 }
 0x797   : > { %5605 = vst.msk [vmem:[%s10002_s28 + $0x10] sm:$0xff] %vm4668_vm15, %v5573_v50  ;;  %v5571_v8 = vmax.f32 %v5539_v11, 0.0  ;;  %v5542_v6 = vadd.f32 %v5450_v47, %v5382_v28  ;;  %v5380_v1 = vadd.f32 %v9977_v51, %v5341_v43  ;;  %v5305_v32 = vadd.f32 %v5190_v35, %v5019_v18  ;;  %v10035_v43 = vpop.f32.mrf.mxu1  ;;  %v10042_v35 = vpop.permute.xlu1 %5473 }
 0x798   : > { %v5346_v41 = vmul.f32 %v9968_v26, %v5307_v62  ;;  %v6418_v27 = vpop.f32.mrf.mxu0 }
 0x799   : > { %5603 = vst.msk [vmem:[%s10002_s28] sm:$0xff] %vm4668_vm15, %v5571_v8  ;;  %v5574_v34 = vmax.f32 %v5542_v6, 0.0  ;;  %v5540_v17 = vadd.f32 %v9915_v42, %v5380_v1  ;;  %v5344_v47 = vmul.f32 %v9968_v26, %v5305_v32  ;;  %v5308_v48 = vadd.f32 %v6418_v27, %v5030_v59  ;;  %v10051_v27 = vpop.permute.xlu0 %5475 }
 0x79a   : > { %v5385_v20 = vadd.f32 %v9977_v51, %v5346_v41  ;;  %v5193_v39 = vpop.f32.mrf.mxu0  ;;  %v5035_v8 = vadd.f32 %v9903_v57, %v9881_v2 }
 0x79b   : > { %5606 = vst.msk [vmem:[%s10002_s28 + $0x18] sm:$0xff] %vm4668_vm15, %v5574_v34  ;;  %v5572_v18 = vmax.f32 %v5540_v17, 0.0  ;;  %v5383_v9 = vadd.f32 %v9977_v51, %v5344_v47  ;;  %v5347_v50 = vmul.f32 %v9968_v26, %v5308_v48  ;;  %v5306_v11 = vadd.f32 %v5193_v39, %v5022_v15 }
 0x79c   : > { %v5545_v42 = vadd.f32 %v9943_v61, %v5385_v20  ;;  %v6421_v28 = vpop.f32.mrf.mxu0  ;;  %v5046_v61 = vadd.f32 %v9911_v55, %v9883_v36  ;;  %v5038_v34 = vadd.f32 %v9919_v19, %v9887_v22  ;;  %v10057_v36 = vpop.f32.mrf.mxu1  ;;  %v5059_v48 = vadd.f32 %v9925_v38, %v9889_v29 }
 0x79d   : > { %5604 = vst.msk [vmem:[%s10002_s28 + $0x8] sm:$0xff] %vm4668_vm15, %v5572_v18  ;;  %v5543_v21 = vadd.f32 %v9929_v7, %v5383_v9  ;;  %v5386_v49 = vadd.f32 %v9977_v51, %v5347_v50  ;;  %v5345_v59 = vmul.f32 %v9968_v26, %v5306_v11  ;;  %v5311_v62 = vadd.f32 %v6421_v28, %v5043_v40 }
 0x79e   : > { %v5577_v6 = vmax.f32 %v5545_v42, 0.0  ;;  %v5206_v1 = vpop.f32.mrf.mxu0  ;;  %v5051_v9 = vadd.f32 %v9933_v33, %v9893_v14  ;;  %v10075_v38 = vpop.f32.mrf.mxu1 }
 0x79f   : > { %v5575_v32 = vmax.f32 %v5543_v21, 0.0  ;;  %v5546_v15 = vadd.f32 %v9951_v53, %v5386_v49  ;;  %v5384_v7 = vadd.f32 %v9977_v51, %v5345_v59  ;;  %v5350_v41 = vmul.f32 %v9968_v26, %v5311_v62  ;;  %v5480_v21 = vpop.permute.xlu0 %5479 }
 0x7a0   : > { %5609 = vst.msk [vmem:[%s10002_s28 + $0x30] sm:$0xff] %vm4668_vm15, %v5577_v6  ;;  %v5309_v2 = vadd.f32 %v5206_v1, %v5035_v8  ;;  %v6422_v57 = vpop.f32.mrf.mxu0  ;;  %v5054_v6 = vadd.f32 %v9949_v23, %v9899_v13 }
 0x7a1   : > { %5607 = vst.msk [vmem:[%s10002_s28 + $0x20] sm:$0xff] %vm4668_vm15, %v5575_v32  ;;  %v5578_v55 = vmax.f32 %v5546_v15, 0.0  ;;  %v5544_v53 = vadd.f32 %v9937_v30, %v5384_v7  ;;  %v5389_v17 = vadd.f32 %v9977_v51, %v5350_v41  ;;  %v5312_v47 = vadd.f32 %v6422_v57, %v5046_v61  ;;  %v10070_v30 = vpop.permute.xlu1 %5477  ;;  %v10091_v32 = vpop.f32.mrf.mxu1 }
 0x7a2   : > { %v5348_v22 = vmul.f32 %v9968_v26, %v5309_v2  ;;  %v5209_v19 = vpop.f32.mrf.mxu0  ;;  %v5062_v61 = vadd.f32 %v9941_v5, %v9895_v60  ;;  %v5075_v2 = vadd.f32 %v9959_v4, %v9901_v56 }
 0x7a3   : > { %5610 = vst.msk [vmem:[%s10002_s28 + $0x38] sm:$0xff] %vm4668_vm15, %v5578_v55  ;;  %v5576_v40 = vmax.f32 %v5544_v53, 0.0  ;;  %v5549_v20 = vadd.f32 %v9972_v45, %v5389_v17  ;;  %v5351_v39 = vmul.f32 %v9968_v26, %v5312_v47  ;;  %v5310_v18 = vadd.f32 %v5209_v19, %v5038_v34  ;;  %v10104_v55 = vpop.permute.xlu0 %5483  ;;  %v10109_v17 = vpop.f32.mrf.mxu1 }
 0x7a4   : > { %v5387_v50 = vadd.f32 %v9977_v51, %v5348_v22  ;;  %v6425_v29 = vpop.f32.mrf.mxu0  ;;  %v5067_v53 = vadd.f32 %v9970_v37, %v9905_v3  ;;  %v5078_v19 = vadd.f32 %v9984_v10, %v9909_v16 }
 0x7a5   : > { %5608 = vst.msk [vmem:[%s10002_s28 + $0x28] sm:$0xff] %vm4668_vm15, %v5576_v40  ;;  %v5581_v11 = vmax.f32 %v5549_v20, 0.0  ;;  %v5390_v42 = vadd.f32 %v9977_v51, %v5351_v39  ;;  %v5349_v45 = vmul.f32 %v9968_v26, %v5310_v18  ;;  %v5315_v28 = vadd.f32 %v6425_v29, %v5059_v48  ;;  %v5482_v34 = vpop.permute.xlu1 %5481  ;;  %v6404_v29 = vpop.f32.mrf.mxu1 }
 0x7a6   : > { %v5547_v49 = vadd.f32 %v9955_v24, %v5387_v50  ;;  %v5222_v59 = vpop.f32.mrf.mxu0 }
 0x7a7   : > { %5613 = vst.msk [vmem:[%s10002_s28 + $0x50] sm:$0xff] %vm4668_vm15, %v5581_v11  ;;  %v5550_v14 = vadd.f32 %v9989_v25, %v5390_v42  ;;  %v5388_v33 = vadd.f32 %v9977_v51, %v5349_v45  ;;  %v5354_v62 = vmul.f32 %v9968_v26, %v5315_v28  ;;  %v5313_v8 = vadd.f32 %v5222_v59, %v5051_v9  ;;  %v5488_v45 = vpop.permute.xlu0 %5487 }
 0x7a8   : > { %v5579_v1 = vmax.f32 %v5547_v49, 0.0  ;;  %v6426_v24 = vpop.f32.mrf.mxu0  ;;  %v5070_v28 = vadd.f32 %v10004_v46, %v9913_v31  ;;  %v5101_v31 = vpop.f32.mrf.mxu1 }
 0x7a9   : > { %v5582_v15 = vmax.f32 %v5550_v14, 0.0  ;;  %v5548_v7 = vadd.f32 %v9963_v58, %v5388_v33  ;;  %v5393_v25 = vadd.f32 %v9977_v51, %v5354_v62  ;;  %v5352_v41 = vmul.f32 %v9968_v26, %v5313_v8  ;;  %v10122_v9 = vpop.permute.xlu1 %5485 }
 0x7aa   : > { %5611 = vst.msk [vmem:[%s10002_s28 + $0x40] sm:$0xff] %vm4668_vm15, %v5579_v1  ;;  %v5316_v60 = vadd.f32 %v6426_v24, %v5062_v61  ;;  %v5225_v13 = vpop.f32.mrf.mxu0  ;;  %v5083_v8 = vadd.f32 %v10035_v43, %v9921_v63  ;;  %v10626_v24 = vld [vmem:[#allocation38_spill] sm:$0xff] }
 0x7ab   : > { %5614 = vst.msk [vmem:[%s10002_s28 + $0x58] sm:$0xff] %vm4668_vm15, %v5582_v15  ;;  %v5580_v5 = vmax.f32 %v5548_v7, 0.0  ;;  %v5553_v23 = vadd.f32 %v10025_v44, %v5393_v25  ;;  %v5391_v58 = vadd.f32 %v9977_v51, %v5352_v41  ;;  %v5314_v57 = vadd.f32 %v5225_v13, %v5054_v6 }
 0x7ac   : > { %v5355_v56 = vmul.f32 %v9968_v26, %v5316_v60  ;;  %v6429_v4 = vpop.f32.mrf.mxu0  ;;  %v5094_v15 = vadd.f32 %v10057_v36, %v10626_v24  ;;  %v10627_v60 = vld [vmem:[#allocation39_spill] sm:$0xff] }
 0x7ad   : > { %5612 = vst.msk [vmem:[%s10002_s28 + $0x48] sm:$0xff] %vm4668_vm15, %v5580_v5  ;;  %v5585_v47 = vmax.f32 %v5553_v23, 0.0  ;;  %v5551_v44 = vadd.f32 %v9993_v54, %v5391_v58  ;;  %v5353_v48 = vmul.f32 %v9968_v26, %v5314_v57  ;;  %v5319_v22 = vadd.f32 %v6429_v4, %v5075_v2  ;;  %v5490_v1 = vpop.permute.xlu1 %5489  ;;  %v6407_v58 = vpop.f32.mrf.mxu1 }
 0x7ae   : > { %v5394_v40 = vadd.f32 %v9977_v51, %v5355_v56  ;;  %v5238_v3 = vpop.f32.mrf.mxu0  ;;  %v5086_v13 = vadd.f32 %v10075_v38, %v10627_v60 }
 0x7af   : > { %5617 = vst.msk [vmem:[%s10002_s28 + $0x70] sm:$0xff] %vm4668_vm15, %v5585_v47  ;;  %v5583_v37 = vmax.f32 %v5551_v44, 0.0  ;;  %v5392_v20 = vadd.f32 %v9977_v51, %v5353_v48  ;;  %v5358_v39 = vmul.f32 %v9968_v26, %v5319_v22  ;;  %v5317_v18 = vadd.f32 %v5238_v3, %v5067_v53  ;;  %v10629_v3 = vld [vmem:[#allocation41_spill] sm:$0xff] }
 0x7b0   : > { %v5554_v54 = vadd.f32 %v10042_v35, %v5394_v40  ;;  %v6430_v50 = vpop.f32.mrf.mxu0  ;;  %v5091_v35 = vadd.f32 %v10019_v52, %v9917_v12 }
 0x7b1   : > { %5615 = vst.msk [vmem:[%s10002_s28 + $0x60] sm:$0xff] %vm4668_vm15, %v5583_v37  ;;  %v5552_v16 = vadd.f32 %v10014_v0, %v5392_v20  ;;  %v5397_v10 = vadd.f32 %v9977_v51, %v5358_v39  ;;  %v5356_v11 = vmul.f32 %v9968_v26, %v5317_v18  ;;  %v5320_v42 = vadd.f32 %v6430_v50, %v5078_v19  ;;  %v5494_v22 = vpop.permute.xlu1 %5493  ;;  %v10628_v19 = vld [vmem:[#allocation40_spill] sm:$0xff]  ;;  %v5114_v39 = vpop.f32.mrf.mxu1 }
 0x7b2   : > { %v5586_v49 = vmax.f32 %v5554_v54, 0.0  ;;  %v5241_v59 = vpop.f32.mrf.mxu0  ;;  %v5107_v40 = vadd.f32 %v10091_v32, %v10628_v19  ;;  %v5099_v37 = vadd.f32 %v10109_v17, %v10629_v3 }
 0x7b3   : > { %v5584_v14 = vmax.f32 %v5552_v16, 0.0  ;;  %v5557_v33 = vadd.f32 %v5480_v21, %v5397_v10  ;;  %v5395_v62 = vadd.f32 %v9977_v51, %v5356_v11  ;;  %v5359_v0 = vmul.f32 %v9968_v26, %v5320_v42  ;;  %v10630_v11 = vld [vmem:[#allocation42_spill] sm:$0xff] }
 0x7b4   : > { %5618 = vst.msk [vmem:[%s10002_s28 + $0x78] sm:$0xff] %vm4668_vm15, %v5586_v49  ;;  %v5318_v61 = vadd.f32 %v5241_v59, %v5070_v28  ;;  %v6433_v6 = vpop.f32.mrf.mxu0  ;;  %v5110_v42 = vadd.f32 %v6404_v29, %v10630_v11  ;;  %v10631_v49 = vld [vmem:[#allocation43_spill] sm:$0xff] }
 0x7b5   : > { %5616 = vst.msk [vmem:[%s10002_s28 + $0x68] sm:$0xff] %vm4668_vm15, %v5584_v14  ;;  %v5589_v12 = vmax.f32 %v5557_v33, 0.0  ;;  %v5555_v46 = vadd.f32 %v10051_v27, %v5395_v62  ;;  %v5398_v52 = vadd.f32 %v9977_v51, %v5359_v0  ;;  %v5323_v21 = vadd.f32 %v6433_v6, %v5091_v35  ;;  %v5492_v27 = vpop.permute.xlu0 %5491  ;;  %v6408_v62 = vpop.f32.mrf.mxu1 }
 0x7b6   : > { %v5357_v63 = vmul.f32 %v9968_v26, %v5318_v61  ;;  %v5254_v43 = vpop.f32.mrf.mxu0  ;;  %v5102_v59 = vadd.f32 %v5101_v31, %v10631_v49  ;;  %v5498_v6 = vpop.permute.xlu1 %5497 }
 0x7b7   : > { %5621 = vst.msk [vmem:[%s10002_s28 + $0x90] sm:$0xff] %vm4668_vm15, %v5589_v12  ;;  %v5587_v7 = vmax.f32 %v5555_v46, 0.0  ;;  %v5558_v25 = vadd.f32 %v5482_v34, %v5398_v52  ;;  %v5362_v41 = vmul.f32 %v9968_v26, %v5323_v21  ;;  %v5321_v2 = vadd.f32 %v5254_v43, %v5083_v8  ;;  %v10632_v12 = vld [vmem:[#allocation44_spill] sm:$0xff] }
 0x7b8   : > { %v5396_v5 = vadd.f32 %v9977_v51, %v5357_v63  ;;  %v6434_v23 = vpop.f32.mrf.mxu0  ;;  %v5123_v46 = vadd.f32 %v6407_v58, %v10632_v12 }
 0x7b9   : > { %5619 = vst.msk [vmem:[%s10002_s28 + $0x80] sm:$0xff] %vm4668_vm15, %v5587_v7  ;;  %v5590_v36 = vmax.f32 %v5558_v25, 0.0  ;;  %v5401_v57 = vadd.f32 %v9977_v51, %v5362_v41  ;;  %v5360_v53 = vmul.f32 %v9968_v26, %v5321_v2  ;;  %v5324_v56 = vadd.f32 %v6434_v23, %v5094_v15  ;;  %v5496_v10 = vpop.permute.xlu0 %5495  ;;  %v5117_v7 = vpop.f32.mrf.mxu1  ;;  %v10634_v23 = vld [vmem:[#allocation46_spill] sm:$0xff] }
 0x7ba   : > { %v5556_v34 = vadd.f32 %v10070_v30, %v5396_v5  ;;  %v5257_v4 = vpop.f32.mrf.mxu0  ;;  %v5126_v58 = vadd.f32 %v6408_v62, %v10634_v23 }
 0x7bb   : > { %5622 = vst.msk [vmem:[%s10002_s28 + $0x98] sm:$0xff] %vm4668_vm15, %v5590_v36  ;;  %v5561_v47 = vadd.f32 %v5488_v45, %v5401_v57  ;;  %v5399_v38 = vadd.f32 %v9977_v51, %v5360_v53  ;;  %v5363_v44 = vmul.f32 %v9968_v26, %v5324_v56  ;;  %v5322_v48 = vadd.f32 %v5257_v4, %v5086_v13  ;;  %v10633_v13 = vld [vmem:[#allocation45_spill] sm:$0xff] }
 0x7bc   : > { %v5588_v20 = vmax.f32 %v5556_v34, 0.0  ;;  %v6437_v30 = vpop.f32.mrf.mxu0  ;;  %v5115_v5 = vadd.f32 %v5114_v39, %v10633_v13 }
 0x7bd   : > { %v5593_v18 = vmax.f32 %v5561_v47, 0.0  ;;  %v5559_v54 = vadd.f32 %v10104_v55, %v5399_v38  ;;  %v5402_v50 = vadd.f32 %v9977_v51, %v5363_v44  ;;  %v5361_v16 = vmul.f32 %v9968_v26, %v5322_v48  ;;  %v5500_v63 = vpop.permute.xlu0 %5499  ;;  %v10635_v47 = vld [vmem:[#allocation47_spill] sm:$0xff] }
 0x7be   : > { %5620 = vst.msk [vmem:[%s10002_s28 + $0x88] sm:$0xff] %vm4668_vm15, %v5588_v20  ;;  %v5327_v32 = vadd.f32 %v6437_v30, %v5107_v40  ;;  %v5270_v45 = vpop.f32.mrf.mxu0  ;;  %v5118_v38 = vadd.f32 %v5117_v7, %v10635_v47 }
 0x7bf   : > { %5625 = vst.msk [vmem:[%s10002_s28 + $0xb0] sm:$0xff] %vm4668_vm15, %v5593_v18  ;;  %v5591_v17 = vmax.f32 %v5559_v54, 0.0  ;;  %v5562_v28 = vadd.f32 %v5490_v1, %v5402_v50  ;;  %v5400_v35 = vadd.f32 %v9977_v51, %v5361_v16  ;;  %v5325_v55 = vadd.f32 %v5270_v45, %v5099_v37 }
 0x7c0   : > { %v5366_v14 = vmul.f32 %v9968_v26, %v5327_v32  ;;  %v6438_v33 = vpop.f32.mrf.mxu0 }
 0x7c1   : > { %5623 = vst.msk [vmem:[%s10002_s28 + $0xa0] sm:$0xff] %vm4668_vm15, %v5591_v17  ;;  %v5594_v29 = vmax.f32 %v5562_v28, 0.0  ;;  %v5560_v0 = vadd.f32 %v10122_v9, %v5400_v35  ;;  %v5364_v8 = vmul.f32 %v9968_v26, %v5325_v55  ;;  %v5328_v61 = vadd.f32 %v6438_v33, %v5110_v42  ;;  %v5504_v20 = vpop.permute.xlu0 %5503 }
 0x7c2   : > { %v5405_v52 = vadd.f32 %v9977_v51, %v5366_v14  ;;  %v5273_v21 = vpop.f32.mrf.mxu0 }
 0x7c3   : > { %5626 = vst.msk [vmem:[%s10002_s28 + $0xb8] sm:$0xff] %vm4668_vm15, %v5594_v29  ;;  %v5592_v31 = vmax.f32 %v5560_v0, 0.0  ;;  %v5403_v1 = vadd.f32 %v9977_v51, %v5364_v8  ;;  %v5367_v24 = vmul.f32 %v9968_v26, %v5328_v61  ;;  %v5326_v15 = vadd.f32 %v5273_v21, %v5102_v59 }
 0x7c4   : > { %v5565_v9 = vadd.f32 %v5496_v10, %v5405_v52  ;;  %v6441_v43 = vpop.f32.mrf.mxu0 }
 0x7c5   : > { %5624 = vst.msk [vmem:[%s10002_s28 + $0xa8] sm:$0xff] %vm4668_vm15, %v5592_v31  ;;  %v5563_v25 = vadd.f32 %v5492_v27, %v5403_v1  ;;  %v5406_v41 = vadd.f32 %v9977_v51, %v5367_v24  ;;  %v5365_v2 = vmul.f32 %v9968_v26, %v5326_v15  ;;  %v5331_v60 = vadd.f32 %v6441_v43, %v5123_v46  ;;  %v5502_v27 = vpop.permute.xlu1 %5501 }
 0x7c6   : > { %v5597_v36 = vmax.f32 %v5565_v9, 0.0  ;;  %v5286_v57 = vpop.f32.mrf.mxu0 }
 0x7c7   : > { %v5595_v53 = vmax.f32 %v5563_v25, 0.0  ;;  %v5566_v56 = vadd.f32 %v5498_v6, %v5406_v41  ;;  %v5404_v34 = vadd.f32 %v9977_v51, %v5365_v2  ;;  %v5370_v4 = vmul.f32 %v9968_v26, %v5331_v60 }
 0x7c8   : > { %5629 = vst.msk [vmem:[%s10002_s28 + $0xd0] sm:$0xff] %vm4668_vm15, %v5597_v36  ;;  %v5329_v44 = vadd.f32 %v5286_v57, %v5115_v5  ;;  %v6442_v48 = vpop.f32.mrf.mxu0 }
 0x7c9   : > { %5627 = vst.msk [vmem:[%s10002_s28 + $0xc0] sm:$0xff] %vm4668_vm15, %v5595_v53  ;;  %v5598_v19 = vmax.f32 %v5566_v56, 0.0  ;;  %v5564_v40 = vadd.f32 %v5494_v22, %v5404_v34  ;;  %v5409_v3 = vadd.f32 %v9977_v51, %v5370_v4  ;;  %v5332_v37 = vadd.f32 %v6442_v48, %v5126_v58  ;;  %v5506_v32 = vpop.permute.xlu1 %5505 }
 0x7ca   : > { %v5368_v30 = vmul.f32 %v9968_v26, %v5329_v44  ;;  %v5289_v39 = vpop.f32.mrf.mxu0 }
 0x7cb   : > { %5630 = vst.msk [vmem:[%s10002_s28 + $0xd8] sm:$0xff] %vm4668_vm15, %v5598_v19  ;;  %v5596_v18 = vmax.f32 %v5564_v40, 0.0  ;;  %v5569_v54 = vadd.f32 %v5504_v20, %v5409_v3  ;;  %v5371_v50 = vmul.f32 %v9968_v26, %v5332_v37  ;;  %v5330_v16 = vadd.f32 %v5289_v39, %v5118_v38 }
 0x7cc   : > { %v5407_v10 = vadd.f32 %v9977_v51, %v5368_v30 }
 0x7cd   : > { %5628 = vst.msk [vmem:[%s10002_s28 + $0xc8] sm:$0xff] %vm4668_vm15, %v5596_v18  ;;  %v5601_v22 = vmax.f32 %v5569_v54, 0.0  ;;  %v5410_v11 = vadd.f32 %v9977_v51, %v5371_v50  ;;  %v5369_v42 = vmul.f32 %v9968_v26, %v5330_v16 }
 0x7ce   : > { %v5567_v45 = vadd.f32 %v5500_v63, %v5407_v10 }
 0x7cf   : > { %5633 = vst.msk [vmem:[%s10002_s28 + $0xf0] sm:$0xff] %vm4668_vm15, %v5601_v22  ;;  %v5570_v17 = vadd.f32 %v5506_v32, %v5410_v11  ;;  %v5408_v28 = vadd.f32 %v9977_v51, %v5369_v42 }
 0x7d0   : > { %v5599_v35 = vmax.f32 %v5567_v45, 0.0 }
 0x7d1   : > { %v5602_v55 = vmax.f32 %v5570_v17, 0.0  ;;  %v5568_v49 = vadd.f32 %v5502_v27, %v5408_v28 }
 0x7d2   : > { %5631 = vst.msk [vmem:[%s10002_s28 + $0xe0] sm:$0xff] %vm4668_vm15, %v5599_v35 }
 0x7d3   : > { %5634 = vst.msk [vmem:[%s10002_s28 + $0xf8] sm:$0xff] %vm4668_vm15, %v5602_v55  ;;  %v5600_v59 = vmax.f32 %v5568_v49, 0.0 }
 0x7d5   : > { %5632 = vst.msk [vmem:[%s10002_s28 + $0xe8] sm:$0xff] %vm4668_vm15, %v5600_v59 }
 0x7d6 PF: > { %s31_s20 = sadd.s32 1, %s6698_s20  }
 0x7d7   : > { %p28_p4 = scmp.ge.s32.totalorder %s31_s20, 4  }
 0x7d9   :  { %30 = sbr.rel (!%p28_p4) target bundleno = 5 (0x5), region = 133 }

</bundles_post_ra>
